<compile_context>
chip_gen: v7x
topology: tpu7x:2x2x1
jax: 0.10.0
libtpu: 0.0.40
codegen_flags: <defaults>
</compile_context>

<pallas_src>
import functools

import jax
import jax.numpy as jnp
from jax.experimental import pallas as pl
from jax.experimental.pallas import tpu as pltpu


def _sigmoid_via_tanh(z):
    # sigmoid(z) == 0.5 * (tanh(z/2) + 1)  -> one EUP transcendental instead of exp + recip.
    return 0.5 * (jnp.tanh(0.5 * z) + 1.0)


def _attn_res2_kernel(x_ref,
                      w1_ref, b1_ref,      # fused layer-1 gates [L, 2(D+M)], [1, 2(D+M)]
                      w2_ref, b2_ref,      # fused layer-2 gates [M, 2D],     [1, 2D]
                      wha_ref, whb_ref,    # head: (1, D) f32 each if vpu_head else (D, C) bf16
                      bh_ref,              # [1, C] f32
                      out_ref,
                      *, D, M, ew_dtype, vpu_head):
    # In-kernel cast rides free VPU slots under MXU work (no separate XLA HBM cast pass).
    x = x_ref[...].astype(jnp.bfloat16)                              # [tn, L]

    # ---- one MXU pass of x through all four first-layer gate weights -> f32 [tn, 2(D+M)]
    z1 = jnp.dot(x, w1_ref[...], preferred_element_type=jnp.float32) + b1_ref[...]
    z1 = z1.astype(ew_dtype)
    DM = D + M
    t = jnp.tanh(z1[:, :DM])                     # tanh group:    [Wa1 | Wda] columns
    s = _sigmoid_via_tanh(z1[:, DM:])            # sigmoid group: [Wb1 | Wdb] columns
    g = t * s
    A1 = g[:, :D]                                # gated branch 1    [tn, D]
    H = g[:, D:]                                 # double-net hidden [tn, M]

    # ---- second gated layer of the double branch -> A2 [tn, D]
    z2 = jnp.dot(H.astype(jnp.bfloat16), w2_ref[...],
                 preferred_element_type=jnp.float32) + b2_ref[...]
    z2 = z2.astype(ew_dtype)
    A2 = jnp.tanh(z2[:, :D]) * _sigmoid_via_tanh(z2[:, D:])

    # ---- Parallel_Linear head summed over the two branches (no [A1|A2] concat buffer)
    if vpu_head:
        # n_classes == 1: the MXU would pad the single output column to a full tile; the
        # multiply + cross-lane reduce on VPU/XLU is free under the MXU-bound core instead.
        contrib = (A1.astype(jnp.float32) * wha_ref[...]
                   + A2.astype(jnp.float32) * whb_ref[...])
        out = jnp.sum(contrib, axis=-1, keepdims=True) + bh_ref[...]
    else:
        out = (jnp.dot(A1.astype(jnp.bfloat16), wha_ref[...],
                       preferred_element_type=jnp.float32)
               + jnp.dot(A2.astype(jnp.bfloat16), whb_ref[...],
                         preferred_element_type=jnp.float32)
               + bh_ref[...])
    out_ref[...] = out.astype(out_ref.dtype)


def _round_up(v, m):
    return (v + m - 1) // m * m


def _device_kind():
    try:
        return jax.devices()[0].device_kind.lower()
    except Exception:
        return ""


def prepare_params(params):
    """One-time weight prep (hoisted out of the per-call jitted path, per perf review)."""
    f32, bf16 = jnp.float32, jnp.bfloat16
    D = params["wa1"].shape[0]          # nn.Linear(L, D).weight is [D, L]
    M = params["wda"].shape[0]          # nn.Linear(L, M).weight is [M, L]
    n_classes = params["wp"].shape[1]   # Parallel_Linear weight is [2, n_classes, D]
    # Layer-1 gates fused as [tanh-group | sigmoid-group] = [Wa1 | Wda | Wb1 | Wdb].
    w1 = jnp.concatenate(
        [params["wa1"].T, params["wda"].T, params["wb1"].T, params["wdb"].T],
        axis=1).astype(bf16)                                                       # [L, 2(D+M)]
    b1 = jnp.concatenate(
        [params["ba1"], params["bda"], params["bb1"], params["bdb"]]
    ).reshape(1, 2 * (D + M)).astype(f32)
    w2 = jnp.concatenate([params["wdc"].T, params["wdd"].T], axis=1).astype(bf16)  # [M, 2D]
    b2 = jnp.concatenate([params["bdc"], params["bdd"]]).reshape(1, 2 * D).astype(f32)
    bh = (params["bp"][0] + params["bp"][1]).reshape(1, n_classes).astype(f32)
    if n_classes == 1:
        # VPU-head layout: lane-dense weight rows, kept f32 (elementwise path, not MXU).
        wha = params["wp"][0, 0].reshape(1, D).astype(f32)
        whb = params["wp"][1, 0].reshape(1, D).astype(f32)
    else:
        wha = params["wp"][0].T.astype(bf16)                                       # [D, C]
        whb = params["wp"][1].T.astype(bf16)
    return {"w1": w1, "b1": b1, "w2": w2, "b2": b2, "wha": wha, "whb": whb, "bh": bh}


@functools.partial(jax.jit, static_argnames=("tile_n",))
def attn_net_res2(x, prepped, tile_n=None):
    """x: [N, L] float32; prepped: output of prepare_params. Returns (A [N, C], x)."""
    N, L = x.shape
    w1, b1 = prepped["w1"], prepped["b1"]
    w2, b2 = prepped["w2"], prepped["b2"]
    wha, whb, bh = prepped["wha"], prepped["whb"], prepped["bh"]
    wid1 = w1.shape[1]
    M = w2.shape[0]
    D = w2.shape[1] // 2
    n_classes = bh.shape[1]
    vpu_head = (n_classes == 1)

    # Per-generation knobs (trace-time host query; f32 elementwise is the safe default).
    kind = _device_kind()
    is_v7 = ("7x" in kind) or ("v7" in kind)
    bf16_elementwise = is_v7 or ("v6" in kind)     # v5e VPU/EUP have no bf16 path -> keep f32
    ew_dtype = jnp.bfloat16 if bf16_elementwise else jnp.float32
    vmem_limit = (48 if is_v7 else 96) * 1024 * 1024

    # Row tile: multiples of 256 keep v6e/v7x 256-wide MXU tiles fully populated (512 also
    # fits v5e's 128-wide tiles); the cap keeps f32 intermediates well inside VMEM on v7x and
    # gives the "parallel" grid axis >=2 steps so both v7x TensorCores get work.
    if tile_n is None:
        cap = 1024 if (not bf16_elementwise and "v5" in kind) else 512
        tn = min(cap, _round_up(N, 256))
    else:
        tn = min(max(16, _round_up(tile_n, 16)), _round_up(N, 16))
    grid_n = pl.cdiv(N, tn)     # ragged last tile handled by Pallas partial-block masking

    # Constant index maps: weight/bias blocks are DMA'd only once (block index never changes).
    # TODO(synk): on jax versions where pipeline_mode=pl.Buffered(1) is fully supported,
    # single-buffer these constant blocks to reclaim extra VMEM headroom on v7x.
    const = lambda shape: pl.BlockSpec(shape, lambda i: (0, 0))

    head_flops = 4 * N * D if vpu_head else 2 * N * 2 * D * n_classes
    head_w_bytes = (2 * D * 4) if vpu_head else (2 * D * n_classes * 2)
    flops = 2 * N * L * wid1 + 2 * N * M * 2 * D + head_flops
    transcendentals = N * (wid1 + 2 * D)
    bytes_accessed = (N * L * 4                                      # f32 x (cast in-kernel)
                      + (L * wid1 + M * 2 * D) * 2 + head_w_bytes    # weights
                      + (wid1 + 2 * D + n_classes) * 4               # biases
                      + N * n_classes * 4)                           # f32 output

    A = pl.pallas_call(
        functools.partial(_attn_res2_kernel, D=D, M=M,
                          ew_dtype=ew_dtype, vpu_head=vpu_head),
        out_shape=jax.ShapeDtypeStruct((N, n_classes), jnp.float32),
        grid_spec=pltpu.PrefetchScalarGridSpec(
            num_scalar_prefetch=0,
            grid=(grid_n,),
            in_specs=[
                pl.BlockSpec((tn, L), lambda i: (i, 0)),      # f32 x row tile (pipelined)
                const(w1.shape), const(b1.shape),             # fused layer-1 gates
                const(w2.shape), const(b2.shape),             # fused layer-2 gates
                const(wha.shape), const(whb.shape),           # head weights
                const(bh.shape),                              # head bias
            ],
            out_specs=pl.BlockSpec((tn, n_classes), lambda i: (i, 0)),
        ),
        compiler_params=pltpu.CompilerParams(
            dimension_semantics=("parallel",),
            vmem_limit_bytes=vmem_limit,
        ),
        cost_estimate=pl.CostEstimate(
            flops=flops, transcendentals=transcendentals, bytes_accessed=bytes_accessed),
    )(x, w1, b1, w2, b2, wha, whb, bh)

    return A, x


def init_params(key, L, D, M, n_classes):
    """Deterministic synthetic init mirroring the PyTorch module's parameter shapes."""
    ks = jax.random.split(key, 14)
    u = lambda k, shape, bound: jax.random.uniform(
        k, shape, jnp.float32, minval=-bound, maxval=bound)
    bL, bM, bD = 1.0 / (L ** 0.5), 1.0 / (M ** 0.5), 1.0 / (D ** 0.5)
    return {
        # Attn_Net_Gated_Without_Fc: two Linear(L, D)
        "wa1": u(ks[0], (D, L), bL), "ba1": u(ks[1], (D,), bL),
        "wb1": u(ks[2], (D, L), bL), "bb1": u(ks[3], (D,), bL),
        # Attn_Net_Double_Without_Fc: two Linear(L, M), two Linear(M, D)
        "wda": u(ks[4], (M, L), bL), "bda": u(ks[5], (M,), bL),
        "wdb": u(ks[6], (M, L), bL), "bdb": u(ks[7], (M,), bL),
        "wdc": u(ks[8], (D, M), bM), "bdc": u(ks[9], (D,), bM),
        "wdd": u(ks[10], (D, M), bM), "bdd": u(ks[11], (D,), bM),
        # Parallel_Linear: weight [2, n_classes, D], bias [2, n_classes]
        "wp": u(ks[12], (2, n_classes, D), bD),
        "bp": u(ks[13], (2, n_classes), bD),
    }


def _reference(x, p):
    """Pure-JAX f32 reference matching the PyTorch forward exactly."""
    A1 = jnp.tanh(x @ p["wa1"].T + p["ba1"]) * jax.nn.sigmoid(x @ p["wb1"].T + p["bb1"])
    H = jnp.tanh(x @ p["wda"].T + p["bda"]) * jax.nn.sigmoid(x @ p["wdb"].T + p["bdb"])
    A2 = jnp.tanh(H @ p["wdc"].T + p["bdc"]) * jax.nn.sigmoid(H @ p["wdd"].T + p["bdd"])
    A_stack = jnp.stack([A1, A2], axis=1)                            # [N, 2, D]
    out = jnp.einsum("kci,coi->kco", A_stack, p["wp"]) + p["bp"][None]
    return out.sum(axis=1), x


if __name__ == "__main__":
    # TODO(synk): train-mode nn.Dropout(0.25) branches are not implemented; this is the eval
    # path (module default dropout=False).
    # Scaled-down shapes consistent with the module defaults (L=1024, D=256, M=512, n_classes=1).
    N, L, D, M, n_classes = 600, 64, 16, 32, 1
    key = jax.random.PRNGKey(0)
    kx, kp = jax.random.split(key)
    x = jax.random.normal(kx, (N, L), dtype=jnp.float32)
    params = init_params(kp, L, D, M, n_classes)
    prepped = prepare_params(params)        # one-time weight prep, outside the jitted call

    # Default tile (512) -> 2-step "parallel" grid with a ragged last tile (88 valid rows).
    A, x_out = attn_net_res2(x, prepped)
    A = jax.block_until_ready(A)
    x_out = jax.block_until_ready(x_out)

    A_ref, _ = _reference(x, params)
    assert A.shape == (N, n_classes)
    assert x_out.shape == x.shape
    max_err = float(jnp.max(jnp.abs(A - A_ref)))
    # bf16 MXU inputs (plus bf16 elementwise on v6e/v7x) vs the f32 reference.
    assert jnp.allclose(A, A_ref, atol=3e-2, rtol=3e-2), f"max abs err {max_err}"
    assert jnp.array_equal(x_out, x)

    print("KERNEL_OK")
</pallas_src>

<mosaic_0001>
module attributes {stable_mosaic.version = 11 : i64} {
  func.func @_attn_res2_kernel(%arg0: i32, %arg1: memref<512x64xf32, #tpu.memory_space<vmem>>, %arg2: memref<64x96xbf16, #tpu.memory_space<vmem>>, %arg3: memref<1x96xf32, #tpu.memory_space<vmem>>, %arg4: memref<32x32xbf16, #tpu.memory_space<vmem>>, %arg5: memref<1x32xf32, #tpu.memory_space<vmem>>, %arg6: memref<1x16xf32, #tpu.memory_space<vmem>>, %arg7: memref<1x16xf32, #tpu.memory_space<vmem>>, %arg8: memref<1x1xf32, #tpu.memory_space<vmem>>, %arg9: memref<512x1xf32, #tpu.memory_space<vmem>>) attributes {dimension_semantics = [#tpu.dimension_semantics<parallel>], iteration_bounds = array<i64: 2>, scalar_prefetch = 0 : i64, scratch_operands = 0 : i64, tpu.core_type = #tpu.core_type<tc>, window_params = [{transform_indices = @transform_0, window_bounds = array<i64: 512, 64>}, {pipeline_mode = #tpu.pipeline_mode<synchronous>, transform_indices = @transform_1, window_bounds = array<i64: 64, 96>}, {pipeline_mode = #tpu.pipeline_mode<synchronous>, transform_indices = @transform_2, window_bounds = array<i64: 1, 96>}, {pipeline_mode = #tpu.pipeline_mode<synchronous>, transform_indices = @transform_3, window_bounds = array<i64: 32, 32>}, {pipeline_mode = #tpu.pipeline_mode<synchronous>, transform_indices = @transform_4, window_bounds = array<i64: 1, 32>}, {pipeline_mode = #tpu.pipeline_mode<synchronous>, transform_indices = @transform_5, window_bounds = array<i64: 1, 16>}, {pipeline_mode = #tpu.pipeline_mode<synchronous>, transform_indices = @transform_6, window_bounds = array<i64: 1, 16>}, {pipeline_mode = #tpu.pipeline_mode<synchronous>, transform_indices = @transform_7, window_bounds = array<i64: 1, 1>}, {transform_indices = @transform_8, window_bounds = array<i64: 512, 1>}]} {
    %c0 = arith.constant 0 : index
    %c0_0 = arith.constant 0 : index
    %0 = vector.load %arg1[%c0, %c0_0] : memref<512x64xf32, #tpu.memory_space<vmem>>, vector<512x64xf32>
    %1 = arith.truncf %0 : vector<512x64xf32> to vector<512x64xbf16>
    %c0_1 = arith.constant 0 : index
    %c0_2 = arith.constant 0 : index
    %2 = vector.load %arg2[%c0_1, %c0_2] : memref<64x96xbf16, #tpu.memory_space<vmem>>, vector<64x96xbf16>
    %cst = arith.constant dense<0.000000e+00> : vector<512x96xf32>
    %3 = tpu.matmul %1, %2, %cst {dimension_numbers = #tpu.dot_dimension_numbers<[1], [0], [0], [1], [0, 0, 1, 1], [], []>} : vector<512x64xbf16>, vector<64x96xbf16>, vector<512x96xf32> -> vector<512x96xf32>
    %c0_3 = arith.constant 0 : index
    %c0_4 = arith.constant 0 : index
    %4 = vector.load %arg3[%c0_3, %c0_4] : memref<1x96xf32, #tpu.memory_space<vmem>>, vector<1x96xf32>
    %5 = vector.broadcast %4 : vector<1x96xf32> to vector<512x96xf32>
    %6 = arith.addf %3, %5 : vector<512x96xf32>
    %7 = vector.extract_strided_slice %6 {offsets = [0, 0], sizes = [512, 48], strides = [1, 1]} : vector<512x96xf32> to vector<512x48xf32>
    %8 = math.tanh %7 : vector<512x48xf32>
    %9 = vector.extract_strided_slice %6 {offsets = [0, 48], sizes = [512, 48], strides = [1, 1]} : vector<512x96xf32> to vector<512x48xf32>
    %cst_5 = arith.constant 5.000000e-01 : f32
    %10 = vector.broadcast %cst_5 : f32 to vector<512x48xf32>
    %11 = arith.mulf %10, %9 : vector<512x48xf32>
    %12 = math.tanh %11 : vector<512x48xf32>
    %cst_6 = arith.constant 1.000000e+00 : f32
    %13 = vector.broadcast %cst_6 : f32 to vector<512x48xf32>
    %14 = arith.addf %12, %13 : vector<512x48xf32>
    %cst_7 = arith.constant 5.000000e-01 : f32
    %15 = vector.broadcast %cst_7 : f32 to vector<512x48xf32>
    %16 = arith.mulf %15, %14 : vector<512x48xf32>
    %17 = arith.mulf %8, %16 : vector<512x48xf32>
    %18 = vector.extract_strided_slice %17 {offsets = [0, 0], sizes = [512, 16], strides = [1, 1]} : vector<512x48xf32> to vector<512x16xf32>
    %19 = vector.extract_strided_slice %17 {offsets = [0, 16], sizes = [512, 32], strides = [1, 1]} : vector<512x48xf32> to vector<512x32xf32>
    %20 = arith.truncf %19 : vector<512x32xf32> to vector<512x32xbf16>
    %c0_8 = arith.constant 0 : index
    %c0_9 = arith.constant 0 : index
    %21 = vector.load %arg4[%c0_8, %c0_9] : memref<32x32xbf16, #tpu.memory_space<vmem>>, vector<32x32xbf16>
    %cst_10 = arith.constant dense<0.000000e+00> : vector<512x32xf32>
    %22 = tpu.matmul %20, %21, %cst_10 {dimension_numbers = #tpu.dot_dimension_numbers<[1], [0], [0], [1], [0, 0, 1, 1], [], []>} : vector<512x32xbf16>, vector<32x32xbf16>, vector<512x32xf32> -> vector<512x32xf32>
    %c0_11 = arith.constant 0 : index
    %c0_12 = arith.constant 0 : index
    %23 = vector.load %arg5[%c0_11, %c0_12] : memref<1x32xf32, #tpu.memory_space<vmem>>, vector<1x32xf32>
    %24 = vector.broadcast %23 : vector<1x32xf32> to vector<512x32xf32>
    %25 = arith.addf %22, %24 : vector<512x32xf32>
    %26 = vector.extract_strided_slice %25 {offsets = [0, 0], sizes = [512, 16], strides = [1, 1]} : vector<512x32xf32> to vector<512x16xf32>
    %27 = math.tanh %26 : vector<512x16xf32>
    %28 = vector.extract_strided_slice %25 {offsets = [0, 16], sizes = [512, 16], strides = [1, 1]} : vector<512x32xf32> to vector<512x16xf32>
    %cst_13 = arith.constant 5.000000e-01 : f32
    %29 = vector.broadcast %cst_13 : f32 to vector<512x16xf32>
    %30 = arith.mulf %29, %28 : vector<512x16xf32>
    %31 = math.tanh %30 : vector<512x16xf32>
    %cst_14 = arith.constant 1.000000e+00 : f32
    %32 = vector.broadcast %cst_14 : f32 to vector<512x16xf32>
    %33 = arith.addf %31, %32 : vector<512x16xf32>
    %cst_15 = arith.constant 5.000000e-01 : f32
    %34 = vector.broadcast %cst_15 : f32 to vector<512x16xf32>
    %35 = arith.mulf %34, %33 : vector<512x16xf32>
    %36 = arith.mulf %27, %35 : vector<512x16xf32>
    %c0_16 = arith.constant 0 : index
    %c0_17 = arith.constant 0 : index
    %37 = vector.load %arg6[%c0_16, %c0_17] : memref<1x16xf32, #tpu.memory_space<vmem>>, vector<1x16xf32>
    %38 = vector.broadcast %37 : vector<1x16xf32> to vector<512x16xf32>
    %39 = arith.mulf %18, %38 : vector<512x16xf32>
    %c0_18 = arith.constant 0 : index
    %c0_19 = arith.constant 0 : index
    %40 = vector.load %arg7[%c0_18, %c0_19] : memref<1x16xf32, #tpu.memory_space<vmem>>, vector<1x16xf32>
    %41 = vector.broadcast %40 : vector<1x16xf32> to vector<512x16xf32>
    %42 = arith.mulf %36, %41 : vector<512x16xf32>
    %43 = arith.addf %39, %42 : vector<512x16xf32>
    %cst_20 = arith.constant dense<0.000000e+00> : vector<512xf32>
    %44 = vector.multi_reduction <add>, %43, %cst_20 [1] : vector<512x16xf32> to vector<512xf32>
    %45 = vector.shape_cast %44 : vector<512xf32> to vector<512x1xf32>
    %c0_21 = arith.constant 0 : index
    %c0_22 = arith.constant 0 : index
    %46 = vector.load %arg8[%c0_21, %c0_22] : memref<1x1xf32, #tpu.memory_space<vmem>>, vector<1x1xf32>
    %47 = vector.broadcast %46 : vector<1x1xf32> to vector<512x1xf32>
    %48 = arith.addf %45, %47 : vector<512x1xf32>
    %c0_23 = arith.constant 0 : index
    %c0_24 = arith.constant 0 : index
    %49 = vector.load %arg9[%c0_23, %c0_24] : memref<512x1xf32, #tpu.memory_space<vmem>>, vector<512x1xf32>
    tpu.vector_store %arg9[%c0_23, %c0_24], %48 {strides = array<i32>} : memref<512x1xf32, #tpu.memory_space<vmem>>, vector<512x1xf32>,
    return
  }
  func.func @transform_0(%arg0: i32) -> (i32, i32) {
    %c0_i32 = arith.constant 0 : i32
    %c0_i32_0 = arith.constant 0 : i32
    return %arg0, %c0_i32 : i32, i32
  }
  func.func @transform_1(%arg0: i32) -> (i32, i32) {
    %c0_i32 = arith.constant 0 : i32
    %c0_i32_0 = arith.constant 0 : i32
    %c0_i32_1 = arith.constant 0 : i32
    return %c0_i32, %c0_i32_0 : i32, i32
  }
  func.func @transform_2(%arg0: i32) -> (i32, i32) {
    %c0_i32 = arith.constant 0 : i32
    %c0_i32_0 = arith.constant 0 : i32
    %c0_i32_1 = arith.constant 0 : i32
    return %c0_i32, %c0_i32_0 : i32, i32
  }
  func.func @transform_3(%arg0: i32) -> (i32, i32) {
    %c0_i32 = arith.constant 0 : i32
    %c0_i32_0 = arith.constant 0 : i32
    %c0_i32_1 = arith.constant 0 : i32
    return %c0_i32, %c0_i32_0 : i32, i32
  }
  func.func @transform_4(%arg0: i32) -> (i32, i32) {
    %c0_i32 = arith.constant 0 : i32
    %c0_i32_0 = arith.constant 0 : i32
    %c0_i32_1 = arith.constant 0 : i32
    return %c0_i32, %c0_i32_0 : i32, i32
  }
  func.func @transform_5(%arg0: i32) -> (i32, i32) {
    %c0_i32 = arith.constant 0 : i32
    %c0_i32_0 = arith.constant 0 : i32
    %c0_i32_1 = arith.constant 0 : i32
    return %c0_i32, %c0_i32_0 : i32, i32
  }
  func.func @transform_6(%arg0: i32) -> (i32, i32) {
    %c0_i32 = arith.constant 0 : i32
    %c0_i32_0 = arith.constant 0 : i32
    %c0_i32_1 = arith.constant 0 : i32
    return %c0_i32, %c0_i32_0 : i32, i32
  }
  func.func @transform_7(%arg0: i32) -> (i32, i32) {
    %c0_i32 = arith.constant 0 : i32
    %c0_i32_0 = arith.constant 0 : i32
    %c0_i32_1 = arith.constant 0 : i32
    return %c0_i32, %c0_i32_0 : i32, i32
  }
  func.func @transform_8(%arg0: i32) -> (i32, i32) {
    %c0_i32 = arith.constant 0 : i32
    %c0_i32_0 = arith.constant 0 : i32
    return %arg0, %c0_i32 : i32, i32
  }
}

</mosaic_0001>

<bundles_post_ra>
// kernel: attn_net_res2.1
= control target key start
LH: loop header
LB: loop body
LE: loop exit
PB: predicated region body
PF: predicated region fallthrough
CT: control target
= control target key end

     0   :  { %s6887_s0 = inlined_call_operand.hbm [shape: f32[600,64], index: 0, kind: input, shape index: {}]   ;;  %s6888_s1 = inlined_call_operand.hbm [shape: bf16[64,96], index: 1, kind: input, shape index: {}]   ;;  %s6889_s2 = inlined_call_operand.hbm [shape: f32[1,96], index: 2, kind: input, shape index: {}]   ;;  %s6890_s3 = inlined_call_operand.hbm [shape: bf16[32,32], index: 3, kind: input, shape index: {}]   ;;  %s6891_s4 = inlined_call_operand.hbm [shape: f32[1,32], index: 4, kind: input, shape index: {}]   ;;  %s6892_s5 = inlined_call_operand.hbm [shape: f32[1,16], index: 5, kind: input, shape index: {}]   ;;  %s6893_s6 = inlined_call_operand.hbm [shape: f32[1,16], index: 6, kind: input, shape index: {}]   ;;  %s6894_s7 = inlined_call_operand.<no memory space> [shape: f32[1,1], index: 7, kind: input, shape index: {}]   ;;  %s6895_s8 = inlined_call_operand.hbm [shape: f32[600,1], index: 8, kind: output, shape index: {}]  }
   0x1   :  { %6988 = sst [smem:[#allocation93_spill]] %s6888_s1  ;;  %v13_v0 = vstv %s6894_s7 }
   0x2   :  { %6989 = sst [smem:[#allocation94_spill]] %s6895_s8  ;;  %14 = vst [vmem:[#allocation2] sm:$0x1] %v13_v0 }
   0x3   :  { %15 = vsyncpa [#allocation4], 0 }
   0x4   :  { %17 = vsyncpa [#allocation4 + $0x1], 0 }
   0x5   :  { %18 = vsyncpa [#allocation7], 0 }
   0x6   :  { %19 = vsyncpa [#allocation10], 0 }
   0x7   :  { %20 = vsyncpa [#allocation13], 0 }
   0x8   :  { %21 = vsyncpa [#allocation5], 0 }
   0x9   :  { %23 = vsyncpa [#allocation5 + $0x1], 0  ;;  %s4736_s29 = smov 0   ;;  %s4738_s30 = smov 0  }
   0xa   :  { %s4740_s9 = smov 0   ;;  %s4742_s10 = smov 0  }
   0xb LB: > { %6990 = sst [smem:[#allocation21_spill]] %s4658_s29  ;;  %s4757_s7 = sadd.s32 4294967295, %s4670_s10   ;;  %s4670_s10 = sphi %s4742_s10, %s7206_s10   ;;  %s4666_s9 = sphi %s4740_s9, %s7210_s9   ;;  %s4662_s30 = sphi %s4738_s30, %s7209_s30   ;;  %s4658_s29 = sphi %s4736_s29, %s7208_s29  }
   0xc   : > { %s3445_s11 = sadd.s32 4294967294, %s4670_s10   ;;  %s4761_s12 = sadd.s32 1, %s4670_s10  }
   0xd   : > { %6991 = sst [smem:[#allocation22_spill]] %s4761_s12  ;;  %s36_s13 = sadd.s32 1, %s4666_s9 }
   0xe   : > { %s33_s14 = ssub.s32 %s4670_s10, %s4761_s12  ;;  %p43_p0 = scmp.ne.s32.totalorder %s4666_s9, %s4662_s30 }
   0xf   : > { %p34_p1 = scmp.eq.s32.totalorder %s33_s14, 0  ;;  %p44_p2 = scmp.eq.s32.totalorder %s4670_s10, 0 }
  0x10   : > { %p49_p3 = scmp.ne.s32.totalorder %s4662_s30, %s4658_s29  ;;  %p6896_p4 = scmp.eq.s32.totalorder %s4757_s7, 0 }
  0x11   : > { %s4773_s15 = scalar_select %p34_p1, %s4666_s9, %s36_s13  }
  0x12   : > { %p4775_p5 = por %p44_p2, %p43_p0  ;;  %p4781_p6 = por %p6896_p4, %p49_p3 }
  0x13   : > { %6992 = sst [smem:[#allocation23_spill]] %s4773_s15  ;;  %p220_p7 = scmp.eq.s32.totalorder %s4757_s7, 1 }
  0x14   : > { %s6993_s16 = scalar_select %p4775_p5, 1, 0 }
  0x15   : > { %s6994_s17 = scalar_select %p4781_p6, 1, 0 }
  0x16   : > { %p226_p8 = scmp.eq.s32.totalorder %s3445_s11, 1  ;;  %p3446_p9 = scmp.ge.s32.totalorder %s4670_s10, 1 }
  0x17   : > { %p233_p10 = scmp.lt.s32.totalorder %s4670_s10, 3  ;;  %p4788_p11 = por %p220_p7, %p43_p0 }
  0x18   : > { %p4792_p12 = por %p226_p8, %p49_p3  ;;  %s4672_s21 = smov [#allocation6]  }
  0x19   : > { %s6995_s18 = scalar_select %p4788_p11, 1, 0 }
  0x1a   : > { %s6996_s19 = scalar_select %p4792_p12, 1, 0 }
  0x1b   : > { %p4796_p13 = pnand %p3446_p9, %p233_p10  ;;  %s245_s22 = sshll.u32 %s4672_s21, 4  ;;  %s246_s22 = int_to_ptr.vmem [resolvable:$true] %s245_s22 }
  0x1c   : > { %6997 = sst [smem:[#allocation24_spill]] %s6996_s19  ;;  %s4673_s24 = smov [#allocation9]  }
  0x1d   : > { %s6998_s20 = scalar_select %p4796_p13, 1, 0 }
  0x1e   : > { %p3792_p1 = pneg %p4796_p13  ;;  %s269_s25 = sshll.u32 %s4673_s24, 4  ;;  %s4808_s25 = int_to_ptr.vmem [resolvable:$true] %s269_s25 }
  0x1f   : > { %s7000_s1 = sld [smem:[#allocation93_spill]] }
  0x20   : > { %p4804_p2 = pnand %p3792_p1, %p6896_p4 }
  0x22   : > { %p4818_p3 = pneg %p4804_p2 }
  0x25   : > { %s4396_s28 = scalar_lea.hbm %s7000_s1, 512 }
  0x26   : > { %p4397_p0 = scmp.ne.s32.totalorder %s7000_s1, %s4396_s28  ;;  %p4403_p9 = scmp.lt.u32.totalorder %s4396_s28, %s7000_s1 }
  0x28   : > { %p4399_p7 = pnand %p4818_p3, %p4397_p0 }
  0x2a   : > { %p4400_p8 = pneg %p4399_p7 }
  0x2c   : > { %p4405_p10 = pnand %p4403_p9, %p4400_p8 }
  0x2e   : > { %4408 = shalt.err (!%p4405_p10)
}
  0x2f   : > { %s4409_s26 = scalar_lea.vmem %s246_s22, 512  ;;  %p4417_p11 = scmp.lt.s32.totalorder %s246_s22, %s246_s22 }
  0x30   : > { %p4410_p1 = scmp.ne.s32.totalorder %s246_s22, %s4409_s26  ;;  %p4418_p6 = scmp.lt.s32.totalorder %s4409_s26, %s4409_s26 }
  0x32   : > { %p4412_p4 = pnand %p4410_p1, %p4818_p3  ;;  %p4419_p13 = por %p4418_p6, %p4417_p11 }
  0x34   : > { %p4413_p12 = pneg %p4412_p4 }
  0x36   : > { %p4420_p5 = pnand %p4419_p13, %p4413_p12 }
  0x38   : > { %4423 = shalt.err (!%p4420_p5)
}
  0x39   : > { %s4674_s27 = smov 64   ;;  %s4675_s11 = smov 4  }
  0x3a   : > { %3795 = dma.hbm_to_vmem [thread:$0]  (!%p4804_p2), %s7000_s1, 512, %s246_s22, [#allocation7], %s4674_s27, %s4674_s27, %s4675_s11  }
  0x3b   : > { %s4424_s15 = scalar_lea.hbm %s6890_s3, 256 }
  0x3c   : > { %p4425_p4 = scmp.ne.s32.totalorder %s6890_s3, %s4424_s15  ;;  %p4431_p11 = scmp.lt.u32.totalorder %s4424_s15, %s6890_s3 }
  0x3e   : > { %p4427_p6 = pnand %p4425_p4, %p4818_p3 }
  0x40   : > { %p4428_p5 = pneg %p4427_p6 }
  0x42   : > { %p4433_p12 = pnand %p4431_p11, %p4428_p5 }
  0x44   : > { %4436 = shalt.err (!%p4433_p12)
}
  0x45   : > { %s4437_s22 = scalar_lea.vmem %s4808_s25, 256  ;;  %p4445_p8 = scmp.lt.s32.totalorder %s4808_s25, %s4808_s25 }
  0x46   : > { %p4438_p13 = scmp.ne.s32.totalorder %s4808_s25, %s4437_s22  ;;  %p4446_p9 = scmp.lt.s32.totalorder %s4437_s22, %s4437_s22 }
  0x48   : > { %p4440_p0 = pnand %p4438_p13, %p4818_p3  ;;  %p4447_p10 = por %p4446_p9, %p4445_p8 }
  0x4a   : > { %p4441_p7 = pneg %p4440_p0 }
  0x4c   : > { %p4448_p1 = pnand %p4447_p10, %p4441_p7 }
  0x4e   : > { %4451 = shalt.err (!%p4448_p1)
}
  0x4f   : > { %3801 = dma.hbm_to_vmem [thread:$0]  (!%p4804_p2), %s6890_s3, 256, %s4808_s25, [#allocation10], %s4674_s27, %s4674_s27, %s4675_s11  }
  0x50   : > { %s4676_s15 = smov [#allocation12]   ;;  %s4677_s13 = smov [#allocation8]  }
  0x51   : > { %s294_s19 = sshll.u32 %s4676_s15, 4  ;;  %s259_s28 = sshll.u32 %s4677_s13, 4  ;;  %s295_s19 = int_to_ptr.vmem [resolvable:$true] %s294_s19  ;;  %s260_s28 = int_to_ptr.vmem [resolvable:$true] %s259_s28 }
  0x52   : > { %s4452_s26 = scalar_lea.hbm %s6892_s5, 16 }
  0x53   : > { %p4453_p4 = scmp.ne.s32.totalorder %s6892_s5, %s4452_s26  ;;  %p4459_p11 = scmp.lt.u32.totalorder %s4452_s26, %s6892_s5 }
  0x55   : > { %p4455_p6 = pnand %p4453_p4, %p4818_p3 }
  0x57   : > { %p4456_p5 = pneg %p4455_p6 }
  0x59   : > { %p4461_p12 = pnand %p4459_p11, %p4456_p5 }
  0x5b   : > { %4464 = shalt.err (!%p4461_p12)
}
  0x5c   : > { %s4465_s25 = scalar_lea.vmem %s295_s19, 16  ;;  %s4472_s27 = scalar_lea.vmem %s295_s19, 32 }
  0x5d   : > { %p4466_p13 = scmp.ne.s32.totalorder %s295_s19, %s4465_s25  ;;  %p4473_p8 = scmp.lt.s32.totalorder %s295_s19, %s295_s19 }
  0x5e   : > { %p4474_p9 = scmp.lt.s32.totalorder %s4472_s27, %s4465_s25 }
  0x5f   : > { %p4468_p0 = pnand %p4466_p13, %p4818_p3 }
  0x60   : > { %p4475_p10 = por %p4474_p9, %p4473_p8 }
  0x61   : > { %p4469_p7 = pneg %p4468_p0 }
  0x63   : > { %p4476_p1 = pnand %p4475_p10, %p4469_p7 }
  0x65   : > { %4479 = shalt.err (!%p4476_p1)
}
  0x66   : > { %3807 = dma.hbm_to_vmem [thread:$0]  (!%p4804_p2), %s6892_s5, 16, %s295_s19, [#allocation13]  }
  0x67   : > { %s4480_s15 = scalar_lea.hbm %s6889_s2, 16 }
  0x68   : > { %p4481_p4 = scmp.ne.s32.totalorder %s6889_s2, %s4480_s15  ;;  %p4487_p11 = scmp.lt.u32.totalorder %s4480_s15, %s6889_s2 }
  0x6a   : > { %p4483_p6 = pnand %p4481_p4, %p4818_p3 }
  0x6c   : > { %p4484_p5 = pneg %p4483_p6 }
  0x6e   : > { %p4489_p12 = pnand %p4487_p11, %p4484_p5 }
  0x70   : > { %4492 = shalt.err (!%p4489_p12)
}
  0x71   : > { %s4493_s22 = scalar_lea.vmem %s260_s28, 16  ;;  %s4500_s19 = scalar_lea.vmem %s260_s28, 32 }
  0x72   : > { %p4494_p13 = scmp.ne.s32.totalorder %s260_s28, %s4493_s22  ;;  %p4501_p8 = scmp.lt.s32.totalorder %s260_s28, %s260_s28 }
  0x73   : > { %p4502_p9 = scmp.lt.s32.totalorder %s4500_s19, %s4493_s22 }
  0x74   : > { %p4496_p0 = pnand %p4494_p13, %p4818_p3 }
  0x75   : > { %p4503_p10 = por %p4502_p9, %p4501_p8 }
  0x76   : > { %p4497_p7 = pneg %p4496_p0 }
  0x78   : > { %p4504_p1 = pnand %p4503_p10, %p4497_p7 }
  0x7a   : > { %4507 = shalt.err (!%p4504_p1)
}
  0x7b   : > { %3798 = dma.hbm_to_vmem [thread:$0]  (!%p4804_p2), %s6889_s2, 16, %s260_s28, [#allocation7]  }
  0x7c   : > { %s4678_s27 = smov [#allocation11]   ;;  %s4679_s11 = smov [#allocation14]  }
  0x7d   : > { %s283_s1 = sshll.u32 %s4678_s27, 4  ;;  %s305_s8 = sshll.u32 %s4679_s11, 4  ;;  %s284_s1 = int_to_ptr.vmem [resolvable:$true] %s283_s1  ;;  %s306_s8 = int_to_ptr.vmem [resolvable:$true] %s305_s8 }
  0x7e   : > { %s4508_s13 = scalar_lea.hbm %s6891_s4, 16 }
  0x7f   : > { %p4509_p4 = scmp.ne.s32.totalorder %s6891_s4, %s4508_s13  ;;  %p4515_p11 = scmp.lt.u32.totalorder %s4508_s13, %s6891_s4 }
  0x81   : > { %p4511_p6 = pnand %p4509_p4, %p4818_p3 }
  0x83   : > { %p4512_p5 = pneg %p4511_p6 }
  0x85   : > { %p4517_p12 = pnand %p4515_p11, %p4512_p5 }
  0x87   : > { %4520 = shalt.err (!%p4517_p12)
}
  0x88   : > { %s4521_s28 = scalar_lea.vmem %s284_s1, 16  ;;  %s4528_s19 = scalar_lea.vmem %s284_s1, 32 }
  0x89   : > { %p4522_p13 = scmp.ne.s32.totalorder %s284_s1, %s4521_s28  ;;  %p4529_p8 = scmp.lt.s32.totalorder %s284_s1, %s284_s1 }
  0x8a   : > { %p4530_p9 = scmp.lt.s32.totalorder %s4528_s19, %s4521_s28 }
  0x8b   : > { %p4524_p0 = pnand %p4522_p13, %p4818_p3 }
  0x8c   : > { %p4531_p10 = por %p4530_p9, %p4529_p8 }
  0x8d   : > { %p4525_p7 = pneg %p4524_p0 }
  0x8f   : > { %p4532_p1 = pnand %p4531_p10, %p4525_p7 }
  0x91   : > { %4535 = shalt.err (!%p4532_p1)
}
  0x92   : > { %3804 = dma.hbm_to_vmem [thread:$0]  (!%p4804_p2), %s6891_s4, 16, %s284_s1, [#allocation10]  }
  0x93   : > { %s4536_s12 = scalar_lea.hbm %s6893_s6, 16 }
  0x94   : > { %p4537_p4 = scmp.ne.s32.totalorder %s6893_s6, %s4536_s12  ;;  %p4543_p11 = scmp.lt.u32.totalorder %s4536_s12, %s6893_s6 }
  0x96   : > { %p4539_p6 = pnand %p4537_p4, %p4818_p3 }
  0x98   : > { %p4540_p5 = pneg %p4539_p6 }
  0x9a   : > { %p4545_p12 = pnand %p4543_p11, %p4540_p5 }
  0x9c   : > { %4548 = shalt.err (!%p4545_p12)
}
  0x9d   : > { %s4549_s26 = scalar_lea.vmem %s306_s8, 16  ;;  %s4556_s1 = scalar_lea.vmem %s306_s8, 32 }
  0x9e   : > { %p4550_p13 = scmp.ne.s32.totalorder %s306_s8, %s4549_s26  ;;  %p4557_p8 = scmp.lt.s32.totalorder %s306_s8, %s306_s8 }
  0x9f   : > { %p4558_p9 = scmp.lt.s32.totalorder %s4556_s1, %s4549_s26 }
  0xa0   : > { %p4552_p0 = pnand %p4550_p13, %p4818_p3 }
  0xa1   : > { %p4559_p10 = por %p4558_p9, %p4557_p8 }
  0xa2   : > { %p4553_p7 = pneg %p4552_p0 }
  0xa4   : > { %p4560_p1 = pnand %p4559_p10, %p4553_p7 }
  0xa6   : > { %4563 = shalt.err (!%p4560_p1)
}
  0xa7   : > { %3810 = dma.hbm_to_vmem [thread:$0]  (!%p4804_p2), %s6893_s6, 16, %s306_s8, [#allocation13]  }
  0xa8   : > { %p3453_p4 = scmp.ge.s32.totalorder %s4670_s10, 2 }
  0xa9   : > { %p7002_p3 = scmp.ne.s32.totalorder (!%p3453_p4), %s6993_s16, 0 }
  0xaa   : > { %315 = sbr.rel (%p3453_p4) target bundleno = 212 (0xd4), region = 44 }
  0xb1   : > { %318 = sbr.rel (!%p7002_p3) target bundleno = 212 (0xd4), region = 48  ;;  %s319_s14 = sand.u32 (%p7002_p3), 1, %s4666_s9  }
  0xb2   : > { %s3455_s19 = sshll.u32 (%p7002_p3), %s4670_s10, 6  ;;  %s3454_s29 = sshll.u32 (%p7002_p3), %s319_s14, 9 }
  0xb3   : > { %s325_s25 = ssub.s32 (%p7002_p3), 75, %s3455_s19  ;;  %s4939_s27 = scalar_lea.sflag (%p7002_p3), [#allocation4], %s319_s14 }
  0xb4   : > { %p326_p6 = scmp.lt.s32.totalorder (%p7002_p3), %s325_s25, 64  ;;  %s323_s11 = scalar_lea.vmem (%p7002_p3), [#allocation3], %s3454_s29 }
  0xb8   : > { %s7212_s25 = smov (!%p326_p6, %s325_s25), 64 }
  0xb9   : > { %s4936_s23 = sshll.u32 %s7212_s25, 7 }
  0xba   : > { %s330_s8 = ssub.s32 8192, %s4936_s23 }
  0xbb   : > { %331 = vsyncadd %s4939_s27, %s330_s8  ;;  %p3457_p2 = scmp.ne.s32.totalorder %s4936_s23, 0  ;;  %s3554_s16 = sshll.u32 %s4670_s10, 13 }
  0xbc   : > { %s4947_s13 = scalar_lea.hbm %s6887_s0, %s3554_s16  ;;  %s336_s21 = sshll.u32 %s323_s11, 4  ;;  %s4949_s21 = int_to_ptr.vmem [resolvable:$true] %s336_s21 }
  0xbd   : > { %s4564_s24 = scalar_lea.hbm %s4947_s13, %s4936_s23  ;;  %s4568_s22 = scalar_lea.hbm %s6887_s0, 9600 }
  0xbe   : > { %p4565_p5 = scmp.ne.s32.totalorder %s4947_s13, %s4564_s24  ;;  %p4569_p13 = scmp.lt.u32.totalorder %s4947_s13, %s6887_s0 }
  0xbf   : > { %p4570_p0 = scmp.lt.u32.totalorder %s4568_s22, %s4564_s24  ;;  %p4572_p8 = scmp.lt.u32.totalorder %s4564_s24, %s4947_s13 }
  0xc0   : > { %p4566_p11 = pnand %p4565_p5, %p3457_p2 }
  0xc1   : > { %p4571_p7 = por %p4570_p0, %p4569_p13 }
  0xc2   : > { %p4567_p12 = pneg %p4566_p11 }
  0xc3   : > { %p4573_p9 = por %p4572_p8, %p4571_p7 }
  0xc5   : > { %p4574_p10 = pnand %p4573_p9, %p4567_p12 }
  0xc7   : > { %4577 = shalt.err (!%p4574_p10)
}
  0xc8   : > { %s4578_s19 = scalar_lea.vmem %s4949_s21, %s4936_s23  ;;  %s4680_s29 = smov [#allocation3]  }
  0xc9   : > { %p4579_p1 = scmp.ne.s32.totalorder %s4949_s21, %s4578_s19  ;;  %s4582_s25 = sshll.u32 %s4680_s29, 4  ;;  %s4583_s25 = int_to_ptr.vmem [resolvable:$false] %s4582_s25 }
  0xca   : > { %s4584_s8 = scalar_lea.vmem %s4583_s25, 16384  ;;  %p4585_p5 = scmp.lt.s32.totalorder %s4949_s21, %s4583_s25 }
  0xcb   : > { %p4580_p3 = pnand %p4579_p1, %p3457_p2  ;;  %p4586_p11 = scmp.lt.s32.totalorder %s4584_s8, %s4578_s19 }
  0xcd   : > { %p4581_p6 = pneg %p4580_p3  ;;  %p4587_p13 = por %p4586_p11, %p4585_p5 }
  0xcf   : > { %p4588_p0 = pnand %p4587_p13, %p4581_p6 }
  0xd1   : > { %4591 = shalt.err (!%p4588_p0)
}
  0xd2   : > { %s4681_s11 = smov 128   ;;  %s4682_s16 = smov 8  }
  0xd3   : > { %342 = dma.hbm_to_vmem [thread:$0]  (%p3457_p2), %s4947_s13, %s4936_s23, %s4949_s21, %s4939_s27, %s4681_s11, %s4681_s11, %s4682_s16  }
  0xd4 PF: > { %p7003_p12 = scmp.ne.s32.totalorder %s6998_s20, 0 }
  0xd6   : > { %348 = sbr.rel (%p7003_p12) target bundleno = 1471 (0x5bf), region = 52 }
  0xdd   : > { %s4979_s12 = sand.u32 1, %s4662_s30   ;;  %p7004_p7 = scmp.ne.s32.totalorder %s6994_s17, 0 }
  0xde   : > { %s3462_s15 = sshll.u32 %s4979_s12, 9  ;;  %s351_s24 = scalar_lea.sflag [#allocation4], %s4979_s12 }
  0xdf   : > { %s4985_s26 = scalar_lea.vmem [#allocation3], %s3462_s15 }
  0xe0   : > { %4637 = dma.done.wait (%p7004_p7), %s351_s24, 8192  }
  0xe1   : > { %4639 = vsyncadd (%p7004_p7), %s351_s24, 4294959104  ;;  %p7005_p2 = scmp.eq.s32.totalorder %s4757_s7, 0 }
  0xe3   : > { %4641 = dma.done.wait (%p7005_p2), [#allocation7], 528   ;;  %p7006_p8 = pmov %p7005_p2 }
  0xe4   : > { %p7007_p9 = pmov %p7005_p2 }
  0xe5   : > { %4643 = vsyncadd (%p7006_p8), [#allocation7], 4294966768 }
  0xe6   : > { %4645 = dma.done.wait (%p7007_p9), [#allocation10], 272   ;;  %p7008_p10 = pmov %p7005_p2 }
  0xe7   : > { %p7009_p1 = pmov %p7005_p2 }
  0xe8   : > { %4647 = vsyncadd (%p7008_p10), [#allocation10], 4294967024 }
  0xe9   : > { %4649 = dma.done.wait (%p7009_p1), [#allocation13], 32   ;;  %p7010_p3 = pmov %p7009_p1 }
  0xea   : > { %v3874_v1 = vld [vmem:[#allocation6] sm:$0xff]   ;;  %v3875_v2 = vld [vmem:[#allocation6 + $0x8] sm:$0xff]   ;;  %v3876_v3 = vld [vmem:[#allocation6 + $0x10] sm:$0xff]   ;;  %vm557_vm0 = vcmask 523264   ;;  %s4683_s17 = smov 80   ;;  %s4684_s20 = smov 112  }
  0xeb   : > { %4651 = vsyncadd (%p7010_p3), [#allocation13], 4294967264  ;;  %3626 = vmatprep.subr.bf16.mxu0 %v3874_v1  ;;  %v422_v4 = vld [vmem:[%s4985_s26] sm:$0xff]  ;;  %v423_v5 = vld [vmem:[%s4985_s26 + $0x8] sm:$0xff]  ;;  %vm1734_vm1 = vcmask 261120   ;;  %vm2966_vm2 = vcmask 130048  }
  0xec   : > { %3627 = vmatpush3.bf16.msra.mxu0 %v3874_v1  ;;  %v486_v6 = vpack.c.bf16 %v423_v5, %v422_v4  ;;  %v3877_v7 = vld [vmem:[#allocation6 + $0x18] sm:$0xff]   ;;  %v424_v8 = vld [vmem:[%s4985_s26 + $0x10] sm:$0xff]  ;;  %v426_v10 = vld [vmem:[%s4985_s26 + $0x20] sm:$0xff]  ;;  %vm3230_vm3 = vcmask 7168   ;;  %s6631_s23 = scalar_lea.vmem [#allocation15], %s3462_s15  ;;  %s3296_s27 = scalar_lea.sflag [#allocation5], %s4979_s12 }
  0xed   : > { %3628 = vmatprep.subr.bf16.mxu0 %v3875_v2  ;;  %v425_v9 = vld [vmem:[%s4985_s26 + $0x18] sm:$0xff]  ;;  %v427_v11 = vld [vmem:[%s4985_s26 + $0x28] sm:$0xff]  ;;  %v428_v14 = vld [vmem:[%s4985_s26 + $0x30] sm:$0xff]  ;;  %p7201_p6 = scmp.ne.s32.totalorder %s6995_s18, 0 }
  0xee   : > { %3634 = vmatprep.mubr.msk.bf16.mxu0 %vm557_vm0, %v486_v6  ;;  %v487_v12 = vpack.c.bf16 %v425_v9, %v424_v8  ;;  %v488_v13 = vpack.c.bf16 %v427_v11, %v426_v10  ;;  %v429_v15 = vld [vmem:[%s4985_s26 + $0x38] sm:$0xff]  ;;  %v430_v16 = vld [vmem:[%s4985_s26 + $0x40] sm:$0xff]  ;;  %v431_v17 = vld [vmem:[%s4985_s26 + $0x48] sm:$0xff]  ;;  %s3546_s13 = sshll.u32 (%p7201_p6), %s4757_s7, 6 }
  0xef   : > { %v489_v18 = vpack.c.bf16 %v429_v15, %v428_v14  ;;  %v490_v19 = vpack.c.bf16 %v431_v17, %v430_v16  ;;  %v432_v20 = vld [vmem:[%s4985_s26 + $0x50] sm:$0xff]  ;;  %v433_v21 = vld [vmem:[%s4985_s26 + $0x58] sm:$0xff]  ;;  %v434_v22 = vld [vmem:[%s4985_s26 + $0x60] sm:$0xff]  ;;  %s3304_s21 = ssub.s32 (%p7201_p6), 75, %s3546_s13 }
  0xf0   : > { %3629 = vmatpush3.bf16.msra.mxu0 %v3875_v2  ;;  %v435_v23 = vld [vmem:[%s4985_s26 + $0x68] sm:$0xff]  ;;  %v491_v24 = vpack.c.bf16 %v433_v21, %v432_v20  ;;  %v436_v26 = vld [vmem:[%s4985_s26 + $0x70] sm:$0xff]  ;;  %v437_v27 = vld [vmem:[%s4985_s26 + $0x78] sm:$0xff]  ;;  %p3305_p5 = scmp.lt.s32.totalorder (%p7201_p6), %s3304_s21, 64 }
  0xf1   : > { %3630 = vmatprep.subr.bf16.mxu0 %v3876_v3  ;;  %v492_v25 = vpack.c.bf16 %v435_v23, %v434_v22  ;;  %v438_v28 = vld [vmem:[%s4985_s26 + $0x80] sm:$0xff]  ;;  %v439_v29 = vld [vmem:[%s4985_s26 + $0x88] sm:$0xff]  ;;  %v493_v30 = vpack.c.bf16 %v437_v27, %v436_v26  ;;  %v440_v32 = vld [vmem:[%s4985_s26 + $0x90] sm:$0xff] }
  0xf2   : > { %v494_v31 = vpack.c.bf16 %v439_v29, %v438_v28  ;;  %v441_v33 = vld [vmem:[%s4985_s26 + $0x98] sm:$0xff]  ;;  %v442_v34 = vld [vmem:[%s4985_s26 + $0xa0] sm:$0xff]  ;;  %v443_v35 = vld [vmem:[%s4985_s26 + $0xa8] sm:$0xff] }
  0xf3   : > { %v495_v36 = vpack.c.bf16 %v441_v33, %v440_v32  ;;  %v496_v37 = vpack.c.bf16 %v443_v35, %v442_v34  ;;  %v444_v38 = vld [vmem:[%s4985_s26 + $0xb0] sm:$0xff]  ;;  %v445_v39 = vld [vmem:[%s4985_s26 + $0xb8] sm:$0xff]  ;;  %v446_v40 = vld [vmem:[%s4985_s26 + $0xc0] sm:$0xff] }
  0xf4   : > { %3631 = vmatpush3.bf16.msra.mxu0 %v3876_v3  ;;  %v447_v41 = vld [vmem:[%s4985_s26 + $0xc8] sm:$0xff]  ;;  %v497_v42 = vpack.c.bf16 %v445_v39, %v444_v38  ;;  %v448_v44 = vld [vmem:[%s4985_s26 + $0xd0] sm:$0xff]  ;;  %v449_v45 = vld [vmem:[%s4985_s26 + $0xd8] sm:$0xff] }
  0xf5   : > { %3632 = vmatprep.subr.bf16.mxu0 %v3877_v7  ;;  %v498_v43 = vpack.c.bf16 %v447_v41, %v446_v40  ;;  %v450_v46 = vld [vmem:[%s4985_s26 + $0xe0] sm:$0xff]  ;;  %v451_v47 = vld [vmem:[%s4985_s26 + $0xe8] sm:$0xff]  ;;  %v499_v48 = vpack.c.bf16 %v449_v45, %v448_v44  ;;  %v452_v50 = vld [vmem:[%s4985_s26 + $0xf0] sm:$0xff] }
  0xf6   : > { %v500_v49 = vpack.c.bf16 %v451_v47, %v450_v46  ;;  %v453_v51 = vld [vmem:[%s4985_s26 + $0xf8] sm:$0xff]  ;;  %v454_v52 = vld [vmem:[%s4985_s26 + $0x100] sm:$0xff]  ;;  %v455_v53 = vld [vmem:[%s4985_s26 + $0x108] sm:$0xff] }
  0xf7   : > { %v501_v54 = vpack.c.bf16 %v453_v51, %v452_v50  ;;  %v502_v55 = vpack.c.bf16 %v455_v53, %v454_v52  ;;  %v456_v56 = vld [vmem:[%s4985_s26 + $0x110] sm:$0xff]  ;;  %v457_v57 = vld [vmem:[%s4985_s26 + $0x118] sm:$0xff]  ;;  %v458_v58 = vld [vmem:[%s4985_s26 + $0x120] sm:$0xff] }
  0xf8   : > { %3633 = vmatpush3.bf16.msra.mxu0 %v3877_v7  ;;  %v459_v59 = vld [vmem:[%s4985_s26 + $0x128] sm:$0xff]  ;;  %v503_v60 = vpack.c.bf16 %v457_v57, %v456_v56  ;;  %v460_v62 = vld [vmem:[%s4985_s26 + $0x130] sm:$0xff]  ;;  %v461_v63 = vld [vmem:[%s4985_s26 + $0x138] sm:$0xff] }
  0xf9   : > { %v504_v61 = vpack.c.bf16 %v459_v59, %v458_v58  ;;  %v462_v0 = vld [vmem:[%s4985_s26 + $0x140] sm:$0xff]  ;;  %v463_v1 = vld [vmem:[%s4985_s26 + $0x148] sm:$0xff]  ;;  %v505_v2 = vpack.c.bf16 %v461_v63, %v460_v62  ;;  %v464_v4 = vld [vmem:[%s4985_s26 + $0x150] sm:$0xff] }
  0xfa   : > { %v506_v3 = vpack.c.bf16 %v463_v1, %v462_v0  ;;  %v465_v5 = vld [vmem:[%s4985_s26 + $0x158] sm:$0xff]  ;;  %v466_v6 = vld [vmem:[%s4985_s26 + $0x160] sm:$0xff]  ;;  %v467_v7 = vld [vmem:[%s4985_s26 + $0x168] sm:$0xff] }
  0xfb   : > { %3635 = vmatmul.mubr.msk.bf16.vlgmr.msra.gmra.mrb[0].mxu0 %vm557_vm0, %v487_v12  ;;  %v507_v8 = vpack.c.bf16 %v465_v5, %v464_v4  ;;  %v508_v9 = vpack.c.bf16 %v467_v7, %v466_v6  ;;  %v468_v10 = vld [vmem:[%s4985_s26 + $0x170] sm:$0xff]  ;;  %v469_v11 = vld [vmem:[%s4985_s26 + $0x178] sm:$0xff]  ;;  %v470_v12 = vld [vmem:[%s4985_s26 + $0x180] sm:$0xff] }
  0xfc   : > { %3638 = vmatprep.mubr.msk.bf16.mxu0 %vm557_vm0, %v488_v13  ;;  %v471_v13 = vld [vmem:[%s4985_s26 + $0x188] sm:$0xff]  ;;  %v509_v14 = vpack.c.bf16 %v469_v11, %v468_v10  ;;  %v472_v16 = vld [vmem:[%s4985_s26 + $0x190] sm:$0xff]  ;;  %v473_v17 = vld [vmem:[%s4985_s26 + $0x198] sm:$0xff] }
  0xfd   : > { %v510_v15 = vpack.c.bf16 %v471_v13, %v470_v12  ;;  %v511_v20 = vpack.c.bf16 %v473_v17, %v472_v16  ;;  %v476_v22 = vld [vmem:[%s4985_s26 + $0x1b0] sm:$0xff]  ;;  %v477_v23 = vld [vmem:[%s4985_s26 + $0x1b8] sm:$0xff] }
  0xfe   : > { %v513_v26 = vpack.c.bf16 %v477_v23, %v476_v22  ;;  %v480_v28 = vld [vmem:[%s4985_s26 + $0x1d0] sm:$0xff]  ;;  %v481_v29 = vld [vmem:[%s4985_s26 + $0x1d8] sm:$0xff] }
  0xff   : > { %v515_v32 = vpack.c.bf16 %v481_v29, %v480_v28  ;;  %v484_v34 = vld [vmem:[%s4985_s26 + $0x1f0] sm:$0xff]  ;;  %v485_v35 = vld [vmem:[%s4985_s26 + $0x1f8] sm:$0xff] }
 0x103   : > { %3639 = vmatmul.mubr.msk.bf16.gmra.mrb[4].mxu0 %vm557_vm0, %v489_v18  ;;  %v474_v18 = vld [vmem:[%s4985_s26 + $0x1a0] sm:$0xff] }
 0x104   : > { %3642 = vmatprep.mubr.msk.bf16.mxu0 %vm557_vm0, %v490_v19  ;;  %v475_v19 = vld [vmem:[%s4985_s26 + $0x1a8] sm:$0xff] }
 0x105   : > { %v512_v21 = vpack.c.bf16 %v475_v19, %v474_v18 }
 0x10b   : > { %3643 = vmatmul.mubr.msk.bf16.gmra.mrb[8].mxu0 %vm557_vm0, %v491_v24  ;;  %v478_v24 = vld [vmem:[%s4985_s26 + $0x1c0] sm:$0xff] }
 0x10c   : > { %3646 = vmatprep.mubr.msk.bf16.mxu0 %vm557_vm0, %v492_v25  ;;  %v479_v25 = vld [vmem:[%s4985_s26 + $0x1c8] sm:$0xff] }
 0x10d   : > { %v514_v27 = vpack.c.bf16 %v479_v25, %v478_v24 }
 0x113   : > { %3647 = vmatmul.mubr.msk.bf16.gmra.mrb[12].mxu0 %vm557_vm0, %v493_v30  ;;  %v482_v30 = vld [vmem:[%s4985_s26 + $0x1e0] sm:$0xff] }
 0x114   : > { %3650 = vmatprep.mubr.msk.bf16.mxu0 %vm557_vm0, %v494_v31  ;;  %v483_v31 = vld [vmem:[%s4985_s26 + $0x1e8] sm:$0xff] }
 0x115   : > { %v516_v33 = vpack.c.bf16 %v483_v31, %v482_v30 }
 0x11b   : > { %3651 = vmatmul.mubr.msk.bf16.gmra.mrb[16].mxu0 %vm557_vm0, %v495_v36  ;;  %v517_v36 = vpack.c.bf16 %v485_v35, %v484_v34 }
 0x11c   : > { %3654 = vmatprep.mubr.msk.bf16.mxu0 %vm557_vm0, %v496_v37  ;;  %v5099_v37 = vld [vmem:[#allocation8] ss:$0 sm:$0xff] }
 0x123   : > { %3655 = vmatmul.mubr.msk.bf16.gmra.mrb[20].mxu0 %vm557_vm0, %v497_v42 }
 0x124   : > { %3658 = vmatprep.mubr.msk.bf16.mxu0 %vm557_vm0, %v498_v43 }
 0x12b   : > { %3659 = vmatmul.mubr.msk.bf16.gmra.mrb[24].mxu0 %vm557_vm0, %v499_v48 }
 0x12c   : > { %3662 = vmatprep.mubr.msk.bf16.mxu0 %vm557_vm0, %v500_v49 }
 0x133   : > { %3663 = vmatmul.mubr.msk.bf16.gmra.mrb[28].mxu0 %vm557_vm0, %v501_v54 }
 0x134   : > { %3666 = vmatprep.mubr.msk.bf16.mxu0 %vm557_vm0, %v502_v55 }
 0x13b   : > { %3667 = vmatmul.mubr.msk.bf16.gmra.mrb[32].mxu0 %vm557_vm0, %v503_v60 }
 0x13c   : > { %3670 = vmatprep.mubr.msk.bf16.mxu0 %vm557_vm0, %v504_v61 }
 0x143   : > { %3671 = vmatmul.mubr.msk.bf16.gmra.mrb[36].mxu0 %vm557_vm0, %v505_v2 }
 0x144   : > { %3674 = vmatprep.mubr.msk.bf16.mxu0 %vm557_vm0, %v506_v3 }
 0x14b   : > { %3675 = vmatmul.mubr.msk.bf16.gmra.mrb[40].mxu0 %vm557_vm0, %v507_v8 }
 0x14c   : > { %3678 = vmatprep.mubr.msk.bf16.mxu0 %vm557_vm0, %v508_v9 }
 0x153   : > { %3679 = vmatmul.mubr.msk.bf16.gmra.mrb[44].mxu0 %vm557_vm0, %v509_v14 }
 0x154   : > { %3682 = vmatprep.mubr.msk.bf16.mxu0 %vm557_vm0, %v510_v15 }
 0x15b   : > { %3683 = vmatmul.mubr.msk.bf16.gmra.mrb[48].mxu0 %vm557_vm0, %v511_v20 }
 0x15c   : > { %3686 = vmatprep.mubr.msk.bf16.mxu0 %vm557_vm0, %v512_v21 }
 0x163   : > { %3687 = vmatmul.mubr.msk.bf16.gmra.mrb[52].mxu0 %vm557_vm0, %v513_v26 }
 0x164   : > { %3690 = vmatprep.mubr.msk.bf16.mxu0 %vm557_vm0, %v514_v27 }
 0x16b   : > { %3691 = vmatmul.mubr.msk.bf16.gmra.mrb[56].mxu0 %vm557_vm0, %v515_v32 }
 0x16c   : > { %3694 = vmatprep.mubr.msk.bf16.mxu0 %vm557_vm0, %v516_v33 }
 0x173   : > { %3695 = vmatmul.mubr.msk.bf16.gmra.mrb[60].mxu0 %vm557_vm0, %v517_v36 }
 0x1ce   : > { %v3636_v38 = vpop.f32.mrb[0].mxu0 }
 0x1cf   : > { %v5102_v39 = vadd.f32 %v3636_v38, %v5099_v37  ;;  %v688_v40 = vpop.f32.mrb[1].mxu0 }
 0x1d0   : > { %v5105_v41 = vadd.f32 %v5099_v37, %v688_v40  ;;  %v3637_v42 = vpop.f32.mrb[2].mxu0 }
 0x1d1   : > { %v1009_v43 = vmul.f32 0.5, %v5102_v39  ;;  %v5109_v44 = vadd.f32 %v3637_v42, %v5099_v37  ;;  %v691_v45 = vpop.f32.mrb[3].mxu0 }
 0x1d2   : > { %v1007_v46 = vmul.f32 0.5, %v5105_v41  ;;  %v5113_v47 = vadd.f32 %v5099_v37, %v691_v45 }
 0x1d3   : > { %3880 = vtanh.f32 %v1009_v43  ;;  %v1010_v48 = vmul.f32 0.5, %v5109_v44 }
 0x1d4   : > { %3882 = vtanh.f32 %v1007_v46  ;;  %v1008_v49 = vmul.f32 0.5, %v5113_v47 }
 0x1d5   : > { %3884 = vtanh.f32 %v1010_v48 }
 0x1d6   : > { %v3640_v50 = vpop.f32.mrb[4].mxu0  ;;  %3886 = vtanh.f32 %v1008_v49 }
 0x1d7   : > { %v5118_v51 = vadd.f32 %v3640_v50, %v5099_v37  ;;  %v704_v52 = vpop.f32.mrb[5].mxu0 }
 0x1d8   : > { %v5121_v53 = vadd.f32 %v5099_v37, %v704_v52  ;;  %v3641_v54 = vpop.f32.mrb[6].mxu0 }
 0x1d9   : > { %v1013_v55 = vmul.f32 0.5, %v5118_v51  ;;  %v5125_v56 = vadd.f32 %v3641_v54, %v5099_v37  ;;  %v707_v57 = vpop.f32.mrb[7].mxu0 }
 0x1da   : > { %v1011_v58 = vmul.f32 0.5, %v5121_v53  ;;  %v5129_v59 = vadd.f32 %v5099_v37, %v707_v57 }
 0x1db   : > { %3888 = vtanh.f32 %v1013_v55  ;;  %v1014_v60 = vmul.f32 0.5, %v5125_v56 }
 0x1dc   : > { %3890 = vtanh.f32 %v1011_v58  ;;  %v1012_v61 = vmul.f32 0.5, %v5129_v59 }
 0x1dd   : > { %v3881_v62 = vpop.eup %3880  ;;  %3892 = vtanh.f32 %v1014_v60 }
 0x1de   : > { %v3883_v63 = vpop.eup %3882  ;;  %v3644_v0 = vpop.f32.mrb[8].mxu0  ;;  %v1137_v1 = vadd.f32 1.0, %v3881_v62  ;;  %3894 = vtanh.f32 %v1012_v61 }
 0x1df   : > { %v5134_v2 = vadd.f32 %v3644_v0, %v5099_v37  ;;  %v720_v3 = vpop.f32.mrb[9].mxu0  ;;  %v1135_v4 = vadd.f32 1.0, %v3883_v63  ;;  %v3885_v5 = vpop.eup %3884 }
 0x1e0   : > { %v5137_v6 = vadd.f32 %v5099_v37, %v720_v3  ;;  %v3645_v7 = vpop.f32.mrb[10].mxu0  ;;  %v1201_v8 = vmul.f32 0.5, %v1137_v1  ;;  %v3887_v13 = vpop.eup %3886  ;;  %v1138_v16 = vadd.f32 1.0, %v3885_v5 }
 0x1e1   : > { %v1017_v9 = vmul.f32 0.5, %v5134_v2  ;;  %v5141_v10 = vadd.f32 %v3645_v7, %v5099_v37  ;;  %v723_v11 = vpop.f32.mrb[11].mxu0  ;;  %v1199_v12 = vmul.f32 0.5, %v1135_v4  ;;  %v1136_v18 = vadd.f32 1.0, %v3887_v13 }
 0x1e2   : > { %v1015_v14 = vmul.f32 0.5, %v5137_v6  ;;  %v5145_v15 = vadd.f32 %v5099_v37, %v723_v11  ;;  %1331 = vrot.lane.b32.xlu1 %v1201_v8, %s4683_s17  ;;  %v1202_v20 = vmul.f32 0.5, %v1138_v16 }
 0x1e3   : > { %3896 = vtanh.f32 %v1017_v9  ;;  %v1018_v17 = vmul.f32 0.5, %v5141_v10  ;;  %1327 = vrot.lane.b32.xlu0 %v1199_v12, %s4683_s17  ;;  %v1200_v22 = vmul.f32 0.5, %v1136_v18 }
 0x1e4   : > { %3898 = vtanh.f32 %v1015_v14  ;;  %v1016_v19 = vmul.f32 0.5, %v5145_v15 }
 0x1e5   : > { %v3889_v21 = vpop.eup %3888  ;;  %3900 = vtanh.f32 %v1018_v17 }
 0x1e6   : > { %v3891_v23 = vpop.eup %3890  ;;  %1333 = vrot.lane.b32.xlu1 %v1202_v20, %s4683_s17  ;;  %v3648_v24 = vpop.f32.mrb[12].mxu0  ;;  %v1141_v25 = vadd.f32 1.0, %v3889_v21  ;;  %3902 = vtanh.f32 %v1016_v19 }
 0x1e7   : > { %v5153_v26 = vadd.f32 %v3648_v24, %v5099_v37  ;;  %v736_v27 = vpop.f32.mrb[13].mxu0  ;;  %1329 = vrot.lane.b32.xlu0 %v1200_v22, %s4683_s17  ;;  %v3893_v28 = vpop.eup %3892  ;;  %v1139_v36 = vadd.f32 1.0, %v3891_v23 }
 0x1e8   : > { %v5157_v29 = vadd.f32 %v5099_v37, %v736_v27  ;;  %v3649_v30 = vpop.f32.mrb[14].mxu0  ;;  %v1205_v31 = vmul.f32 0.5, %v1141_v25  ;;  %v1142_v35 = vadd.f32 1.0, %v3893_v28  ;;  %v3895_v38 = vpop.eup %3894 }
 0x1e9   : > { %v1021_v32 = vmul.f32 0.5, %v5153_v26  ;;  %v5161_v33 = vadd.f32 %v3649_v30, %v5099_v37  ;;  %v739_v34 = vpop.f32.mrb[15].mxu0  ;;  %v1140_v46 = vadd.f32 1.0, %v3895_v38  ;;  %v1203_v50 = vmul.f32 0.5, %v1139_v36 }
 0x1ea   : > { %v1019_v40 = vmul.f32 0.5, %v5157_v29  ;;  %v5165_v42 = vadd.f32 %v5099_v37, %v739_v34  ;;  %v1206_v45 = vmul.f32 0.5, %v1142_v35 }
 0x1eb   : > { %3904 = vtanh.f32 %v1021_v32  ;;  %v1022_v43 = vmul.f32 0.5, %v5161_v33  ;;  %1339 = vrot.lane.b32.xlu0 %v1205_v31, %s4683_s17  ;;  %v1204_v60 = vmul.f32 0.5, %v1140_v46 }
 0x1ec   : > { %3906 = vtanh.f32 %v1019_v40  ;;  %v1020_v48 = vmul.f32 0.5, %v5165_v42  ;;  %1341 = vrot.lane.b32.xlu1 %v1206_v45, %s4683_s17 }
 0x1ed   : > { %v3897_v49 = vpop.eup %3896  ;;  %3908 = vtanh.f32 %v1022_v43 }
 0x1ee   : > { %v3899_v52 = vpop.eup %3898  ;;  %v3652_v54 = vpop.f32.mrb[16].mxu0  ;;  %v1145_v55 = vadd.f32 1.0, %v3897_v49  ;;  %3910 = vtanh.f32 %v1020_v48 }
 0x1ef   : > { %v5172_v57 = vadd.f32 %v3652_v54, %v5099_v37  ;;  %v752_v58 = vpop.f32.mrb[17].mxu0  ;;  %1335 = vrot.lane.b32.xlu0 %v1203_v50, %s4683_s17  ;;  %v3901_v61 = vpop.eup %3900  ;;  %v1143_v7 = vadd.f32 1.0, %v3899_v52 }
 0x1f0   : > { %v5176_v62 = vadd.f32 %v5099_v37, %v752_v58  ;;  %v3653_v63 = vpop.f32.mrb[18].mxu0  ;;  %v1209_v0 = vmul.f32 0.5, %v1145_v55  ;;  %1337 = vrot.lane.b32.xlu1 %v1204_v60, %s4683_s17  ;;  %v1146_v5 = vadd.f32 1.0, %v3901_v61  ;;  %v3903_v8 = vpop.eup %3902 }
 0x1f1   : > { %v1025_v1 = vmul.f32 0.5, %v5172_v57  ;;  %v5180_v3 = vadd.f32 %v3653_v63, %v5099_v37  ;;  %v755_v4 = vpop.f32.mrb[19].mxu0  ;;  %v1144_v14 = vadd.f32 1.0, %v3903_v8  ;;  %v1207_v18 = vmul.f32 0.5, %v1143_v7 }
 0x1f2   : > { %v1023_v9 = vmul.f32 0.5, %v5176_v62  ;;  %v5185_v11 = vadd.f32 %v5099_v37, %v755_v4  ;;  %v1210_v13 = vmul.f32 0.5, %v1146_v5 }
 0x1f3   : > { %3912 = vtanh.f32 %v1025_v1  ;;  %v1026_v12 = vmul.f32 0.5, %v5180_v3  ;;  %1347 = vrot.lane.b32.xlu0 %v1209_v0, %s4683_s17  ;;  %v1208_v24 = vmul.f32 0.5, %v1144_v14 }
 0x1f4   : > { %3914 = vtanh.f32 %v1023_v9  ;;  %v1024_v16 = vmul.f32 0.5, %v5185_v11  ;;  %1349 = vrot.lane.b32.xlu1 %v1210_v13, %s4683_s17 }
 0x1f5   : > { %v3905_v17 = vpop.eup %3904  ;;  %3916 = vtanh.f32 %v1026_v12 }
 0x1f6   : > { %v3907_v19 = vpop.eup %3906  ;;  %v3656_v20 = vpop.f32.mrb[20].mxu0  ;;  %v1149_v21 = vadd.f32 1.0, %v3905_v17  ;;  %3918 = vtanh.f32 %v1024_v16 }
 0x1f7   : > { %v5192_v22 = vadd.f32 %v3656_v20, %v5099_v37  ;;  %v768_v23 = vpop.f32.mrb[21].mxu0  ;;  %1343 = vrot.lane.b32.xlu0 %v1207_v18, %s4683_s17  ;;  %v3909_v25 = vpop.eup %3908  ;;  %v1147_v36 = vadd.f32 1.0, %v3907_v19 }
 0x1f8   : > { %v5196_v27 = vadd.f32 %v5099_v37, %v768_v23  ;;  %v3657_v28 = vpop.f32.mrb[22].mxu0  ;;  %v1213_v30 = vmul.f32 0.5, %v1149_v21  ;;  %1345 = vrot.lane.b32.xlu1 %v1208_v24, %s4683_s17  ;;  %v1150_v35 = vadd.f32 1.0, %v3909_v25  ;;  %v3911_v38 = vpop.eup %3910 }
 0x1f9   : > { %v1029_v31 = vmul.f32 0.5, %v5192_v22  ;;  %v5200_v32 = vadd.f32 %v3657_v28, %v5099_v37  ;;  %v771_v34 = vpop.f32.mrb[23].mxu0  ;;  %v1148_v48 = vadd.f32 1.0, %v3911_v38  ;;  %v1211_v52 = vmul.f32 0.5, %v1147_v36 }
 0x1fa   : > { %v1027_v40 = vmul.f32 0.5, %v5196_v27  ;;  %v5205_v43 = vadd.f32 %v5099_v37, %v771_v34  ;;  %v1214_v46 = vmul.f32 0.5, %v1150_v35 }
 0x1fb   : > { %3920 = vtanh.f32 %v1029_v31  ;;  %v1030_v45 = vmul.f32 0.5, %v5200_v32  ;;  %1355 = vrot.lane.b32.xlu0 %v1213_v30, %s4683_s17  ;;  %v1212_v63 = vmul.f32 0.5, %v1148_v48 }
 0x1fc   : > { %3922 = vtanh.f32 %v1027_v40  ;;  %v1028_v49 = vmul.f32 0.5, %v5205_v43  ;;  %1357 = vrot.lane.b32.xlu1 %v1214_v46, %s4683_s17 }
 0x1fd   : > { %v3913_v50 = vpop.eup %3912  ;;  %3924 = vtanh.f32 %v1030_v45 }
 0x1fe   : > { %v3915_v54 = vpop.eup %3914  ;;  %v3660_v55 = vpop.f32.mrb[24].mxu0  ;;  %v1153_v58 = vadd.f32 1.0, %v3913_v50  ;;  %3926 = vtanh.f32 %v1028_v49 }
 0x1ff   : > { %v5212_v60 = vadd.f32 %v3660_v55, %v5099_v37  ;;  %v784_v61 = vpop.f32.mrb[25].mxu0  ;;  %1351 = vrot.lane.b32.xlu0 %v1211_v52, %s4683_s17  ;;  %v3917_v0 = vpop.eup %3916  ;;  %v1151_v13 = vadd.f32 1.0, %v3915_v54 }
 0x200   : > { %v5216_v1 = vadd.f32 %v5099_v37, %v784_v61  ;;  %v3661_v4 = vpop.f32.mrb[26].mxu0  ;;  %v1217_v5 = vmul.f32 0.5, %v1153_v58  ;;  %1353 = vrot.lane.b32.xlu1 %v1212_v63, %s4683_s17  ;;  %v1154_v12 = vadd.f32 1.0, %v3917_v0  ;;  %v3919_v14 = vpop.eup %3918 }
 0x201   : > { %v1033_v7 = vmul.f32 0.5, %v5212_v60  ;;  %v5220_v8 = vadd.f32 %v3661_v4, %v5099_v37  ;;  %v787_v9 = vpop.f32.mrb[27].mxu0  ;;  %v1152_v20 = vadd.f32 1.0, %v3919_v14  ;;  %v1215_v24 = vmul.f32 0.5, %v1151_v13 }
 0x202   : > { %v1031_v16 = vmul.f32 0.5, %v5216_v1  ;;  %v5225_v17 = vadd.f32 %v5099_v37, %v787_v9  ;;  %v1218_v19 = vmul.f32 0.5, %v1154_v12 }
 0x203   : > { %3928 = vtanh.f32 %v1033_v7  ;;  %v1034_v18 = vmul.f32 0.5, %v5220_v8  ;;  %1363 = vrot.lane.b32.xlu0 %v1217_v5, %s4683_s17  ;;  %v1216_v35 = vmul.f32 0.5, %v1152_v20 }
 0x204   : > { %3930 = vtanh.f32 %v1031_v16  ;;  %v1032_v21 = vmul.f32 0.5, %v5225_v17  ;;  %1365 = vrot.lane.b32.xlu1 %v1218_v19, %s4683_s17 }
 0x205   : > { %v3921_v23 = vpop.eup %3920  ;;  %3932 = vtanh.f32 %v1034_v18 }
 0x206   : > { %v3923_v25 = vpop.eup %3922  ;;  %v3664_v28 = vpop.f32.mrb[28].mxu0  ;;  %v1157_v30 = vadd.f32 1.0, %v3921_v23  ;;  %3934 = vtanh.f32 %v1032_v21 }
 0x207   : > { %v5232_v31 = vadd.f32 %v3664_v28, %v5099_v37  ;;  %v800_v34 = vpop.f32.mrb[29].mxu0  ;;  %1359 = vrot.lane.b32.xlu0 %v1215_v24, %s4683_s17  ;;  %v3925_v36 = vpop.eup %3924  ;;  %v1155_v52 = vadd.f32 1.0, %v3923_v25 }
 0x208   : > { %v5236_v38 = vadd.f32 %v5099_v37, %v800_v34  ;;  %v3665_v40 = vpop.f32.mrb[30].mxu0  ;;  %v1221_v45 = vmul.f32 0.5, %v1157_v30  ;;  %1361 = vrot.lane.b32.xlu1 %v1216_v35, %s4683_s17  ;;  %v1158_v50 = vadd.f32 1.0, %v3925_v36  ;;  %v3927_v54 = vpop.eup %3926 }
 0x209   : > { %v1037_v46 = vmul.f32 0.5, %v5232_v31  ;;  %v5240_v48 = vadd.f32 %v3665_v40, %v5099_v37  ;;  %v803_v49 = vpop.f32.mrb[31].mxu0  ;;  %v1156_v0 = vadd.f32 1.0, %v3927_v54  ;;  %v1219_v7 = vmul.f32 0.5, %v1155_v52 }
 0x20a   : > { %v1035_v55 = vmul.f32 0.5, %v5236_v38  ;;  %v5245_v58 = vadd.f32 %v5099_v37, %v803_v49  ;;  %v1222_v63 = vmul.f32 0.5, %v1158_v50 }
 0x20b   : > { %3936 = vtanh.f32 %v1037_v46  ;;  %v1038_v61 = vmul.f32 0.5, %v5240_v48  ;;  %1371 = vrot.lane.b32.xlu0 %v1221_v45, %s4683_s17  ;;  %v1220_v18 = vmul.f32 0.5, %v1156_v0 }
 0x20c   : > { %3938 = vtanh.f32 %v1035_v55  ;;  %v1036_v4 = vmul.f32 0.5, %v5245_v58  ;;  %1373 = vrot.lane.b32.xlu1 %v1222_v63, %s4683_s17 }
 0x20d   : > { %v3929_v5 = vpop.eup %3928  ;;  %3940 = vtanh.f32 %v1038_v61 }
 0x20e   : > { %v3931_v9 = vpop.eup %3930  ;;  %v3668_v12 = vpop.f32.mrb[32].mxu0  ;;  %v1161_v13 = vadd.f32 1.0, %v3929_v5  ;;  %3942 = vtanh.f32 %v1036_v4 }
 0x20f   : > { %v5252_v14 = vadd.f32 %v3668_v12, %v5099_v37  ;;  %v816_v16 = vpop.f32.mrb[33].mxu0  ;;  %1367 = vrot.lane.b32.xlu0 %v1219_v7, %s4683_s17  ;;  %v3933_v19 = vpop.eup %3932  ;;  %v1159_v34 = vadd.f32 1.0, %v3931_v9 }
 0x210   : > { %v5256_v20 = vadd.f32 %v5099_v37, %v816_v16  ;;  %v3669_v21 = vpop.f32.mrb[34].mxu0  ;;  %v1225_v23 = vmul.f32 0.5, %v1161_v13  ;;  %1369 = vrot.lane.b32.xlu1 %v1220_v18, %s4683_s17  ;;  %v1162_v30 = vadd.f32 1.0, %v3933_v19  ;;  %v3935_v35 = vpop.eup %3934 }
 0x211   : > { %v1041_v24 = vmul.f32 0.5, %v5252_v14  ;;  %v5260_v25 = vadd.f32 %v3669_v21, %v5099_v37  ;;  %v819_v28 = vpop.f32.mrb[35].mxu0  ;;  %v1160_v49 = vadd.f32 1.0, %v3935_v35  ;;  %v1223_v54 = vmul.f32 0.5, %v1159_v34 }
 0x212   : > { %v1039_v36 = vmul.f32 0.5, %v5256_v20  ;;  %v5265_v40 = vadd.f32 %v5099_v37, %v819_v28  ;;  %v1226_v46 = vmul.f32 0.5, %v1162_v30 }
 0x213   : > { %3944 = vtanh.f32 %v1041_v24  ;;  %v1042_v45 = vmul.f32 0.5, %v5260_v25  ;;  %1379 = vrot.lane.b32.xlu0 %v1225_v23, %s4683_s17  ;;  %v1224_v5 = vmul.f32 0.5, %v1160_v49 }
 0x214   : > { %3946 = vtanh.f32 %v1039_v36  ;;  %v1040_v50 = vmul.f32 0.5, %v5265_v40  ;;  %1381 = vrot.lane.b32.xlu1 %v1226_v46, %s4683_s17 }
 0x215   : > { %v3937_v52 = vpop.eup %3936  ;;  %3948 = vtanh.f32 %v1042_v45 }
 0x216   : > { %v3939_v55 = vpop.eup %3938  ;;  %v3672_v61 = vpop.f32.mrb[36].mxu0  ;;  %v1165_v63 = vadd.f32 1.0, %v3937_v52  ;;  %3950 = vtanh.f32 %v1040_v50 }
 0x217   : > { %v5272_v0 = vadd.f32 %v3672_v61, %v5099_v37  ;;  %v832_v4 = vpop.f32.mrb[37].mxu0  ;;  %1375 = vrot.lane.b32.xlu0 %v1223_v54, %s4683_s17  ;;  %v3941_v7 = vpop.eup %3940  ;;  %v1163_v23 = vadd.f32 1.0, %v3939_v55 }
 0x218   : > { %v5276_v9 = vadd.f32 %v5099_v37, %v832_v4  ;;  %v3673_v12 = vpop.f32.mrb[38].mxu0  ;;  %v1229_v13 = vmul.f32 0.5, %v1165_v63  ;;  %1377 = vrot.lane.b32.xlu1 %v1224_v5, %s4683_s17  ;;  %v1166_v21 = vadd.f32 1.0, %v3941_v7  ;;  %v3943_v24 = vpop.eup %3942 }
 0x219   : > { %v1045_v16 = vmul.f32 0.5, %v5272_v0  ;;  %v5280_v18 = vadd.f32 %v3673_v12, %v5099_v37  ;;  %v835_v19 = vpop.f32.mrb[39].mxu0  ;;  %v1164_v36 = vadd.f32 1.0, %v3943_v24  ;;  %v1227_v49 = vmul.f32 0.5, %v1163_v23 }
 0x21a   : > { %v1043_v28 = vmul.f32 0.5, %v5276_v9  ;;  %v5285_v30 = vadd.f32 %v5099_v37, %v835_v19  ;;  %v1230_v35 = vmul.f32 0.5, %v1166_v21 }
 0x21b   : > { %3952 = vtanh.f32 %v1045_v16  ;;  %v1046_v34 = vmul.f32 0.5, %v5280_v18  ;;  %1387 = vrot.lane.b32.xlu0 %v1229_v13, %s4683_s17  ;;  %v1228_v63 = vmul.f32 0.5, %v1164_v36 }
 0x21c   : > { %3954 = vtanh.f32 %v1043_v28  ;;  %v1044_v45 = vmul.f32 0.5, %v5285_v30  ;;  %1389 = vrot.lane.b32.xlu1 %v1230_v35, %s4683_s17 }
 0x21d   : > { %v3945_v46 = vpop.eup %3944  ;;  %3956 = vtanh.f32 %v1046_v34 }
 0x21e   : > { %v3947_v50 = vpop.eup %3946  ;;  %v3676_v52 = vpop.f32.mrb[40].mxu0  ;;  %v1169_v54 = vadd.f32 1.0, %v3945_v46  ;;  %3958 = vtanh.f32 %v1044_v45 }
 0x21f   : > { %v5292_v55 = vadd.f32 %v3676_v52, %v5099_v37  ;;  %v848_v61 = vpop.f32.mrb[41].mxu0  ;;  %1383 = vrot.lane.b32.xlu0 %v1227_v49, %s4683_s17  ;;  %v1167_v4 = vadd.f32 1.0, %v3947_v50  ;;  %v3949_v5 = vpop.eup %3948 }
 0x220   : > { %v5296_v7 = vadd.f32 %v5099_v37, %v848_v61  ;;  %v3677_v12 = vpop.f32.mrb[42].mxu0  ;;  %v1233_v13 = vmul.f32 0.5, %v1169_v54  ;;  %1385 = vrot.lane.b32.xlu1 %v1228_v63, %s4683_s17  ;;  %v1170_v23 = vadd.f32 1.0, %v3949_v5  ;;  %v3951_v24 = vpop.eup %3950 }
 0x221   : > { %7011 = vst [vmem:[#allocation25_spill] sm:$0xff] %v5292_v55  ;;  %v1049_v16 = vmul.f32 0.5, %v5292_v55  ;;  %v5300_v19 = vadd.f32 %v3677_v12, %v5099_v37  ;;  %v851_v21 = vpop.f32.mrb[43].mxu0  ;;  %v1231_v35 = vmul.f32 0.5, %v1167_v4  ;;  %v1168_v46 = vadd.f32 1.0, %v3951_v24 }
 0x222   : > { %7012 = vst [vmem:[#allocation26_spill] sm:$0xff] %v5296_v7  ;;  %v1047_v28 = vmul.f32 0.5, %v5296_v7  ;;  %v5305_v34 = vadd.f32 %v5099_v37, %v851_v21  ;;  %v1234_v45 = vmul.f32 0.5, %v1170_v23 }
 0x223   : > { %7013 = vst [vmem:[#allocation27_spill] sm:$0xff] %v5300_v19  ;;  %3960 = vtanh.f32 %v1049_v16  ;;  %v1050_v36 = vmul.f32 0.5, %v5300_v19  ;;  %1395 = vrot.lane.b32.xlu0 %v1233_v13, %s4683_s17  ;;  %v1232_v52 = vmul.f32 0.5, %v1168_v46 }
 0x224   : > { %7014 = vst [vmem:[#allocation28_spill] sm:$0xff] %v5305_v34  ;;  %3962 = vtanh.f32 %v1047_v28  ;;  %v1048_v49 = vmul.f32 0.5, %v5305_v34  ;;  %1397 = vrot.lane.b32.xlu1 %v1234_v45, %s4683_s17 }
 0x225   : > { %v3953_v50 = vpop.eup %3952  ;;  %3964 = vtanh.f32 %v1050_v36 }
 0x226   : > { %v3955_v54 = vpop.eup %3954  ;;  %v3680_v61 = vpop.f32.mrb[44].mxu0  ;;  %v1173_v63 = vadd.f32 1.0, %v3953_v50  ;;  %3966 = vtanh.f32 %v1048_v49 }
 0x227   : > { %v5312_v4 = vadd.f32 %v3680_v61, %v5099_v37  ;;  %v864_v5 = vpop.f32.mrb[45].mxu0  ;;  %1391 = vrot.lane.b32.xlu0 %v1231_v35, %s4683_s17  ;;  %v1171_v12 = vadd.f32 1.0, %v3955_v54  ;;  %v3957_v13 = vpop.eup %3956 }
 0x228   : > { %v5316_v16 = vadd.f32 %v5099_v37, %v864_v5  ;;  %v3681_v21 = vpop.f32.mrb[46].mxu0  ;;  %v1237_v23 = vmul.f32 0.5, %v1173_v63  ;;  %1393 = vrot.lane.b32.xlu1 %v1232_v52, %s4683_s17  ;;  %v1174_v45 = vadd.f32 1.0, %v3957_v13  ;;  %v3959_v46 = vpop.eup %3958 }
 0x229   : > { %7015 = vst [vmem:[#allocation29_spill] sm:$0xff] %v5312_v4  ;;  %v1053_v24 = vmul.f32 0.5, %v5312_v4  ;;  %v5320_v28 = vadd.f32 %v3681_v21, %v5099_v37  ;;  %v867_v36 = vpop.f32.mrb[47].mxu0  ;;  %v1235_v49 = vmul.f32 0.5, %v1171_v12  ;;  %v1172_v63 = vadd.f32 1.0, %v3959_v46 }
 0x22a   : > { %7016 = vst [vmem:[#allocation30_spill] sm:$0xff] %v5316_v16  ;;  %v1051_v35 = vmul.f32 0.5, %v5316_v16  ;;  %v5325_v50 = vadd.f32 %v5099_v37, %v867_v36  ;;  %v1238_v61 = vmul.f32 0.5, %v1174_v45 }
 0x22b   : > { %7017 = vst [vmem:[#allocation31_spill] sm:$0xff] %v5320_v28  ;;  %3968 = vtanh.f32 %v1053_v24  ;;  %v1054_v54 = vmul.f32 0.5, %v5320_v28  ;;  %1403 = vrot.lane.b32.xlu0 %v1237_v23, %s4683_s17  ;;  %v1236_v13 = vmul.f32 0.5, %v1172_v63 }
 0x22c   : > { %7018 = vst [vmem:[#allocation32_spill] sm:$0xff] %v5325_v50  ;;  %3970 = vtanh.f32 %v1051_v35  ;;  %v1052_v5 = vmul.f32 0.5, %v5325_v50  ;;  %1405 = vrot.lane.b32.xlu1 %v1238_v61, %s4683_s17 }
 0x22d   : > { %v3961_v52 = vpop.eup %3960  ;;  %3972 = vtanh.f32 %v1054_v54 }
 0x22e   : > { %v3963_v21 = vpop.eup %3962  ;;  %v1177_v16 = vadd.f32 1.0, %v3961_v52  ;;  %v5331_v36 = vpop.f32.mrb[48].mxu0  ;;  %3974 = vtanh.f32 %v1052_v5 }
 0x22f   : > { %1399 = vrot.lane.b32.xlu0 %v1235_v49, %s4683_s17  ;;  %v1175_v12 = vadd.f32 1.0, %v3963_v21  ;;  %v880_v24 = vpop.f32.mrb[49].mxu0  ;;  %v3965_v28 = vpop.eup %3964  ;;  %3976 = vtanh.f32 %v5102_v39 }
 0x230   : > { %v1241_v23 = vmul.f32 0.5, %v1177_v16  ;;  %v3685_v45 = vpop.f32.mrb[50].mxu0  ;;  %1401 = vrot.lane.b32.xlu1 %v1236_v13, %s4683_s17  ;;  %v1178_v46 = vadd.f32 1.0, %v3965_v28  ;;  %v3967_v50 = vpop.eup %3966  ;;  %3978 = vtanh.f32 %v5105_v41 }
 0x231   : > { %v883_v35 = vpop.f32.mrb[51].mxu0  ;;  %v1239_v54 = vmul.f32 0.5, %v1175_v12  ;;  %v1176_v63 = vadd.f32 1.0, %v3967_v50  ;;  %v3879_v12 = vld [vmem:[#allocation9 + $0x8] sm:$0xff]  }
 0x232   : > { %v1242_v61 = vmul.f32 0.5, %v1178_v46 }
 0x233   : > { %1411 = vrot.lane.b32.xlu0 %v1241_v23, %s4683_s17  ;;  %v1240_v49 = vmul.f32 0.5, %v1176_v63  ;;  %v3878_v23 = vld [vmem:[#allocation9] sm:$0xff]  }
 0x234   : > { %1413 = vrot.lane.b32.xlu1 %v1242_v61, %s4683_s17  ;;  %3698 = vmatprep.subr.bf16.mxu1 %v3878_v23 }
 0x235   : > { %v3969_v52 = vpop.eup %3968  ;;  %3699 = vmatpush3.bf16.msra.mxu1 %v3878_v23  ;;  %v5363_v23 = vadd.f32 %v5099_v37, %v880_v24  ;;  %v5378_v24 = vadd.f32 %v3685_v45, %v5099_v37 }
 0x236   : > { %v3971_v21 = vpop.eup %3970  ;;  %v1181_v4 = vadd.f32 1.0, %v3969_v52  ;;  %v5337_v34 = vpop.f32.mrb[52].mxu0  ;;  %3700 = vmatprep.subr.bf16.mxu1 %v3879_v12 }
 0x237   : > { %1407 = vrot.lane.b32.xlu0 %v1239_v54, %s4683_s17  ;;  %v1179_v16 = vadd.f32 1.0, %v3971_v21  ;;  %v5340_v5 = vpop.f32.mrb[53].mxu0  ;;  %v3973_v28 = vpop.eup %3972  ;;  %7020 = vst [vmem:[#allocation34_spill] sm:$0xff] %v5363_v23  ;;  %7021 = vst [vmem:[#allocation35_spill] sm:$0xff] %v5378_v24 }
 0x238   : > { %v1245_v13 = vmul.f32 0.5, %v1181_v4  ;;  %v5342_v7 = vpop.f32.mrb[54].mxu0  ;;  %1409 = vrot.lane.b32.xlu1 %v1240_v49, %s4683_s17  ;;  %v1182_v50 = vadd.f32 1.0, %v3973_v28  ;;  %v3975_v61 = vpop.eup %3974 }
 0x239   : > { %v899_v46 = vpop.f32.mrb[55].mxu0  ;;  %v1243_v52 = vmul.f32 0.5, %v1179_v16  ;;  %v1180_v54 = vadd.f32 1.0, %v3975_v61  ;;  %3701 = vmatpush3.bf16.msra.mxu1 %v3879_v12  ;;  %v5358_v16 = vadd.f32 %v5099_v37, %v883_v35  ;;  %v1055_v35 = vmul.f32 0.5, %v5363_v23  ;;  %v3977_v39 = vpop.eup %3976 }
 0x23a   : > { %v1246_v63 = vmul.f32 0.5, %v1182_v50  ;;  %v3979_v45 = vpop.eup %3978 }
 0x23b   : > { %1419 = vrot.lane.b32.xlu0 %v1245_v13, %s4683_s17  ;;  %v1244_v4 = vmul.f32 0.5, %v1180_v54  ;;  %7019 = vst [vmem:[#allocation33_spill] sm:$0xff] %v5358_v16  ;;  %v1056_v61 = vmul.f32 0.5, %v5358_v16  ;;  %v1058_v54 = vmul.f32 0.5, %v5378_v24 }
 0x23c   : > { %1421 = vrot.lane.b32.xlu1 %v1246_v63, %s4683_s17 }
 0x23d   : > { %3980 = vtanh.f32 %v1056_v61 }
 0x23e   : > { %v5347_v21 = vpop.f32.mrb[56].mxu0  ;;  %3982 = vtanh.f32 %v5109_v44 }
 0x23f   : > { %1415 = vrot.lane.b32.xlu0 %v1243_v52, %s4683_s17  ;;  %v5350_v19 = vpop.f32.mrb[57].mxu0  ;;  %3984 = vtanh.f32 %v5113_v47  ;;  %v5382_v52 = vadd.f32 %v5331_v36, %v5099_v37  ;;  %v5389_v47 = vadd.f32 %v5099_v37, %v899_v46 }
 0x240   : > { %v5352_v49 = vpop.f32.mrb[58].mxu0  ;;  %1417 = vrot.lane.b32.xlu1 %v1244_v4, %s4683_s17  ;;  %3986 = vtanh.f32 %v1055_v35 }
 0x241   : > { %v5355_v28 = vpop.f32.mrb[59].mxu0  ;;  %7022 = vst [vmem:[#allocation36_spill] sm:$0xff] %v5382_v52  ;;  %3988 = vtanh.f32 %v5118_v51  ;;  %v1057_v41 = vmul.f32 0.5, %v5382_v52 }
 0x242   : > { %3990 = vtanh.f32 %v5121_v53  ;;  %v1060_v53 = vmul.f32 0.5, %v5389_v47 }
 0x243   : > { %3992 = vtanh.f32 %v5125_v56  ;;  %v5400_v56 = vadd.f32 %v5099_v37, %v5340_v5 }
 0x244   : > { %3994 = vtanh.f32 %v1058_v54 }
 0x245   : > { %3996 = vtanh.f32 %v5129_v59  ;;  %v1059_v5 = vmul.f32 0.5, %v5400_v56 }
 0x246   : > { %v5360_v13 = vpop.f32.mrb[60].mxu0  ;;  %3998 = vtanh.f32 %v1057_v41 }
 0x247   : > { %v5365_v50 = vpop.f32.mrb[61].mxu0  ;;  %v3981_v61 = vpop.eup %3980  ;;  %4000 = vtanh.f32 %v5134_v2  ;;  %v5416_v2 = vadd.f32 %v5342_v7, %v5099_v37 }
 0x248   : > { %v5368_v63 = vpop.f32.mrb[62].mxu0  ;;  %v3983_v36 = vpop.eup %3982  ;;  %v1184_v16 = vadd.f32 1.0, %v3981_v61  ;;  %4002 = vtanh.f32 %v1060_v53 }
 0x249   : > { %v5370_v12 = vpop.f32.mrb[63].mxu0  ;;  %v3985_v35 = vpop.eup %3984  ;;  %4004 = vtanh.f32 %v5141_v10 }
 0x24a   : > { %v3987_v24 = vpop.eup %3986  ;;  %4006 = vtanh.f32 %v5137_v6 }
 0x24b   : > { %v1183_v41 = vadd.f32 1.0, %v3987_v24  ;;  %4008 = vtanh.f32 %v5145_v15 }
 0x24c   : > { %4010 = vtanh.f32 %v1059_v5  ;;  %v5441_v5 = vadd.f32 %v5099_v37, %v5355_v28 }
 0x24d   : > { %v1247_v53 = vmul.f32 0.5, %v1183_v41  ;;  %4012 = vtanh.f32 %v5153_v26 }
 0x24e   : > { %4014 = vtanh.f32 %v5161_v33 }
 0x254   : > { %v1332_v44 = vpop.permute.xlu1 %1331 }
 0x255   : > { %v1328_v4 = vpop.permute.xlu0 %1327  ;;  %v5394_v52 = vmul.f32 %v3977_v39, %v1332_v44  ;;  %v3989_v44 = vpop.eup %3988 }
 0x256   : > { %v5402_v54 = vmul.f32 %v3979_v45, %v1328_v4  ;;  %v1248_v4 = vmul.f32 0.5, %v1184_v16  ;;  %v3991_v61 = vpop.eup %3990 }
 0x257   : > { %v3993_v24 = vpop.eup %3992 }
 0x258   : > { %v1334_v51 = vpop.permute.xlu1 %1333 }
 0x259   : > { %v5396_v23 = vmul.f32 %v3983_v36, %v1334_v51  ;;  %v1330_v46 = vpop.permute.xlu0 %1329 }
 0x25a   : > { %v5404_v55 = vmul.f32 %v3985_v35, %v1330_v46  ;;  %v3995_v35 = vpop.eup %3994  ;;  %v5427_v46 = vadd.f32 %v5337_v34, %v5099_v37 }
 0x25b   : > { %v1584_v59 = vpack.c.bf16 %v5396_v23, %v5394_v52  ;;  %v3997_v16 = vpop.eup %3996  ;;  %v1186_v41 = vadd.f32 1.0, %v3995_v35 }
 0x25c   : > { %v1583_v39 = vpack.c.bf16 %v5404_v55, %v5402_v54 }
 0x25d   : > { %1660 = vrot.lane.b32.xlu1 %v1584_v59, %s4684_s20  ;;  %v1340_v45 = vpop.permute.xlu0 %1339  ;;  %v3999_v59 = vpop.eup %3998 }
 0x25e   : > { %v5418_v36 = vmul.f32 %v3989_v44, %v1340_v45  ;;  %1658 = vrot.lane.b32.xlu0 %v1583_v39, %s4684_s20  ;;  %v1342_v10 = vpop.permute.xlu1 %1341  ;;  %v1062_v39 = vmul.f32 0.5, %v5416_v2  ;;  %v4001_v45 = vpop.eup %4000  ;;  %v1185_v35 = vadd.f32 1.0, %v3999_v59  ;;  %v5459_v59 = vadd.f32 %v5099_v37, %v5350_v19 }
 0x25f   : > { %v5423_v51 = vmul.f32 %v3993_v24, %v1342_v10  ;;  %v4003_v24 = vpop.eup %4002 }
 0x260   : > { %4016 = vtanh.f32 %v1062_v39  ;;  %v1063_v37 = vmul.f32 0.5, %v5459_v59 }
 0x261   : > { %1425 = vrot.lane.b32.xlu1 %v1248_v4, %s4683_s17  ;;  %v1336_v7 = vpop.permute.xlu0 %1335  ;;  %v1586_v6 = vpack.c.bf16 %v5423_v51, %v5418_v36  ;;  %v1061_v4 = vmul.f32 0.5, %v5427_v46  ;;  %4018 = vtanh.f32 %v5157_v29  ;;  %v1188_v29 = vadd.f32 1.0, %v4003_v24 }
 0x262   : > { %v5433_v44 = vmul.f32 %v3991_v61, %v1336_v7  ;;  %1423 = vrot.lane.b32.xlu0 %v1247_v53, %s4683_s17  ;;  %v1338_v15 = vpop.permute.xlu1 %1337  ;;  %v4005_v53 = vpop.eup %4004  ;;  %4020 = vtanh.f32 %v5165_v42  ;;  %v1064_v7 = vmul.f32 0.5, %v5441_v5 }
 0x263   : > { %v5437_v34 = vmul.f32 %v3997_v16, %v1338_v15  ;;  %v1250_v16 = vmul.f32 0.5, %v1186_v41  ;;  %v4007_v39 = vpop.eup %4006  ;;  %4022 = vtanh.f32 %v1061_v4  ;;  %v1252_v24 = vmul.f32 0.5, %v1188_v29 }
 0x264   : > { %v4009_v15 = vpop.eup %4008  ;;  %4024 = vtanh.f32 %v5172_v57 }
 0x265   : > { %1664 = vrot.lane.b32.xlu1 %v1586_v6, %s4684_s20  ;;  %v1348_v61 = vpop.permute.xlu0 %1347  ;;  %v1585_v26 = vpack.c.bf16 %v5437_v34, %v5433_v44  ;;  %4026 = vtanh.f32 %v1064_v7 }
 0x266   : > { %v5448_v10 = vmul.f32 %v4001_v45, %v1348_v61  ;;  %v1350_v28 = vpop.permute.xlu1 %1349  ;;  %v1249_v45 = vmul.f32 0.5, %v1185_v35  ;;  %v4011_v61 = vpop.eup %4010  ;;  %4028 = vtanh.f32 %v5180_v3 }
 0x267   : > { %v5452_v33 = vmul.f32 %v4005_v53, %v1350_v28  ;;  %1662 = vrot.lane.b32.xlu0 %v1585_v26, %s4684_s20  ;;  %v4013_v53 = vpop.eup %4012  ;;  %v5474_v28 = vld [vmem:[#allocation8] ss:$0 sm:$0xff]  ;;  %v1187_v7 = vadd.f32 1.0, %v4011_v61  ;;  %4030 = vtanh.f32 %v5176_v62 }
 0x268   : > { %v5478_v57 = vadd.f32 %v5474_v28, %v5352_v49  ;;  %4032 = vtanh.f32 %v5185_v11 }
 0x269   : > { %1429 = vrot.lane.b32.xlu1 %v1250_v16, %s4683_s17  ;;  %v1344_v6 = vpop.permute.xlu0 %1343  ;;  %v1588_v42 = vpack.c.bf16 %v5452_v33, %v5448_v10  ;;  %4034 = vtanh.f32 %v1063_v37  ;;  %v5503_v37 = vadd.f32 %v5474_v28, %v5370_v12 }
 0x26a   : > { %v5463_v41 = vmul.f32 %v4007_v39, %v1344_v6  ;;  %v1346_v26 = vpop.permute.xlu1 %1345  ;;  %v4015_v39 = vpop.eup %4014  ;;  %v1066_v62 = vmul.f32 0.5, %v5478_v57  ;;  %4036 = vtanh.f32 %v5192_v22 }
 0x26b   : > { %v5466_v4 = vmul.f32 %v4009_v15, %v1346_v26  ;;  %1427 = vrot.lane.b32.xlu0 %v1249_v45, %s4683_s17  ;;  %v4017_v6 = vpop.eup %4016  ;;  %v1251_v26 = vmul.f32 0.5, %v1187_v7  ;;  %4038 = vtanh.f32 %v5200_v32 }
 0x26c   : > { %v4019_v15 = vpop.eup %4018  ;;  %4040 = vtanh.f32 %v1066_v62 }
 0x26d   : > { %1668 = vrot.lane.b32.xlu1 %v1588_v42, %s4684_s20  ;;  %v1356_v19 = vpop.permute.xlu0 %1355  ;;  %v1587_v35 = vpack.c.bf16 %v5466_v4, %v5463_v41  ;;  %v5489_v42 = vadd.f32 %v5474_v28, %v5347_v21  ;;  %v4021_v45 = vpop.eup %4020  ;;  %4042 = vtanh.f32 %v5196_v27 }
 0x26e   : > { %v5480_v16 = vmul.f32 %v4013_v53, %v1356_v19  ;;  %v1358_v3 = vpop.permute.xlu1 %1357  ;;  %v4023_v53 = vpop.eup %4022  ;;  %4044 = vtanh.f32 %v5205_v43 }
 0x26f   : > { %v5484_v29 = vmul.f32 %v4015_v39, %v1358_v3  ;;  %1666 = vrot.lane.b32.xlu0 %v1587_v35, %s4684_s20  ;;  %v1190_v35 = vadd.f32 1.0, %v4017_v6  ;;  %v1065_v39 = vmul.f32 0.5, %v5489_v42 }
 0x271   : > { %1433 = vrot.lane.b32.xlu1 %v1252_v24, %s4683_s17  ;;  %v1352_v49 = vpop.permute.xlu0 %1351  ;;  %v1590_v61 = vpack.c.bf16 %v5484_v29, %v5480_v16  ;;  %v4025_v24 = vpop.eup %4024  ;;  %4046 = vtanh.f32 %v1065_v39 }
 0x272   : > { %v5495_v11 = vmul.f32 %v4019_v15, %v1352_v49  ;;  %v1354_v19 = vpop.permute.xlu1 %1353  ;;  %v4027_v3 = vpop.eup %4026  ;;  %v1189_v15 = vadd.f32 1.0, %v4023_v53  ;;  %v5521_v53 = vadd.f32 %v5474_v28, %v5365_v50  ;;  %4048 = vtanh.f32 %v5212_v60 }
 0x273   : > { %v5498_v21 = vmul.f32 %v4021_v45, %v1354_v19  ;;  %1431 = vrot.lane.b32.xlu0 %v1251_v26, %s4683_s17  ;;  %v4029_v49 = vpop.eup %4028  ;;  %v1254_v45 = vmul.f32 0.5, %v1190_v35  ;;  %v1192_v27 = vadd.f32 1.0, %v4027_v3  ;;  %v5538_v60 = vadd.f32 %v5474_v28, %v5368_v63 }
 0x274   : > { %v4031_v62 = vpop.eup %4030  ;;  %v1067_v50 = vmul.f32 0.5, %v5521_v53 }
 0x275   : > { %1672 = vrot.lane.b32.xlu1 %v1590_v61, %s4684_s20  ;;  %v1364_v7 = vpop.permute.xlu0 %1363  ;;  %v1589_v22 = vpack.c.bf16 %v5498_v21, %v5495_v11  ;;  %v1068_v61 = vmul.f32 0.5, %v5503_v37  ;;  %v4033_v19 = vpop.eup %4032 }
 0x276   : > { %v5510_v6 = vmul.f32 %v4025_v24, %v1364_v7  ;;  %v1366_v12 = vpop.permute.xlu1 %1365  ;;  %v1253_v24 = vmul.f32 0.5, %v1189_v15  ;;  %v4035_v7 = vpop.eup %4034 }
 0x277   : > { %v5514_v32 = vmul.f32 %v4029_v49, %v1366_v12  ;;  %1670 = vrot.lane.b32.xlu0 %v1589_v22, %s4684_s20  ;;  %4050 = vtanh.f32 %v1068_v61  ;;  %v4037_v49 = vpop.eup %4036  ;;  %v1256_v12 = vmul.f32 0.5, %v1192_v27 }
 0x278   : > { %4052 = vtanh.f32 %v5220_v8  ;;  %v4039_v61 = vpop.eup %4038 }
 0x279   : > { %1437 = vrot.lane.b32.xlu1 %v1254_v45, %s4683_s17  ;;  %v1360_v26 = vpop.permute.xlu0 %1359  ;;  %v1592_v43 = vpack.c.bf16 %v5514_v32, %v5510_v6  ;;  %4054 = vtanh.f32 %v5216_v1  ;;  %v1070_v1 = vmul.f32 0.5, %v5538_v60 }
 0x27a   : > { %v5525_v35 = vmul.f32 %v4031_v62, %v1360_v26  ;;  %v1362_v22 = vpop.permute.xlu1 %1361  ;;  %v1191_v62 = vadd.f32 1.0, %v4035_v7  ;;  %v4041_v26 = vpop.eup %4040  ;;  %4056 = vtanh.f32 %v5225_v17 }
 0x27b   : > { %v5528_v39 = vmul.f32 %v4033_v19, %v1362_v22  ;;  %1435 = vrot.lane.b32.xlu0 %v1253_v24, %s4683_s17  ;;  %v4043_v27 = vpop.eup %4042  ;;  %4058 = vtanh.f32 %v1067_v50 }
 0x27c   : > { %v4045_v24 = vpop.eup %4044  ;;  %v1255_v22 = vmul.f32 0.5, %v1191_v62  ;;  %4060 = vtanh.f32 %v5232_v31 }
 0x27d   : > { %1676 = vrot.lane.b32.xlu1 %v1592_v43, %s4684_s20  ;;  %v1372_v3 = vpop.permute.xlu0 %1371  ;;  %v1591_v15 = vpack.c.bf16 %v5528_v39, %v5525_v35  ;;  %v5549_v43 = vadd.f32 %v5474_v28, %v5360_v13  ;;  %4062 = vtanh.f32 %v5240_v48 }
 0x27e   : > { %v5540_v45 = vmul.f32 %v4037_v49, %v1372_v3  ;;  %v1374_v8 = vpop.permute.xlu1 %1373  ;;  %v4047_v49 = vpop.eup %4046  ;;  %4064 = vtanh.f32 %v1070_v1 }
 0x27f   : > { %v5544_v19 = vmul.f32 %v4039_v61, %v1374_v8  ;;  %1674 = vrot.lane.b32.xlu0 %v1591_v15, %s4684_s20  ;;  %v1194_v15 = vadd.f32 1.0, %v4041_v26  ;;  %v4049_v28 = vpop.eup %4048  ;;  %v1069_v50 = vmul.f32 0.5, %v5549_v43  ;;  %v1193_v8 = vadd.f32 1.0, %v4047_v49 }
 0x280   : > { %7023 = vst [vmem:[#allocation37_spill] sm:$0xff] %v5540_v45  ;;  %4066 = vtanh.f32 %v5236_v38 }
 0x281   : > { %7024 = vst [vmem:[#allocation38_spill] sm:$0xff] %v5544_v19  ;;  %1441 = vrot.lane.b32.xlu1 %v1256_v12, %s4683_s17  ;;  %v1368_v63 = vpop.permute.xlu0 %1367  ;;  %v1594_v7 = vpack.c.bf16 %v5544_v19, %v5540_v45  ;;  %v4051_v61 = vpop.eup %4050  ;;  %4068 = vtanh.f32 %v5245_v58  ;;  %v1257_v38 = vmul.f32 0.5, %v1193_v8 }
 0x282   : > { %v5555_v17 = vmul.f32 %v4043_v27, %v1368_v63  ;;  %v1370_v3 = vpop.permute.xlu1 %1369  ;;  %v4053_v26 = vpop.eup %4052  ;;  %v1258_v63 = vmul.f32 0.5, %v1194_v15  ;;  %4070 = vtanh.f32 %v1069_v50 }
 0x283   : > { %v5558_v13 = vmul.f32 %v4045_v24, %v1370_v3  ;;  %1439 = vrot.lane.b32.xlu0 %v1255_v22, %s4683_s17  ;;  %v4055_v24 = vpop.eup %4054  ;;  %4072 = vtanh.f32 %v5252_v14 }
 0x284   : > { %7025 = vst [vmem:[#allocation39_spill] sm:$0xff] %v5555_v17  ;;  %v4057_v22 = vpop.eup %4056  ;;  %4074 = vtanh.f32 %v5260_v25 }
 0x285   : > { %7026 = vst [vmem:[#allocation40_spill] sm:$0xff] %v5558_v13  ;;  %1680 = vrot.lane.b32.xlu1 %v1594_v7, %s4684_s20  ;;  %v1380_v12 = vpop.permute.xlu0 %1379  ;;  %v1593_v62 = vpack.c.bf16 %v5558_v13, %v5555_v17  ;;  %v1196_v7 = vadd.f32 1.0, %v4051_v61  ;;  %v4059_v15 = vpop.eup %4058  ;;  %4076 = vtanh.f32 %v5256_v20 }
 0x286   : > { %v5566_v31 = vmul.f32 %v4049_v28, %v1380_v12  ;;  %v1382_v27 = vpop.permute.xlu1 %1381  ;;  %v4061_v50 = vpop.eup %4060  ;;  %v1195_v8 = vadd.f32 1.0, %v4059_v15  ;;  %4078 = vtanh.f32 %v5265_v40 }
 0x287   : > { %v5570_v48 = vmul.f32 %v4053_v26, %v1382_v27  ;;  %1678 = vrot.lane.b32.xlu0 %v1593_v62, %s4684_s20  ;;  %v1260_v61 = vmul.f32 0.5, %v1196_v7  ;;  %v4063_v27 = vpop.eup %4062  ;;  %4080 = vtanh.f32 %v5272_v0 }
 0x288   : > { %7027 = vst [vmem:[#allocation41_spill] sm:$0xff] %v5566_v31  ;;  %4082 = vtanh.f32 %v5280_v18 }
 0x289   : > { %7028 = vst [vmem:[#allocation42_spill] sm:$0xff] %v5570_v48  ;;  %1445 = vrot.lane.b32.xlu1 %v1258_v63, %s4683_s17  ;;  %v1376_v1 = vpop.permute.xlu0 %1375  ;;  %v1596_v49 = vpack.c.bf16 %v5570_v48, %v5566_v31  ;;  %v4065_v63 = vpop.eup %4064  ;;  %4084 = vtanh.f32 %v5276_v9  ;;  %v7038_v9 = vld [vmem:[#allocation25_spill] sm:$0xff] }
 0x28a   : > { %v5576_v3 = vmul.f32 %v4055_v24, %v1376_v1  ;;  %v1378_v58 = vpop.permute.xlu1 %1377  ;;  %v4067_v25 = vpop.eup %4066  ;;  %4086 = vtanh.f32 %v5285_v30 }
 0x28b   : > { %v5579_v28 = vmul.f32 %v4057_v22, %v1378_v58  ;;  %1443 = vrot.lane.b32.xlu0 %v1257_v38, %s4683_s17  ;;  %v4069_v7 = vpop.eup %4068  ;;  %v1259_v38 = vmul.f32 0.5, %v1195_v8  ;;  %v1198_v58 = vadd.f32 1.0, %v4065_v63  ;;  %4088 = vtanh.f32 %v7038_v9 }
 0x28c   : > { %7029 = vst [vmem:[#allocation43_spill] sm:$0xff] %v5576_v3  ;;  %v4071_v20 = vpop.eup %4070 }
 0x28d   : > { %7030 = vst [vmem:[#allocation44_spill] sm:$0xff] %v5579_v28  ;;  %1684 = vrot.lane.b32.xlu1 %v1596_v49, %s4684_s20  ;;  %v1388_v12 = vpop.permute.xlu0 %1387  ;;  %v1595_v62 = vpack.c.bf16 %v5579_v28, %v5576_v3  ;;  %v4073_v40 = vpop.eup %4072  ;;  %v1197_v8 = vadd.f32 1.0, %v4071_v20 }
 0x28e   : > { %v5586_v26 = vmul.f32 %v4061_v50, %v1388_v12  ;;  %v1390_v14 = vpop.permute.xlu1 %1389 }
 0x28f   : > { %v5589_v24 = vmul.f32 %v4063_v27, %v1390_v14  ;;  %1682 = vrot.lane.b32.xlu0 %v1595_v62, %s4684_s20  ;;  %v4075_v27 = vpop.eup %4074  ;;  %v1262_v14 = vmul.f32 0.5, %v1198_v58 }
 0x290   : > { %7031 = vst [vmem:[#allocation45_spill] sm:$0xff] %v5586_v26 }
 0x291   : > { %7032 = vst [vmem:[#allocation46_spill] sm:$0xff] %v5589_v24  ;;  %1449 = vrot.lane.b32.xlu1 %v1260_v61, %s4683_s17  ;;  %v1384_v1 = vpop.permute.xlu0 %1383  ;;  %v1598_v22 = vpack.c.bf16 %v5589_v24, %v5586_v26 }
 0x292   : > { %v5596_v49 = vmul.f32 %v4067_v25, %v1384_v1  ;;  %v1386_v15 = vpop.permute.xlu1 %1385  ;;  %v4077_v25 = vpop.eup %4076 }
 0x293   : > { %v5599_v50 = vmul.f32 %v4069_v7, %v1386_v15  ;;  %1447 = vrot.lane.b32.xlu0 %v1259_v38, %s4683_s17  ;;  %v4079_v38 = vpop.eup %4078 }
 0x294   : > { %7033 = vst [vmem:[#allocation47_spill] sm:$0xff] %v5596_v49  ;;  %v4081_v58 = vpop.eup %4080 }
 0x295   : > { %7034 = vst [vmem:[#allocation48_spill] sm:$0xff] %v5599_v50  ;;  %1688 = vrot.lane.b32.xlu1 %v1598_v22, %s4684_s20  ;;  %v1396_v12 = vpop.permute.xlu0 %1395  ;;  %v1597_v61 = vpack.c.bf16 %v5599_v50, %v5596_v49  ;;  %v1261_v22 = vmul.f32 0.5, %v1197_v8  ;;  %v4083_v8 = vpop.eup %4082 }
 0x296   : > { %v5606_v62 = vmul.f32 %v4073_v40, %v1396_v12  ;;  %v1398_v0 = vpop.permute.xlu1 %1397  ;;  %v7040_v40 = vld [vmem:[#allocation27_spill] sm:$0xff] }
 0x297   : > { %v5609_v63 = vmul.f32 %v4075_v27, %v1398_v0  ;;  %1686 = vrot.lane.b32.xlu0 %v1597_v61, %s4684_s20  ;;  %4090 = vtanh.f32 %v7040_v40  ;;  %v7042_v27 = vld [vmem:[#allocation26_spill] sm:$0xff] }
 0x298   : > { %7035 = vst [vmem:[#allocation49_spill] sm:$0xff] %v5606_v62  ;;  %4092 = vtanh.f32 %v7042_v27 }
 0x299   : > { %7036 = vst [vmem:[#allocation50_spill] sm:$0xff] %v5609_v63  ;;  %1453 = vrot.lane.b32.xlu1 %v1262_v14, %s4683_s17  ;;  %v1392_v18 = vpop.permute.xlu0 %1391  ;;  %v1600_v1 = vpack.c.bf16 %v5609_v63, %v5606_v62 }
 0x29a   : > { %v5616_v7 = vmul.f32 %v4077_v25, %v1392_v18  ;;  %v1394_v20 = vpop.permute.xlu1 %1393  ;;  %v4085_v25 = vpop.eup %4084  ;;  %v7044_v18 = vld [vmem:[#allocation28_spill] sm:$0xff] }
 0x29b   : > { %v5619_v15 = vmul.f32 %v4079_v38, %v1394_v20  ;;  %1451 = vrot.lane.b32.xlu0 %v1261_v22, %s4683_s17  ;;  %4094 = vtanh.f32 %v7044_v18  ;;  %v4087_v9 = vpop.eup %4086  ;;  %v7046_v20 = vld [vmem:[#allocation29_spill] sm:$0xff] }
 0x29c   : > { %7037 = vst [vmem:[#allocation51_spill] sm:$0xff] %v5616_v7  ;;  %4096 = vtanh.f32 %v7046_v20  ;;  %v7052_v20 = vld [vmem:[#allocation32_spill] sm:$0xff] }
 0x29d   : > { %7039 = vst [vmem:[#allocation25_spill] sm:$0xff] %v5619_v15  ;;  %1692 = vrot.lane.b32.xlu1 %v1600_v1, %s4684_s20  ;;  %v1404_v30 = vpop.permute.xlu0 %1403  ;;  %v1599_v12 = vpack.c.bf16 %v5619_v15, %v5616_v7 }
 0x29e   : > { %v5626_v61 = vmul.f32 %v4081_v58, %v1404_v30  ;;  %v1406_v0 = vpop.permute.xlu1 %1405  ;;  %v4089_v30 = vpop.eup %4088 }
 0x29f   : > { %v5629_v14 = vmul.f32 %v4083_v8, %v1406_v0  ;;  %1690 = vrot.lane.b32.xlu0 %v1599_v12, %s4684_s20  ;;  %v7048_v8 = vld [vmem:[#allocation31_spill] sm:$0xff] }
 0x2a0   : > { %7041 = vst [vmem:[#allocation27_spill] sm:$0xff] %v5626_v61  ;;  %4098 = vtanh.f32 %v7048_v8 }
 0x2a1   : > { %7043 = vst [vmem:[#allocation26_spill] sm:$0xff] %v5629_v14  ;;  %v1400_v22 = vpop.permute.xlu0 %1399  ;;  %v1602_v1 = vpack.c.bf16 %v5629_v14, %v5626_v61  ;;  %v4091_v18 = vpop.eup %4090 }
 0x2a2   : > { %v5635_v38 = vmul.f32 %v4085_v25, %v1400_v22  ;;  %v1402_v58 = vpop.permute.xlu1 %1401  ;;  %v7050_v25 = vld [vmem:[#allocation30_spill] sm:$0xff] }
 0x2a3   : > { %v5638_v40 = vmul.f32 %v4087_v9, %v1402_v58  ;;  %1696 = vrot.lane.b32.xlu1 %v1602_v1, %s4684_s20  ;;  %4100 = vtanh.f32 %v7050_v25  ;;  %v4093_v9 = vpop.eup %4092 }
 0x2a4   : > { %7045 = vst [vmem:[#allocation28_spill] sm:$0xff] %v5635_v38  ;;  %4102 = vtanh.f32 %v7052_v20 }
 0x2a5   : > { %7047 = vst [vmem:[#allocation29_spill] sm:$0xff] %v5638_v40  ;;  %v1412_v12 = vpop.permute.xlu0 %1411  ;;  %v1601_v27 = vpack.c.bf16 %v5638_v40, %v5635_v38  ;;  %v4095_v40 = vpop.eup %4094 }
 0x2a6   : > { %v5644_v0 = vmul.f32 %v4089_v30, %v1412_v12  ;;  %v1414_v22 = vpop.permute.xlu1 %1413  ;;  %v4097_v25 = vpop.eup %4096 }
 0x2a7   : > { %v5647_v14 = vmul.f32 %v4091_v18, %v1414_v22  ;;  %1694 = vrot.lane.b32.xlu0 %v1601_v27, %s4684_s20 }
 0x2a8   : > { %7049 = vst [vmem:[#allocation31_spill] sm:$0xff] %v5644_v0 }
 0x2a9   : > { %7051 = vst [vmem:[#allocation30_spill] sm:$0xff] %v5647_v14  ;;  %v1408_v1 = vpop.permute.xlu0 %1407  ;;  %v1604_v58 = vpack.c.bf16 %v5647_v14, %v5644_v0 }
 0x2aa   : > { %v5653_v8 = vmul.f32 %v4093_v9, %v1408_v1  ;;  %v1410_v30 = vpop.permute.xlu1 %1409  ;;  %v4099_v20 = vpop.eup %4098 }
 0x2ab   : > { %v5655_v12 = vmul.f32 %v4095_v40, %v1410_v30  ;;  %1700 = vrot.lane.b32.xlu1 %v1604_v58, %s4684_s20 }
 0x2ac   : > { %7053 = vst [vmem:[#allocation32_spill] sm:$0xff] %v5653_v8 }
 0x2ad   : > { %7054 = vst [vmem:[#allocation52_spill] sm:$0xff] %v5655_v12  ;;  %v1420_v18 = vpop.permute.xlu0 %1419  ;;  %v1603_v27 = vpack.c.bf16 %v5655_v12, %v5653_v8  ;;  %v4101_v9 = vpop.eup %4100 }
 0x2ae   : > { %v5660_v22 = vmul.f32 %v4097_v25, %v1420_v18  ;;  %v1422_v38 = vpop.permute.xlu1 %1421  ;;  %v4103_v58 = vpop.eup %4102  ;;  %v7060_v18 = vld [vmem:[#allocation34_spill] sm:$0xff] }
 0x2af   : > { %v5662_v61 = vmul.f32 %v4099_v20, %v1422_v38  ;;  %1698 = vrot.lane.b32.xlu0 %v1603_v27, %s4684_s20  ;;  %v7059_v38 = vld [vmem:[#allocation33_spill] sm:$0xff] }
 0x2b0   : > { %7055 = vst [vmem:[#allocation53_spill] sm:$0xff] %v5660_v22  ;;  %4104 = vtanh.f32 %v7059_v38 }
 0x2b1   : > { %7056 = vst [vmem:[#allocation54_spill] sm:$0xff] %v5662_v61  ;;  %v1416_v1 = vpop.permute.xlu0 %1415  ;;  %v1606_v40 = vpack.c.bf16 %v5662_v61, %v5660_v22  ;;  %4106 = vtanh.f32 %v7060_v18 }
 0x2b2   : > { %v5667_v30 = vmul.f32 %v4101_v9, %v1416_v1  ;;  %v1418_v14 = vpop.permute.xlu1 %1417  ;;  %v7061_v9 = vld [vmem:[#allocation36_spill] sm:$0xff] }
 0x2b3   : > { %v5669_v0 = vmul.f32 %v4103_v58, %v1418_v14  ;;  %1704 = vrot.lane.b32.xlu1 %v1606_v40, %s4684_s20  ;;  %4108 = vtanh.f32 %v7061_v9  ;;  %v7062_v58 = vld [vmem:[#allocation35_spill] sm:$0xff] }
 0x2b4   : > { %7057 = vst [vmem:[#allocation55_spill] sm:$0xff] %v5667_v30  ;;  %4110 = vtanh.f32 %v7062_v58 }
 0x2b5   : > { %7058 = vst [vmem:[#allocation56_spill] sm:$0xff] %v5669_v0  ;;  %v1605_v25 = vpack.c.bf16 %v5669_v0, %v5667_v30  ;;  %4112 = vtanh.f32 %v5400_v56 }
 0x2b6   : > { %4114 = vtanh.f32 %v5389_v47 }
 0x2b7   : > { %1702 = vrot.lane.b32.xlu0 %v1605_v25, %s4684_s20  ;;  %4116 = vtanh.f32 %v5427_v46 }
 0x2b8   : > { %4118 = vtanh.f32 %v5416_v2 }
 0x2b9   : > { %4120 = vtanh.f32 %v5459_v59 }
 0x2ba   : > { %v4105_v14 = vpop.eup %4104  ;;  %4122 = vtanh.f32 %v5441_v5 }
 0x2bb   : > { %v4107_v40 = vpop.eup %4106  ;;  %4124 = vtanh.f32 %v5489_v42 }
 0x2bc   : > { %4126 = vtanh.f32 %v5478_v57 }
 0x2bd   : > { %4128 = vtanh.f32 %v5521_v53 }
 0x2be   : > { %4130 = vtanh.f32 %v5503_v37 }
 0x2bf   : > { %4132 = vtanh.f32 %v5549_v43 }
 0x2c0   : > { %4134 = vtanh.f32 %v5538_v60 }
 0x2cf   : > { %v1661_v27 = vpop.permute.xlu1 %1660 }
 0x2d0   : > { %v1659_v20 = vpop.permute.xlu0 %1658 }
 0x2d1   : > { %3702 = vmatprep.mubr.msk.bf16.mxu1 %vm1734_vm1, %v1659_v20 }
 0x2d2   : > { %3703 = vmatmul.mubr.msk.bf16.vlgmr.msra.gmra.mrb[0].mxu1 %vm1734_vm1, %v1661_v27 }
 0x2d3   : > { %v1426_v1 = vpop.permute.xlu1 %1425 }
 0x2d4   : > { %v5681_v0 = vmul.f32 %v4105_v14, %v1426_v1  ;;  %v1424_v25 = vpop.permute.xlu0 %1423  ;;  %v4109_v14 = vpop.eup %4108 }
 0x2d5   : > { %v5683_v38 = vmul.f32 %v4107_v40, %v1424_v25  ;;  %v4111_v9 = vpop.eup %4110 }
 0x2d6   : > { %7063 = vst [vmem:[#allocation33_spill] sm:$0xff] %v5681_v0  ;;  %v4113_v56 = vpop.eup %4112 }
 0x2d7   : > { %7064 = vst [vmem:[#allocation34_spill] sm:$0xff] %v5683_v38  ;;  %v1607_v18 = vpack.c.bf16 %v5681_v0, %v5683_v38  ;;  %v1665_v30 = vpop.permute.xlu1 %1664 }
 0x2d9   : > { %1706 = vrot.lane.b32.xlu0 %v1607_v18, %s4684_s20  ;;  %v1663_v20 = vpop.permute.xlu0 %1662 }
 0x2da   : > { %3706 = vmatprep.mubr.msk.bf16.mxu1 %vm1734_vm1, %v1663_v20 }
 0x2db   : > { %v1430_v27 = vpop.permute.xlu1 %1429  ;;  %3707 = vmatmul.mubr.msk.bf16.gmra.mrb[4].mxu1 %vm1734_vm1, %v1665_v30  ;;  %v4115_v30 = vpop.eup %4114 }
 0x2dc   : > { %v5692_v40 = vmul.f32 %v4111_v9, %v1430_v27 }
 0x2dd   : > { %v1428_v1 = vpop.permute.xlu0 %1427 }
 0x2de   : > { %7065 = vst [vmem:[#allocation36_spill] sm:$0xff] %v5692_v40  ;;  %v5694_v58 = vmul.f32 %v4109_v14, %v1428_v1 }
 0x2df   : > { %v1669_v25 = vpop.permute.xlu1 %1668 }
 0x2e0   : > { %7066 = vst [vmem:[#allocation35_spill] sm:$0xff] %v5694_v58  ;;  %v1608_v18 = vpack.c.bf16 %v5692_v40, %v5694_v58 }
 0x2e1   : > { %v1667_v0 = vpop.permute.xlu0 %1666 }
 0x2e2   : > { %1708 = vrot.lane.b32.xlu1 %v1608_v18, %s4684_s20  ;;  %3710 = vmatprep.mubr.msk.bf16.mxu1 %vm1734_vm1, %v1667_v0  ;;  %v4117_v0 = vpop.eup %4116 }
 0x2e3   : > { %v1434_v47 = vpop.permute.xlu1 %1433  ;;  %3711 = vmatmul.mubr.msk.bf16.gmra.mrb[8].mxu1 %vm1734_vm1, %v1669_v25  ;;  %v4119_v25 = vpop.eup %4118 }
 0x2e4   : > { %v5703_v27 = vmul.f32 %v4115_v30, %v1434_v47 }
 0x2e5   : > { %v1432_v20 = vpop.permute.xlu0 %1431 }
 0x2e6   : > { %7067 = vst [vmem:[#allocation57_spill] sm:$0xff] %v5703_v27  ;;  %v5705_v14 = vmul.f32 %v4113_v56, %v1432_v20 }
 0x2e7   : > { %v1673_v9 = vpop.permute.xlu1 %1672 }
 0x2e8   : > { %7068 = vst [vmem:[#allocation58_spill] sm:$0xff] %v5705_v14  ;;  %v1609_v46 = vpack.c.bf16 %v5703_v27, %v5705_v14 }
 0x2e9   : > { %v1671_v1 = vpop.permute.xlu0 %1670 }
 0x2ea   : > { %1710 = vrot.lane.b32.xlu0 %v1609_v46, %s4684_s20  ;;  %3714 = vmatprep.mubr.msk.bf16.mxu1 %vm1734_vm1, %v1671_v1 }
 0x2eb   : > { %v1438_v2 = vpop.permute.xlu1 %1437  ;;  %3715 = vmatmul.mubr.msk.bf16.gmra.mrb[12].mxu1 %vm1734_vm1, %v1673_v9  ;;  %v4121_v9 = vpop.eup %4120 }
 0x2ec   : > { %v5714_v47 = vmul.f32 %v4119_v25, %v1438_v2  ;;  %v4123_v46 = vpop.eup %4122 }
 0x2ed   : > { %v1436_v18 = vpop.permute.xlu0 %1435 }
 0x2ee   : > { %7069 = vst [vmem:[#allocation59_spill] sm:$0xff] %v5714_v47  ;;  %v5716_v56 = vmul.f32 %v4117_v0, %v1436_v18 }
 0x2ef   : > { %v1677_v30 = vpop.permute.xlu1 %1676 }
 0x2f0   : > { %7070 = vst [vmem:[#allocation60_spill] sm:$0xff] %v5716_v56  ;;  %v1610_v59 = vpack.c.bf16 %v5714_v47, %v5716_v56 }
 0x2f1   : > { %v1675_v20 = vpop.permute.xlu0 %1674 }
 0x2f2   : > { %1712 = vrot.lane.b32.xlu1 %v1610_v59, %s4684_s20  ;;  %3718 = vmatprep.mubr.msk.bf16.mxu1 %vm1734_vm1, %v1675_v20 }
 0x2f3   : > { %v1442_v5 = vpop.permute.xlu1 %1441  ;;  %3719 = vmatmul.mubr.msk.bf16.gmra.mrb[16].mxu1 %vm1734_vm1, %v1677_v30  ;;  %v4125_v30 = vpop.eup %4124 }
 0x2f4   : > { %v5725_v2 = vmul.f32 %v4123_v46, %v1442_v5  ;;  %v4127_v59 = vpop.eup %4126 }
 0x2f5   : > { %v1440_v1 = vpop.permute.xlu0 %1439 }
 0x2f6   : > { %7071 = vst [vmem:[#allocation61_spill] sm:$0xff] %v5725_v2  ;;  %v5727_v0 = vmul.f32 %v4121_v9, %v1440_v1 }
 0x2f7   : > { %v1681_v25 = vpop.permute.xlu1 %1680 }
 0x2f8   : > { %7072 = vst [vmem:[#allocation62_spill] sm:$0xff] %v5727_v0  ;;  %v1611_v42 = vpack.c.bf16 %v5725_v2, %v5727_v0 }
 0x2f9   : > { %v1679_v18 = vpop.permute.xlu0 %1678 }
 0x2fa   : > { %1714 = vrot.lane.b32.xlu0 %v1611_v42, %s4684_s20  ;;  %3722 = vmatprep.mubr.msk.bf16.mxu1 %vm1734_vm1, %v1679_v18 }
 0x2fb   : > { %v1446_v57 = vpop.permute.xlu1 %1445  ;;  %3723 = vmatmul.mubr.msk.bf16.gmra.mrb[20].mxu1 %vm1734_vm1, %v1681_v25  ;;  %v4129_v25 = vpop.eup %4128 }
 0x2fc   : > { %v5736_v5 = vmul.f32 %v4127_v59, %v1446_v57  ;;  %v4131_v42 = vpop.eup %4130 }
 0x2fd   : > { %v1444_v20 = vpop.permute.xlu0 %1443  ;;  %v4133_v60 = vpop.eup %4132 }
 0x2fe   : > { %7073 = vst [vmem:[#allocation63_spill] sm:$0xff] %v5736_v5  ;;  %v5738_v9 = vmul.f32 %v4125_v30, %v1444_v20 }
 0x2ff   : > { %v1685_v46 = vpop.permute.xlu1 %1684 }
 0x300   : > { %7074 = vst [vmem:[#allocation64_spill] sm:$0xff] %v5738_v9  ;;  %v1612_v53 = vpack.c.bf16 %v5736_v5, %v5738_v9 }
 0x301   : > { %v1683_v1 = vpop.permute.xlu0 %1682 }
 0x302   : > { %1716 = vrot.lane.b32.xlu1 %v1612_v53, %s4684_s20  ;;  %3726 = vmatprep.mubr.msk.bf16.mxu1 %vm1734_vm1, %v1683_v1 }
 0x303   : > { %v1450_v37 = vpop.permute.xlu1 %1449  ;;  %3727 = vmatmul.mubr.msk.bf16.gmra.mrb[24].mxu1 %vm1734_vm1, %v1685_v46  ;;  %v4135_v46 = vpop.eup %4134 }
 0x304   : > { %v5747_v57 = vmul.f32 %v4131_v42, %v1450_v37 }
 0x305   : > { %v1448_v18 = vpop.permute.xlu0 %1447 }
 0x306   : > { %7075 = vst [vmem:[#allocation65_spill] sm:$0xff] %v5747_v57  ;;  %v5749_v30 = vmul.f32 %v4129_v25, %v1448_v18 }
 0x307   : > { %v1689_v59 = vpop.permute.xlu1 %1688 }
 0x308   : > { %7076 = vst [vmem:[#allocation66_spill] sm:$0xff] %v5749_v30  ;;  %v1613_v43 = vpack.c.bf16 %v5747_v57, %v5749_v30 }
 0x309   : > { %v1687_v20 = vpop.permute.xlu0 %1686 }
 0x30a   : > { %1718 = vrot.lane.b32.xlu0 %v1613_v43, %s4684_s20  ;;  %3730 = vmatprep.mubr.msk.bf16.mxu1 %vm1734_vm1, %v1687_v20 }
 0x30b   : > { %v1454_v53 = vpop.permute.xlu1 %1453  ;;  %3731 = vmatmul.mubr.msk.bf16.gmra.mrb[28].mxu1 %vm1734_vm1, %v1689_v59 }
 0x30c   : > { %v5756_v2 = vmul.f32 %v4135_v46, %v1454_v53 }
 0x30d   : > { %v1452_v1 = vpop.permute.xlu0 %1451 }
 0x30e   : > { %7077 = vst [vmem:[#allocation67_spill] sm:$0xff] %v5756_v2  ;;  %v5758_v37 = vmul.f32 %v4133_v60, %v1452_v1 }
 0x30f   : > { %v1693_v18 = vpop.permute.xlu1 %1692 }
 0x310   : > { %7078 = vst [vmem:[#allocation68_spill] sm:$0xff] %v5758_v37  ;;  %v1614_v25 = vpack.c.bf16 %v5756_v2, %v5758_v37 }
 0x311   : > { %v1691_v42 = vpop.permute.xlu0 %1690 }
 0x312   : > { %1720 = vrot.lane.b32.xlu1 %v1614_v25, %s4684_s20  ;;  %3734 = vmatprep.mubr.msk.bf16.mxu1 %vm1734_vm1, %v1691_v42 }
 0x313   : > { %3735 = vmatmul.mubr.msk.bf16.gmra.mrb[32].mxu1 %vm1734_vm1, %v1693_v18 }
 0x315   : > { %v1697_v59 = vpop.permute.xlu1 %1696 }
 0x319   : > { %v1695_v43 = vpop.permute.xlu0 %1694 }
 0x31a   : > { %3738 = vmatprep.mubr.msk.bf16.mxu1 %vm1734_vm1, %v1695_v43 }
 0x31b   : > { %3739 = vmatmul.mubr.msk.bf16.gmra.mrb[36].mxu1 %vm1734_vm1, %v1697_v59 }
 0x31d   : > { %v1701_v53 = vpop.permute.xlu1 %1700 }
 0x321   : > { %v1699_v20 = vpop.permute.xlu0 %1698 }
 0x322   : > { %3742 = vmatprep.mubr.msk.bf16.mxu1 %vm1734_vm1, %v1699_v20 }
 0x323   : > { %3743 = vmatmul.mubr.msk.bf16.gmra.mrb[40].mxu1 %vm1734_vm1, %v1701_v53 }
 0x325   : > { %v1705_v46 = vpop.permute.xlu1 %1704 }
 0x329   : > { %v1703_v60 = vpop.permute.xlu0 %1702 }
 0x32a   : > { %3746 = vmatprep.mubr.msk.bf16.mxu1 %vm1734_vm1, %v1703_v60  ;;  %v5779_v60 = vld [vmem:[#allocation11] ss:$0 sm:$0xff] }
 0x32b   : > { %3747 = vmatmul.mubr.msk.bf16.gmra.mrb[44].mxu1 %vm1734_vm1, %v1705_v46 }
 0x34b   : > { %v1707_v1 = vpop.permute.xlu0 %1706 }
 0x34c   : > { %3750 = vmatprep.mubr.msk.bf16.mxu1 %vm1734_vm1, %v1707_v1 }
 0x354   : > { %v1709_v25 = vpop.permute.xlu1 %1708 }
 0x355   : > { %3751 = vmatmul.mubr.msk.bf16.gmra.mrb[48].mxu1 %vm1734_vm1, %v1709_v25 }
 0x35c   : > { %v1711_v42 = vpop.permute.xlu0 %1710 }
 0x35d   : > { %3754 = vmatprep.mubr.msk.bf16.mxu1 %vm1734_vm1, %v1711_v42 }
 0x364   : > { %v1713_v18 = vpop.permute.xlu1 %1712 }
 0x365   : > { %3755 = vmatmul.mubr.msk.bf16.gmra.mrb[52].mxu1 %vm1734_vm1, %v1713_v18 }
 0x36c   : > { %v1715_v43 = vpop.permute.xlu0 %1714 }
 0x36d   : > { %3758 = vmatprep.mubr.msk.bf16.mxu1 %vm1734_vm1, %v1715_v43 }
 0x374   : > { %v1717_v59 = vpop.permute.xlu1 %1716 }
 0x375   : > { %3759 = vmatmul.mubr.msk.bf16.gmra.mrb[56].mxu1 %vm1734_vm1, %v1717_v59 }
 0x37c   : > { %v1719_v20 = vpop.permute.xlu0 %1718 }
 0x37d   : > { %3762 = vmatprep.mubr.msk.bf16.mxu1 %vm1734_vm1, %v1719_v20 }
 0x384   : > { %v1721_v53 = vpop.permute.xlu1 %1720 }
 0x385   : > { %3763 = vmatmul.mubr.msk.bf16.gmra.mrb[60].mxu1 %vm1734_vm1, %v1721_v53 }
 0x3a5   : > { %v3704_v46 = vpop.f32.mrb[0].mxu1 }
 0x3a6   : > { %v5782_v1 = vadd.f32 %v3704_v46, %v5779_v60  ;;  %v1865_v25 = vpop.f32.mrb[1].mxu1 }
 0x3a7   : > { %v5785_v42 = vadd.f32 %v5779_v60, %v1865_v25  ;;  %v3705_v18 = vpop.f32.mrb[2].mxu1 }
 0x3a8   : > { %v2186_v43 = vmul.f32 0.5, %v5782_v1  ;;  %v5789_v59 = vadd.f32 %v3705_v18, %v5779_v60  ;;  %v1868_v20 = vpop.f32.mrb[3].mxu1 }
 0x3a9   : > { %v2184_v57 = vmul.f32 0.5, %v5785_v42  ;;  %v5793_v53 = vadd.f32 %v5779_v60, %v1868_v20 }
 0x3aa   : > { %4136 = vtanh.f32 %v2186_v43  ;;  %v2187_v46 = vmul.f32 0.5, %v5789_v59 }
 0x3ab   : > { %4138 = vtanh.f32 %v2184_v57  ;;  %v2185_v2 = vmul.f32 0.5, %v5793_v53 }
 0x3ac   : > { %4140 = vtanh.f32 %v2187_v46 }
 0x3ad   : > { %4142 = vtanh.f32 %v2185_v2 }
 0x3ae   : > { %v3708_v25 = vpop.f32.mrb[4].mxu1 }
 0x3af   : > { %v5798_v30 = vadd.f32 %v3708_v25, %v5779_v60  ;;  %v1881_v18 = vpop.f32.mrb[5].mxu1 }
 0x3b0   : > { %v5801_v37 = vadd.f32 %v5779_v60, %v1881_v18  ;;  %v3709_v5 = vpop.f32.mrb[6].mxu1 }
 0x3b1   : > { %v2190_v20 = vmul.f32 0.5, %v5798_v30  ;;  %v5805_v43 = vadd.f32 %v3709_v5, %v5779_v60  ;;  %v1884_v0 = vpop.f32.mrb[7].mxu1 }
 0x3b2   : > { %v2188_v57 = vmul.f32 0.5, %v5801_v37  ;;  %v5809_v46 = vadd.f32 %v5779_v60, %v1884_v0 }
 0x3b3   : > { %4144 = vtanh.f32 %v2190_v20  ;;  %v2191_v25 = vmul.f32 0.5, %v5805_v43 }
 0x3b4   : > { %v4137_v2 = vpop.eup %4136  ;;  %4146 = vtanh.f32 %v2188_v57  ;;  %v2189_v18 = vmul.f32 0.5, %v5809_v46 }
 0x3b5   : > { %v4139_v9 = vpop.eup %4138  ;;  %v2314_v27 = vadd.f32 1.0, %v4137_v2  ;;  %4148 = vtanh.f32 %v2191_v25 }
 0x3b6   : > { %v2312_v47 = vadd.f32 1.0, %v4139_v9  ;;  %v4141_v14 = vpop.eup %4140  ;;  %v3712_v5 = vpop.f32.mrb[8].mxu1  ;;  %4150 = vtanh.f32 %v2189_v18 }
 0x3b7   : > { %v2378_v56 = vmul.f32 0.5, %v2314_v27  ;;  %v5814_v38 = vadd.f32 %v3712_v5, %v5779_v60  ;;  %v1897_v40 = vpop.f32.mrb[9].mxu1  ;;  %v2315_v0 = vadd.f32 1.0, %v4141_v14  ;;  %v4143_v58 = vpop.eup %4142 }
 0x3b8   : > { %v5817_v20 = vadd.f32 %v5779_v60, %v1897_v40  ;;  %v3713_v61 = vpop.f32.mrb[10].mxu1  ;;  %v2376_v57 = vmul.f32 0.5, %v2312_v47  ;;  %v2313_v25 = vadd.f32 1.0, %v4143_v58 }
 0x3b9   : > { %2508 = vrot.lane.b32.xlu0 %v2378_v56, %s4684_s20  ;;  %v2194_v9 = vmul.f32 0.5, %v5814_v38  ;;  %v5822_v2 = vadd.f32 %v3713_v61, %v5779_v60  ;;  %v1900_v27 = vpop.f32.mrb[11].mxu1  ;;  %v2379_v18 = vmul.f32 0.5, %v2315_v0 }
 0x3ba   : > { %v2192_v5 = vmul.f32 0.5, %v5817_v20  ;;  %v5826_v14 = vadd.f32 %v5779_v60, %v1900_v27  ;;  %v2377_v22 = vmul.f32 0.5, %v2313_v25 }
 0x3bb   : > { %4152 = vtanh.f32 %v2194_v9  ;;  %v2195_v40 = vmul.f32 0.5, %v5822_v2  ;;  %2510 = vrot.lane.b32.xlu1 %v2379_v18, %s4684_s20 }
 0x3bc   : > { %4154 = vtanh.f32 %v2192_v5  ;;  %v2193_v56 = vmul.f32 0.5, %v5826_v14 }
 0x3bd   : > { %2504 = vrot.lane.b32.xlu0 %v2376_v57, %s4684_s20  ;;  %v4145_v61 = vpop.eup %4144  ;;  %4156 = vtanh.f32 %v2195_v40 }
 0x3be   : > { %v4147_v47 = vpop.eup %4146  ;;  %v2318_v58 = vadd.f32 1.0, %v4145_v61  ;;  %v3716_v12 = vpop.f32.mrb[12].mxu1  ;;  %4158 = vtanh.f32 %v2193_v56 }
 0x3bf   : > { %v5833_v27 = vadd.f32 %v3716_v12, %v5779_v60  ;;  %v1913_v0 = vpop.f32.mrb[13].mxu1  ;;  %v4149_v9 = vpop.eup %4148  ;;  %v2316_v15 = vadd.f32 1.0, %v4147_v47  ;;  %2506 = vrot.lane.b32.xlu1 %v2377_v22, %s4684_s20 }
 0x3c0   : > { %v2382_v8 = vmul.f32 0.5, %v2318_v58  ;;  %v5836_v5 = vadd.f32 %v5779_v60, %v1913_v0  ;;  %v3717_v57 = vpop.f32.mrb[14].mxu1  ;;  %v2319_v18 = vadd.f32 1.0, %v4149_v9  ;;  %v4151_v40 = vpop.eup %4150 }
 0x3c1   : > { %v2198_v25 = vmul.f32 0.5, %v5833_v27  ;;  %v1916_v61 = vpop.f32.mrb[15].mxu1  ;;  %v5842_v12 = vadd.f32 %v3717_v57, %v5779_v60  ;;  %v2317_v47 = vadd.f32 1.0, %v4151_v40  ;;  %v2380_v22 = vmul.f32 0.5, %v2316_v15 }
 0x3c2   : > { %v2196_v7 = vmul.f32 0.5, %v5836_v5  ;;  %v5845_v58 = vadd.f32 %v5779_v60, %v1916_v61  ;;  %2516 = vrot.lane.b32.xlu0 %v2382_v8, %s4684_s20  ;;  %v2383_v56 = vmul.f32 0.5, %v2319_v18 }
 0x3c3   : > { %4160 = vtanh.f32 %v2198_v25  ;;  %v2199_v0 = vmul.f32 0.5, %v5842_v12  ;;  %v2381_v61 = vmul.f32 0.5, %v2317_v47 }
 0x3c4   : > { %4162 = vtanh.f32 %v2196_v7  ;;  %v2197_v9 = vmul.f32 0.5, %v5845_v58  ;;  %2518 = vrot.lane.b32.xlu1 %v2383_v56, %s4684_s20 }
 0x3c5   : > { %v4153_v63 = vpop.eup %4152  ;;  %4164 = vtanh.f32 %v2199_v0 }
 0x3c6   : > { %v4155_v62 = vpop.eup %4154  ;;  %v2322_v57 = vadd.f32 1.0, %v4153_v63  ;;  %v3720_v50 = vpop.f32.mrb[16].mxu1  ;;  %2512 = vrot.lane.b32.xlu0 %v2380_v22, %s4684_s20  ;;  %4166 = vtanh.f32 %v2197_v9 }
 0x3c7   : > { %v5853_v8 = vadd.f32 %v3720_v50, %v5779_v60  ;;  %v1929_v18 = vpop.f32.mrb[17].mxu1  ;;  %v4157_v15 = vpop.eup %4156  ;;  %v2320_v25 = vadd.f32 1.0, %v4155_v62 }
 0x3c8   : > { %v2386_v7 = vmul.f32 0.5, %v2322_v57  ;;  %v5856_v40 = vadd.f32 %v5779_v60, %v1929_v18  ;;  %v3721_v49 = vpop.f32.mrb[18].mxu1  ;;  %v2323_v56 = vadd.f32 1.0, %v4157_v15  ;;  %2514 = vrot.lane.b32.xlu1 %v2381_v61, %s4684_s20  ;;  %v4159_v22 = vpop.eup %4158 }
 0x3c9   : > { %v2202_v63 = vmul.f32 0.5, %v5853_v8  ;;  %v1932_v0 = vpop.f32.mrb[19].mxu1  ;;  %v5862_v50 = vadd.f32 %v3721_v49, %v5779_v60  ;;  %v2321_v9 = vadd.f32 1.0, %v4159_v22  ;;  %v2384_v18 = vmul.f32 0.5, %v2320_v25 }
 0x3ca   : > { %v2200_v47 = vmul.f32 0.5, %v5856_v40  ;;  %v5865_v57 = vadd.f32 %v5779_v60, %v1932_v0  ;;  %2524 = vrot.lane.b32.xlu0 %v2386_v7, %s4684_s20  ;;  %v2387_v62 = vmul.f32 0.5, %v2323_v56 }
 0x3cb   : > { %4168 = vtanh.f32 %v2202_v63  ;;  %v2203_v15 = vmul.f32 0.5, %v5862_v50  ;;  %v2385_v0 = vmul.f32 0.5, %v2321_v9 }
 0x3cc   : > { %4170 = vtanh.f32 %v2200_v47  ;;  %v2201_v61 = vmul.f32 0.5, %v5865_v57  ;;  %2526 = vrot.lane.b32.xlu1 %v2387_v62, %s4684_s20 }
 0x3cd   : > { %v4161_v24 = vpop.eup %4160  ;;  %4172 = vtanh.f32 %v2203_v15 }
 0x3ce   : > { %v4163_v26 = vpop.eup %4162  ;;  %v2326_v49 = vadd.f32 1.0, %v4161_v24  ;;  %v3724_v28 = vpop.f32.mrb[20].mxu1  ;;  %2520 = vrot.lane.b32.xlu0 %v2384_v18, %s4684_s20  ;;  %4174 = vtanh.f32 %v2201_v61 }
 0x3cf   : > { %v5873_v7 = vadd.f32 %v3724_v28, %v5779_v60  ;;  %v1945_v56 = vpop.f32.mrb[21].mxu1  ;;  %v4165_v25 = vpop.eup %4164  ;;  %v2324_v22 = vadd.f32 1.0, %v4163_v26 }
 0x3d0   : > { %v2390_v63 = vmul.f32 0.5, %v2326_v49  ;;  %v5876_v47 = vadd.f32 %v5779_v60, %v1945_v56  ;;  %v3725_v3 = vpop.f32.mrb[22].mxu1  ;;  %v2327_v62 = vadd.f32 1.0, %v4165_v25  ;;  %2522 = vrot.lane.b32.xlu1 %v2385_v0, %s4684_s20  ;;  %v4167_v18 = vpop.eup %4166 }
 0x3d1   : > { %v2206_v24 = vmul.f32 0.5, %v5873_v7  ;;  %v1948_v15 = vpop.f32.mrb[23].mxu1  ;;  %v5882_v28 = vadd.f32 %v3725_v3, %v5779_v60  ;;  %v2325_v61 = vadd.f32 1.0, %v4167_v18  ;;  %v2388_v56 = vmul.f32 0.5, %v2324_v22 }
 0x3d2   : > { %v2204_v9 = vmul.f32 0.5, %v5876_v47  ;;  %v5885_v49 = vadd.f32 %v5779_v60, %v1948_v15  ;;  %2532 = vrot.lane.b32.xlu0 %v2390_v63, %s4684_s20  ;;  %v2391_v26 = vmul.f32 0.5, %v2327_v62 }
 0x3d3   : > { %4176 = vtanh.f32 %v2206_v24  ;;  %v2207_v25 = vmul.f32 0.5, %v5882_v28  ;;  %v2389_v15 = vmul.f32 0.5, %v2325_v61 }
 0x3d4   : > { %4178 = vtanh.f32 %v2204_v9  ;;  %v2205_v0 = vmul.f32 0.5, %v5885_v49  ;;  %2534 = vrot.lane.b32.xlu1 %v2391_v26, %s4684_s20 }
 0x3d5   : > { %v4169_v48 = vpop.eup %4168  ;;  %4180 = vtanh.f32 %v2207_v25 }
 0x3d6   : > { %v4171_v31 = vpop.eup %4170  ;;  %v2330_v3 = vadd.f32 1.0, %v4169_v48  ;;  %v3728_v13 = vpop.f32.mrb[24].mxu1  ;;  %2528 = vrot.lane.b32.xlu0 %v2388_v56, %s4684_s20  ;;  %4182 = vtanh.f32 %v2205_v0 }
 0x3d7   : > { %v5893_v63 = vadd.f32 %v3728_v13, %v5779_v60  ;;  %v1961_v62 = vpop.f32.mrb[25].mxu1  ;;  %v4173_v22 = vpop.eup %4172  ;;  %v2328_v18 = vadd.f32 1.0, %v4171_v31 }
 0x3d8   : > { %v2394_v24 = vmul.f32 0.5, %v2330_v3  ;;  %v5896_v9 = vadd.f32 %v5779_v60, %v1961_v62  ;;  %v3729_v17 = vpop.f32.mrb[26].mxu1  ;;  %v2331_v26 = vadd.f32 1.0, %v4173_v22  ;;  %2530 = vrot.lane.b32.xlu1 %v2389_v15, %s4684_s20  ;;  %v4175_v56 = vpop.eup %4174 }
 0x3d9   : > { %v2210_v48 = vmul.f32 0.5, %v5893_v63  ;;  %v1964_v25 = vpop.f32.mrb[27].mxu1  ;;  %v5902_v13 = vadd.f32 %v3729_v17, %v5779_v60  ;;  %v2329_v0 = vadd.f32 1.0, %v4175_v56  ;;  %v2392_v62 = vmul.f32 0.5, %v2328_v18 }
 0x3da   : > { %7079 = vst [vmem:[#allocation69_spill] sm:$0xff] %v5896_v9  ;;  %v2208_v61 = vmul.f32 0.5, %v5896_v9  ;;  %v5905_v3 = vadd.f32 %v5779_v60, %v1964_v25  ;;  %2540 = vrot.lane.b32.xlu0 %v2394_v24, %s4684_s20  ;;  %v2395_v31 = vmul.f32 0.5, %v2331_v26 }
 0x3db   : > { %7080 = vst [vmem:[#allocation70_spill] sm:$0xff] %v5902_v13  ;;  %4184 = vtanh.f32 %v2210_v48  ;;  %v2211_v22 = vmul.f32 0.5, %v5902_v13  ;;  %v2393_v45 = vmul.f32 0.5, %v2329_v0 }
 0x3dc   : > { %7081 = vst [vmem:[#allocation71_spill] sm:$0xff] %v5905_v3  ;;  %4186 = vtanh.f32 %v2208_v61  ;;  %v2209_v15 = vmul.f32 0.5, %v5905_v3  ;;  %2542 = vrot.lane.b32.xlu1 %v2395_v31, %s4684_s20 }
 0x3dd   : > { %v4177_v19 = vpop.eup %4176  ;;  %4188 = vtanh.f32 %v2211_v22 }
 0x3de   : > { %v4179_v9 = vpop.eup %4178  ;;  %v2334_v17 = vadd.f32 1.0, %v4177_v19  ;;  %2536 = vrot.lane.b32.xlu0 %v2392_v62, %s4684_s20  ;;  %v3732_v25 = vpop.f32.mrb[28].mxu1  ;;  %4190 = vtanh.f32 %v2209_v15 }
 0x3df   : > { %v5913_v24 = vadd.f32 %v3732_v25, %v5779_v60  ;;  %v1977_v26 = vpop.f32.mrb[29].mxu1  ;;  %v4181_v18 = vpop.eup %4180  ;;  %v2332_v56 = vadd.f32 1.0, %v4179_v9 }
 0x3e0   : > { %v2398_v48 = vmul.f32 0.5, %v2334_v17  ;;  %v5916_v61 = vadd.f32 %v5779_v60, %v1977_v26  ;;  %v3733_v3 = vpop.f32.mrb[30].mxu1  ;;  %v2335_v31 = vadd.f32 1.0, %v4181_v18  ;;  %2538 = vrot.lane.b32.xlu1 %v2393_v45, %s4684_s20  ;;  %v4183_v22 = vpop.eup %4182 }
 0x3e1   : > { %7082 = vst [vmem:[#allocation72_spill] sm:$0xff] %v5913_v24  ;;  %v2214_v19 = vmul.f32 0.5, %v5913_v24  ;;  %v1980_v62 = vpop.f32.mrb[31].mxu1  ;;  %v5922_v25 = vadd.f32 %v3733_v3, %v5779_v60  ;;  %v2333_v15 = vadd.f32 1.0, %v4183_v22  ;;  %v2396_v26 = vmul.f32 0.5, %v2332_v56 }
 0x3e2   : > { %7083 = vst [vmem:[#allocation73_spill] sm:$0xff] %v5916_v61  ;;  %v2212_v0 = vmul.f32 0.5, %v5916_v61  ;;  %v5925_v17 = vadd.f32 %v5779_v60, %v1980_v62  ;;  %2548 = vrot.lane.b32.xlu0 %v2398_v48, %s4684_s20  ;;  %v2399_v9 = vmul.f32 0.5, %v2335_v31 }
 0x3e3   : > { %7084 = vst [vmem:[#allocation74_spill] sm:$0xff] %v5922_v25  ;;  %4192 = vtanh.f32 %v2214_v19  ;;  %v2215_v18 = vmul.f32 0.5, %v5922_v25  ;;  %v2397_v13 = vmul.f32 0.5, %v2333_v15 }
 0x3e4   : > { %7085 = vst [vmem:[#allocation75_spill] sm:$0xff] %v5925_v17  ;;  %4194 = vtanh.f32 %v2212_v0  ;;  %v2213_v45 = vmul.f32 0.5, %v5925_v17  ;;  %2550 = vrot.lane.b32.xlu1 %v2399_v9, %s4684_s20 }
 0x3e5   : > { %v4185_v24 = vpop.eup %4184  ;;  %4196 = vtanh.f32 %v2215_v18 }
 0x3e6   : > { %v4187_v61 = vpop.eup %4186  ;;  %v2338_v3 = vadd.f32 1.0, %v4185_v24  ;;  %2544 = vrot.lane.b32.xlu0 %v2396_v26, %s4684_s20  ;;  %v3736_v62 = vpop.f32.mrb[32].mxu1  ;;  %4198 = vtanh.f32 %v2213_v45 }
 0x3e7   : > { %v5933_v48 = vadd.f32 %v3736_v62, %v5779_v60  ;;  %v1993_v31 = vpop.f32.mrb[33].mxu1  ;;  %v4189_v56 = vpop.eup %4188  ;;  %v2336_v22 = vadd.f32 1.0, %v4187_v61 }
 0x3e8   : > { %v2402_v19 = vmul.f32 0.5, %v2338_v3  ;;  %v5936_v0 = vadd.f32 %v5779_v60, %v1993_v31  ;;  %v3737_v17 = vpop.f32.mrb[34].mxu1  ;;  %v2339_v9 = vadd.f32 1.0, %v4189_v56  ;;  %2546 = vrot.lane.b32.xlu1 %v2397_v13, %s4684_s20  ;;  %v4191_v18 = vpop.eup %4190 }
 0x3e9   : > { %7086 = vst [vmem:[#allocation76_spill] sm:$0xff] %v5933_v48  ;;  %v2218_v24 = vmul.f32 0.5, %v5933_v48  ;;  %v1996_v26 = vpop.f32.mrb[35].mxu1  ;;  %v5942_v62 = vadd.f32 %v3737_v17, %v5779_v60  ;;  %v2337_v45 = vadd.f32 1.0, %v4191_v18  ;;  %v2400_v31 = vmul.f32 0.5, %v2336_v22 }
 0x3ea   : > { %7087 = vst [vmem:[#allocation77_spill] sm:$0xff] %v5936_v0  ;;  %v2216_v15 = vmul.f32 0.5, %v5936_v0  ;;  %v5945_v3 = vadd.f32 %v5779_v60, %v1996_v26  ;;  %2556 = vrot.lane.b32.xlu0 %v2402_v19, %s4684_s20  ;;  %v2403_v61 = vmul.f32 0.5, %v2339_v9 }
 0x3eb   : > { %7088 = vst [vmem:[#allocation78_spill] sm:$0xff] %v5942_v62  ;;  %4200 = vtanh.f32 %v2218_v24  ;;  %v2219_v56 = vmul.f32 0.5, %v5942_v62  ;;  %v2401_v25 = vmul.f32 0.5, %v2337_v45 }
 0x3ec   : > { %7089 = vst [vmem:[#allocation79_spill] sm:$0xff] %v5945_v3  ;;  %4202 = vtanh.f32 %v2216_v15  ;;  %v2217_v13 = vmul.f32 0.5, %v5945_v3  ;;  %2558 = vrot.lane.b32.xlu1 %v2403_v61, %s4684_s20 }
 0x3ed   : > { %v4193_v48 = vpop.eup %4192  ;;  %4204 = vtanh.f32 %v2219_v56 }
 0x3ee   : > { %v4195_v0 = vpop.eup %4194  ;;  %v2342_v17 = vadd.f32 1.0, %v4193_v48  ;;  %2552 = vrot.lane.b32.xlu0 %v2400_v31, %s4684_s20  ;;  %v3740_v26 = vpop.f32.mrb[36].mxu1  ;;  %4206 = vtanh.f32 %v2217_v13 }
 0x3ef   : > { %v5953_v19 = vadd.f32 %v3740_v26, %v5779_v60  ;;  %v2009_v9 = vpop.f32.mrb[37].mxu1  ;;  %v4197_v22 = vpop.eup %4196  ;;  %v2340_v18 = vadd.f32 1.0, %v4195_v0 }
 0x3f0   : > { %v2406_v24 = vmul.f32 0.5, %v2342_v17  ;;  %v5956_v15 = vadd.f32 %v5779_v60, %v2009_v9  ;;  %v3741_v3 = vpop.f32.mrb[38].mxu1  ;;  %v2343_v61 = vadd.f32 1.0, %v4197_v22  ;;  %2554 = vrot.lane.b32.xlu1 %v2401_v25, %s4684_s20  ;;  %v4199_v56 = vpop.eup %4198 }
 0x3f1   : > { %7090 = vst [vmem:[#allocation80_spill] sm:$0xff] %v5953_v19  ;;  %v2222_v48 = vmul.f32 0.5, %v5953_v19  ;;  %v2012_v31 = vpop.f32.mrb[39].mxu1  ;;  %v5962_v26 = vadd.f32 %v3741_v3, %v5779_v60  ;;  %v2341_v13 = vadd.f32 1.0, %v4199_v56  ;;  %v2404_v9 = vmul.f32 0.5, %v2340_v18 }
 0x3f2   : > { %7091 = vst [vmem:[#allocation81_spill] sm:$0xff] %v5956_v15  ;;  %v2220_v45 = vmul.f32 0.5, %v5956_v15  ;;  %v5965_v17 = vadd.f32 %v5779_v60, %v2012_v31  ;;  %2564 = vrot.lane.b32.xlu0 %v2406_v24, %s4684_s20  ;;  %v2407_v0 = vmul.f32 0.5, %v2343_v61 }
 0x3f3   : > { %7092 = vst [vmem:[#allocation82_spill] sm:$0xff] %v5962_v26  ;;  %4208 = vtanh.f32 %v2222_v48  ;;  %v2223_v22 = vmul.f32 0.5, %v5962_v26  ;;  %v2405_v62 = vmul.f32 0.5, %v2341_v13 }
 0x3f4   : > { %7093 = vst [vmem:[#allocation83_spill] sm:$0xff] %v5965_v17  ;;  %4210 = vtanh.f32 %v2220_v45  ;;  %v2221_v25 = vmul.f32 0.5, %v5965_v17  ;;  %2566 = vrot.lane.b32.xlu1 %v2407_v0, %s4684_s20 }
 0x3f5   : > { %v4201_v19 = vpop.eup %4200  ;;  %4212 = vtanh.f32 %v2223_v22 }
 0x3f6   : > { %v4203_v15 = vpop.eup %4202  ;;  %v2346_v3 = vadd.f32 1.0, %v4201_v19  ;;  %2560 = vrot.lane.b32.xlu0 %v2404_v9, %s4684_s20  ;;  %v3744_v31 = vpop.f32.mrb[40].mxu1  ;;  %4214 = vtanh.f32 %v2221_v25 }
 0x3f7   : > { %v5973_v24 = vadd.f32 %v3744_v31, %v5779_v60  ;;  %v2025_v61 = vpop.f32.mrb[41].mxu1  ;;  %v4205_v18 = vpop.eup %4204  ;;  %v2344_v56 = vadd.f32 1.0, %v4203_v15 }
 0x3f8   : > { %v2410_v48 = vmul.f32 0.5, %v2346_v3  ;;  %v5976_v45 = vadd.f32 %v5779_v60, %v2025_v61  ;;  %v3745_v17 = vpop.f32.mrb[42].mxu1  ;;  %v2347_v0 = vadd.f32 1.0, %v4205_v18  ;;  %2562 = vrot.lane.b32.xlu1 %v2405_v62, %s4684_s20  ;;  %v4207_v22 = vpop.eup %4206 }
 0x3f9   : > { %7094 = vst [vmem:[#allocation84_spill] sm:$0xff] %v5973_v24  ;;  %v2226_v19 = vmul.f32 0.5, %v5973_v24  ;;  %v2028_v9 = vpop.f32.mrb[43].mxu1  ;;  %v5982_v31 = vadd.f32 %v3745_v17, %v5779_v60  ;;  %v2345_v25 = vadd.f32 1.0, %v4207_v22  ;;  %v2408_v61 = vmul.f32 0.5, %v2344_v56 }
 0x3fa   : > { %7095 = vst [vmem:[#allocation85_spill] sm:$0xff] %v5976_v45  ;;  %v2224_v13 = vmul.f32 0.5, %v5976_v45  ;;  %v5985_v3 = vadd.f32 %v5779_v60, %v2028_v9  ;;  %2572 = vrot.lane.b32.xlu0 %v2410_v48, %s4684_s20  ;;  %v2411_v15 = vmul.f32 0.5, %v2347_v0 }
 0x3fb   : > { %7096 = vst [vmem:[#allocation86_spill] sm:$0xff] %v5982_v31  ;;  %4216 = vtanh.f32 %v2226_v19  ;;  %v2227_v18 = vmul.f32 0.5, %v5982_v31  ;;  %v2409_v26 = vmul.f32 0.5, %v2345_v25 }
 0x3fc   : > { %7097 = vst [vmem:[#allocation87_spill] sm:$0xff] %v5985_v3  ;;  %4218 = vtanh.f32 %v2224_v13  ;;  %v2225_v62 = vmul.f32 0.5, %v5985_v3  ;;  %2574 = vrot.lane.b32.xlu1 %v2411_v15, %s4684_s20 }
 0x3fd   : > { %v4209_v24 = vpop.eup %4208  ;;  %4220 = vtanh.f32 %v2227_v18 }
 0x3fe   : > { %v4211_v45 = vpop.eup %4210  ;;  %v2350_v17 = vadd.f32 1.0, %v4209_v24  ;;  %2568 = vrot.lane.b32.xlu0 %v2408_v61, %s4684_s20  ;;  %v3748_v9 = vpop.f32.mrb[44].mxu1  ;;  %4222 = vtanh.f32 %v2225_v62 }
 0x3ff   : > { %v5993_v48 = vadd.f32 %v3748_v9, %v5779_v60  ;;  %v2041_v0 = vpop.f32.mrb[45].mxu1  ;;  %v4213_v56 = vpop.eup %4212  ;;  %v2348_v22 = vadd.f32 1.0, %v4211_v45 }
 0x400   : > { %v2414_v19 = vmul.f32 0.5, %v2350_v17  ;;  %v5996_v13 = vadd.f32 %v5779_v60, %v2041_v0  ;;  %v3749_v3 = vpop.f32.mrb[46].mxu1  ;;  %v2351_v15 = vadd.f32 1.0, %v4213_v56  ;;  %2570 = vrot.lane.b32.xlu1 %v2409_v26, %s4684_s20  ;;  %v4215_v18 = vpop.eup %4214 }
 0x401   : > { %7098 = vst [vmem:[#allocation88_spill] sm:$0xff] %v5993_v48  ;;  %v2230_v24 = vmul.f32 0.5, %v5993_v48  ;;  %v2044_v61 = vpop.f32.mrb[47].mxu1  ;;  %v6002_v9 = vadd.f32 %v3749_v3, %v5779_v60  ;;  %v2349_v62 = vadd.f32 1.0, %v4215_v18  ;;  %v2412_v0 = vmul.f32 0.5, %v2348_v22 }
 0x402   : > { %7099 = vst [vmem:[#allocation89_spill] sm:$0xff] %v5996_v13  ;;  %v2228_v25 = vmul.f32 0.5, %v5996_v13  ;;  %v6005_v17 = vadd.f32 %v5779_v60, %v2044_v61  ;;  %2580 = vrot.lane.b32.xlu0 %v2414_v19, %s4684_s20  ;;  %v2415_v45 = vmul.f32 0.5, %v2351_v15 }
 0x403   : > { %4224 = vtanh.f32 %v2230_v24  ;;  %v2231_v56 = vmul.f32 0.5, %v6002_v9  ;;  %v2413_v61 = vmul.f32 0.5, %v2349_v62 }
 0x404   : > { %7100 = vst [vmem:[#allocation90_spill] sm:$0xff] %v6005_v17  ;;  %4226 = vtanh.f32 %v2228_v25  ;;  %v2229_v26 = vmul.f32 0.5, %v6005_v17  ;;  %2582 = vrot.lane.b32.xlu1 %v2415_v45, %s4684_s20 }
 0x405   : > { %v4217_v48 = vpop.eup %4216  ;;  %4228 = vtanh.f32 %v2231_v56 }
 0x406   : > { %v4219_v13 = vpop.eup %4218  ;;  %v2354_v3 = vadd.f32 1.0, %v4217_v48  ;;  %2576 = vrot.lane.b32.xlu0 %v2412_v0, %s4684_s20  ;;  %4230 = vtanh.f32 %v2229_v26 }
 0x407   : > { %v4221_v31 = vpop.eup %4220  ;;  %v2352_v15 = vadd.f32 1.0, %v4219_v13  ;;  %4232 = vtanh.f32 %v5782_v1 }
 0x408   : > { %v2418_v19 = vmul.f32 0.5, %v2354_v3  ;;  %v2355_v24 = vadd.f32 1.0, %v4221_v31  ;;  %2578 = vrot.lane.b32.xlu1 %v2413_v61, %s4684_s20  ;;  %v4223_v22 = vpop.eup %4222  ;;  %4234 = vtanh.f32 %v5785_v42 }
 0x409   : > { %v2353_v25 = vadd.f32 1.0, %v4223_v22  ;;  %v2416_v17 = vmul.f32 0.5, %v2352_v15  ;;  %4236 = vtanh.f32 %v5789_v59 }
 0x40a   : > { %2588 = vrot.lane.b32.xlu0 %v2418_v19, %s4684_s20  ;;  %v2419_v18 = vmul.f32 0.5, %v2355_v24  ;;  %4238 = vtanh.f32 %v5793_v53 }
 0x40b   : > { %v2417_v62 = vmul.f32 0.5, %v2353_v25  ;;  %4240 = vtanh.f32 %v5798_v30 }
 0x40c   : > { %2590 = vrot.lane.b32.xlu1 %v2419_v18, %s4684_s20  ;;  %4242 = vtanh.f32 %v5801_v37 }
 0x40d   : > { %v4225_v45 = vpop.eup %4224  ;;  %4244 = vtanh.f32 %v5805_v43 }
 0x40e   : > { %v4227_v48 = vpop.eup %4226  ;;  %v2358_v56 = vadd.f32 1.0, %v4225_v45  ;;  %2584 = vrot.lane.b32.xlu0 %v2416_v17, %s4684_s20  ;;  %v6028_v45 = vld [vmem:[#allocation12] ss:$0 sm:$0xff] }
 0x40f   : > { %v4229_v0 = vpop.eup %4228  ;;  %v2356_v26 = vadd.f32 1.0, %v4227_v48 }
 0x410   : > { %v2422_v13 = vmul.f32 0.5, %v2358_v56  ;;  %v2359_v31 = vadd.f32 1.0, %v4229_v0  ;;  %2586 = vrot.lane.b32.xlu1 %v2417_v62, %s4684_s20  ;;  %v4231_v3 = vpop.eup %4230  ;;  %v6034_v56 = vld [vmem:[#allocation14] ss:$0 sm:$0xff] }
 0x411   : > { %v2357_v19 = vadd.f32 1.0, %v4231_v3  ;;  %v2420_v15 = vmul.f32 0.5, %v2356_v26  ;;  %v4233_v25 = vpop.eup %4232 }
 0x412   : > { %2596 = vrot.lane.b32.xlu0 %v2422_v13, %s4684_s20  ;;  %v2423_v61 = vmul.f32 0.5, %v2359_v31  ;;  %v4235_v26 = vpop.eup %4234  ;;  %v2769_v31 = vmul.f32 %v6028_v45, %v5394_v52  ;;  %v2770_v52 = vmul.f32 %v6028_v45, %v5396_v23  ;;  %v2768_v23 = vmul.f32 %v6028_v45, %v5404_v55 }
 0x413   : > { %v2421_v24 = vmul.f32 0.5, %v2357_v19 }
 0x414   : > { %2598 = vrot.lane.b32.xlu1 %v2423_v61, %s4684_s20  ;;  %v4237_v61 = vpop.eup %4236 }
 0x416   : > { %2592 = vrot.lane.b32.xlu0 %v2420_v15, %s4684_s20 }
 0x418   : > { %2594 = vrot.lane.b32.xlu1 %v2421_v24, %s4684_s20 }
 0x428   : > { %v3752_v17 = vpop.f32.mrb[48].mxu1 }
 0x429   : > { %v6026_v22 = vadd.f32 %v3752_v17, %v5779_v60  ;;  %v2057_v18 = vpop.f32.mrb[49].mxu1 }
 0x42a   : > { %v6032_v48 = vadd.f32 %v5779_v60, %v2057_v18  ;;  %v3753_v1 = vpop.f32.mrb[50].mxu1 }
 0x42b   : > { %v2509_v42 = vpop.permute.xlu0 %2508  ;;  %v2234_v59 = vmul.f32 0.5, %v6026_v22  ;;  %v6039_v53 = vadd.f32 %v3753_v1, %v5779_v60  ;;  %v2060_v62 = vpop.f32.mrb[51].mxu1 }
 0x42c   : > { %v2698_v0 = vmul.f32 %v4233_v25, %v2509_v42  ;;  %v2232_v30 = vmul.f32 0.5, %v6032_v48  ;;  %v6044_v13 = vadd.f32 %v5779_v60, %v2060_v62  ;;  %v2767_v25 = vmul.f32 %v6028_v45, %v5402_v54 }
 0x42d   : > { %4246 = vtanh.f32 %v2234_v59  ;;  %v2235_v37 = vmul.f32 0.5, %v6039_v53  ;;  %v2511_v15 = vpop.permute.xlu1 %2510  ;;  %v4239_v59 = vpop.eup %4238 }
 0x42e   : > { %v2840_v3 = vmul.f32 %v6034_v56, %v2698_v0  ;;  %4248 = vtanh.f32 %v2232_v30  ;;  %v2233_v19 = vmul.f32 0.5, %v6044_v13  ;;  %v2699_v24 = vmul.f32 %v4237_v61, %v2511_v15  ;;  %v4241_v54 = vpop.eup %4240 }
 0x42f   : > { %v2505_v43 = vpop.permute.xlu0 %2504  ;;  %4250 = vtanh.f32 %v2235_v37  ;;  %v4243_v37 = vpop.eup %4242  ;;  %v2774_v15 = vmul.f32 %v6028_v45, %v5423_v51 }
 0x430   : > { %v2696_v17 = vmul.f32 %v4235_v26, %v2505_v43  ;;  %v6051_v18 = vadd.f32 %v2840_v3, %v2769_v31  ;;  %4252 = vtanh.f32 %v5809_v46  ;;  %v2841_v1 = vmul.f32 %v6034_v56, %v2699_v24  ;;  %v4245_v61 = vpop.eup %4244 }
 0x431   : > { %4254 = vtanh.f32 %v2233_v19  ;;  %v2507_v62 = vpop.permute.xlu1 %2506  ;;  %v2771_v43 = vmul.f32 %v6028_v45, %v5433_v44 }
 0x432   : > { %v2838_v42 = vmul.f32 %v6034_v56, %v2696_v17  ;;  %4256 = vtanh.f32 %v5814_v38  ;;  %v2697_v0 = vmul.f32 %v4239_v59, %v2507_v62  ;;  %v6063_v26 = vadd.f32 %v2841_v1, %v2770_v52 }
 0x433   : > { %4258 = vtanh.f32 %v5822_v2  ;;  %v2773_v38 = vmul.f32 %v6028_v45, %v5418_v36 }
 0x434   : > { %v6061_v30 = vadd.f32 %v2838_v42, %v2767_v25  ;;  %v2517_v31 = vpop.permute.xlu0 %2516  ;;  %v2839_v46 = vmul.f32 %v6034_v56, %v2697_v0  ;;  %4260 = vtanh.f32 %v5817_v20  ;;  %v2772_v25 = vmul.f32 %v6028_v45, %v5437_v34 }
 0x435   : > { %v2702_v3 = vmul.f32 %v4241_v54, %v2517_v31  ;;  %4262 = vtanh.f32 %v5826_v14 }
 0x436   : > { %v2519_v24 = vpop.permute.xlu1 %2518  ;;  %v6077_v2 = vadd.f32 %v2839_v46, %v2768_v23  ;;  %4264 = vtanh.f32 %v5833_v27 }
 0x437   : > { %v4247_v19 = vpop.eup %4246  ;;  %v2844_v55 = vmul.f32 %v6034_v56, %v2702_v3  ;;  %v2703_v20 = vmul.f32 %v4245_v61, %v2519_v24  ;;  %4266 = vtanh.f32 %v5836_v5 }
 0x438   : > { %v4249_v17 = vpop.eup %4248  ;;  %v2362_v36 = vadd.f32 1.0, %v4247_v19  ;;  %v3756_v52 = vpop.f32.mrb[52].mxu1  ;;  %4268 = vtanh.f32 %v5842_v12 }
 0x439   : > { %v2513_v1 = vpop.permute.xlu0 %2512  ;;  %v2360_v51 = vadd.f32 1.0, %v4249_v17  ;;  %v6084_v44 = vadd.f32 %v3756_v52, %v5779_v60  ;;  %v2073_v59 = vpop.f32.mrb[53].mxu1  ;;  %v6090_v54 = vadd.f32 %v2844_v55, %v2773_v38  ;;  %v2845_v23 = vmul.f32 %v6034_v56, %v2703_v20 }
 0x43a   : > { %v2700_v42 = vmul.f32 %v4243_v37, %v2513_v1  ;;  %v4251_v62 = vpop.eup %4250  ;;  %v2426_v0 = vmul.f32 0.5, %v2362_v36  ;;  %v6088_v34 = vadd.f32 %v5779_v60, %v2073_v59  ;;  %v3757_v14 = vpop.f32.mrb[54].mxu1  ;;  %v2777_v59 = vmul.f32 %v6028_v45, %v5448_v10 }
 0x43b   : > { %v4253_v31 = vpop.eup %4252  ;;  %v2363_v27 = vadd.f32 1.0, %v4251_v62  ;;  %v2238_v46 = vmul.f32 0.5, %v6084_v44  ;;  %v2515_v37 = vpop.permute.xlu1 %2514  ;;  %v2424_v19 = vmul.f32 0.5, %v2360_v51  ;;  %v6099_v20 = vadd.f32 %v3757_v14, %v5779_v60 }
 0x43c   : > { %v2076_v3 = vpop.f32.mrb[55].mxu1  ;;  %v4255_v61 = vpop.eup %4254  ;;  %v2842_v5 = vmul.f32 %v6034_v56, %v2700_v42  ;;  %v2236_v24 = vmul.f32 0.5, %v6088_v34  ;;  %v2701_v17 = vmul.f32 %v4253_v31, %v2515_v37  ;;  %2604 = vrot.lane.b32.xlu0 %v2426_v0, %s4684_s20  ;;  %v2778_v62 = vmul.f32 %v6028_v45, %v5452_v33 }
 0x43d   : > { %v2525_v38 = vpop.permute.xlu0 %2524  ;;  %v4257_v55 = vpop.eup %4256  ;;  %v2427_v36 = vmul.f32 0.5, %v2363_v27  ;;  %v2361_v12 = vadd.f32 1.0, %v4255_v61  ;;  %4270 = vtanh.f32 %v2238_v46  ;;  %v6103_v1 = vadd.f32 %v5779_v60, %v2076_v3 }
 0x43e   : > { %4272 = vtanh.f32 %v2236_v24  ;;  %v2843_v52 = vmul.f32 %v6034_v56, %v2701_v17  ;;  %v2706_v51 = vmul.f32 %v4257_v55, %v2525_v38  ;;  %v4259_v42 = vpop.eup %4258  ;;  %v2239_v0 = vmul.f32 0.5, %v6099_v20 }
 0x43f   : > { %4274 = vtanh.f32 %v5845_v58  ;;  %v2527_v14 = vpop.permute.xlu1 %2526  ;;  %2606 = vrot.lane.b32.xlu1 %v2427_v36, %s4684_s20  ;;  %v4261_v31 = vpop.eup %4260  ;;  %v2425_v27 = vmul.f32 0.5, %v2361_v12  ;;  %v2237_v60 = vmul.f32 0.5, %v6103_v1  ;;  %v6115_v33 = vadd.f32 %v2845_v23, %v2774_v15 }
 0x440   : > { %v2848_v46 = vmul.f32 %v6034_v56, %v2706_v51  ;;  %v2707_v37 = vmul.f32 %v4259_v42, %v2527_v14  ;;  %2600 = vrot.lane.b32.xlu0 %v2424_v19, %s4684_s20  ;;  %4276 = vtanh.f32 %v2239_v0  ;;  %v6117_v58 = vadd.f32 %v2842_v5, %v2771_v43  ;;  %v4263_v61 = vpop.eup %4262 }
 0x441   : > { %v2521_v10 = vpop.permute.xlu0 %2520  ;;  %4278 = vtanh.f32 %v2237_v60  ;;  %v6120_v17 = vadd.f32 %v2843_v52, %v2772_v25  ;;  %v4265_v55 = vpop.eup %4264  ;;  %v2775_v36 = vmul.f32 %v6028_v45, %v5463_v41  ;;  %v2776_v41 = vmul.f32 %v6028_v45, %v5466_v4 }
 0x442   : > { %v2704_v3 = vmul.f32 %v4261_v31, %v2521_v10  ;;  %v2849_v24 = vmul.f32 %v6034_v56, %v2707_v37  ;;  %v6122_v38 = vadd.f32 %v2848_v46, %v2777_v59  ;;  %4280 = vtanh.f32 %v5853_v8  ;;  %v4267_v43 = vpop.eup %4266  ;;  %v6153_v37 = vld [vmem:[#allocation11] ss:$0 sm:$0xff] }
 0x443   : > { %v2523_v15 = vpop.permute.xlu1 %2522  ;;  %2602 = vrot.lane.b32.xlu1 %v2425_v27, %s4684_s20  ;;  %v4269_v25 = vpop.eup %4268  ;;  %4282 = vtanh.f32 %v5862_v50  ;;  %v2781_v8 = vmul.f32 %v6028_v45, %v5480_v16  ;;  %v6146_v50 = vmul.f32 %v6028_v45, %v5495_v11 }
 0x444   : > { %v2846_v19 = vmul.f32 %v6034_v56, %v2704_v3  ;;  %v2705_v23 = vmul.f32 %v4263_v61, %v2523_v15  ;;  %v6129_v12 = vadd.f32 %v2849_v24, %v2778_v62  ;;  %4284 = vtanh.f32 %v5856_v40 }
 0x445   : > { %v2533_v5 = vpop.permute.xlu0 %2532  ;;  %v6142_v62 = vmul.f32 %v6028_v45, %v5484_v29  ;;  %4286 = vtanh.f32 %v5865_v57 }
 0x446   : > { %v2710_v52 = vmul.f32 %v4265_v55, %v2533_v5  ;;  %v6132_v51 = vadd.f32 %v2846_v19, %v2775_v36  ;;  %v2847_v42 = vmul.f32 %v6034_v56, %v2705_v23  ;;  %4288 = vtanh.f32 %v5873_v7 }
 0x447   : > { %v4271_v59 = vpop.eup %4270  ;;  %v2535_v0 = vpop.permute.xlu1 %2534  ;;  %v2780_v7 = vmul.f32 %v6028_v45, %v5498_v21  ;;  %4290 = vtanh.f32 %v5876_v47 }
 0x448   : > { %v2852_v4 = vmul.f32 %v6034_v56, %v2710_v52  ;;  %v4273_v14 = vpop.eup %4272  ;;  %v2366_v16 = vadd.f32 1.0, %v4271_v59  ;;  %v2711_v40 = vmul.f32 %v4269_v25, %v2535_v0  ;;  %v3760_v31 = vpop.f32.mrb[56].mxu1  ;;  %v6151_v60 = vadd.f32 %v2847_v42, %v2776_v41 }
 0x449   : > { %v2529_v27 = vpop.permute.xlu0 %2528  ;;  %v4275_v29 = vpop.eup %4274  ;;  %v2364_v46 = vadd.f32 1.0, %v4273_v14  ;;  %v6156_v11 = vadd.f32 %v6153_v37, %v3760_v31  ;;  %4292 = vtanh.f32 %v5882_v28  ;;  %v2785_v31 = vmul.f32 %v6028_v45, %v5510_v6 }
 0x44a   : > { %v2708_v57 = vmul.f32 %v4267_v43, %v2529_v27  ;;  %v2089_v10 = vpop.f32.mrb[57].mxu1  ;;  %v6158_v3 = vadd.f32 %v2852_v4, %v2781_v8  ;;  %v2430_v61 = vmul.f32 0.5, %v2366_v16  ;;  %v4277_v36 = vpop.eup %4276  ;;  %v2853_v15 = vmul.f32 %v6034_v56, %v2711_v40 }
 0x44b   : > { %v6164_v24 = vadd.f32 %v6153_v37, %v2089_v10  ;;  %v3761_v55 = vpop.f32.mrb[58].mxu1  ;;  %v2428_v19 = vmul.f32 0.5, %v2364_v46  ;;  %v2242_v43 = vmul.f32 0.5, %v6156_v11  ;;  %v2531_v23 = vpop.permute.xlu1 %2530  ;;  %v2367_v52 = vadd.f32 1.0, %v4277_v36 }
 0x44c   : > { %v2092_v5 = vpop.f32.mrb[59].mxu1  ;;  %v4279_v25 = vpop.eup %4278  ;;  %v2850_v21 = vmul.f32 %v6034_v56, %v2708_v57  ;;  %v2709_v41 = vmul.f32 %v4275_v29, %v2531_v23  ;;  %2612 = vrot.lane.b32.xlu0 %v2430_v61, %s4684_s20  ;;  %v6173_v28 = vadd.f32 %v6153_v37, %v3761_v55  ;;  %v2786_v27 = vmul.f32 %v6028_v45, %v5514_v32 }
 0x44d   : > { %v2240_v47 = vmul.f32 0.5, %v6164_v24  ;;  %v2541_v8 = vpop.permute.xlu0 %2540  ;;  %v4281_v42 = vpop.eup %4280  ;;  %v2365_v59 = vadd.f32 1.0, %v4279_v25  ;;  %4294 = vtanh.f32 %v2242_v43  ;;  %v6176_v4 = vadd.f32 %v6153_v37, %v2092_v5 }
 0x44e   : > { %7101 = vst [vmem:[#allocation91_spill] sm:$0xff] %v6173_v28  ;;  %v2431_v0 = vmul.f32 0.5, %v2367_v52  ;;  %v2851_v14 = vmul.f32 %v6034_v56, %v2709_v41  ;;  %v2714_v16 = vmul.f32 %v4281_v42, %v2541_v8  ;;  %v4283_v40 = vpop.eup %4282  ;;  %v2243_v29 = vmul.f32 0.5, %v6173_v28 }
 0x44f   : > { %7102 = vst [vmem:[#allocation92_spill] sm:$0xff] %v6176_v4  ;;  %4296 = vtanh.f32 %v2240_v47  ;;  %v2241_v46 = vmul.f32 0.5, %v6176_v4  ;;  %v2543_v57 = vpop.permute.xlu1 %2542  ;;  %v4285_v10 = vpop.eup %4284  ;;  %v2429_v61 = vmul.f32 0.5, %v2365_v59  ;;  %v6190_v23 = vadd.f32 %v2853_v15, %v6142_v62  ;;  %v7103_v59 = vld [vmem:[#allocation70_spill] sm:$0xff]  ;;  %v7120_v4 = vld [vmem:[#allocation76_spill] sm:$0xff] }
 0x450   : > { %4298 = vtanh.f32 %v5885_v49  ;;  %v2856_v55 = vmul.f32 %v6034_v56, %v2714_v16  ;;  %v2715_v36 = vmul.f32 %v4283_v40, %v2543_v57  ;;  %2614 = vrot.lane.b32.xlu1 %v2431_v0, %s4684_s20  ;;  %2608 = vrot.lane.b32.xlu0 %v2428_v19, %s4684_s20  ;;  %v4287_v43 = vpop.eup %4286  ;;  %v6193_v5 = vadd.f32 %v2850_v21, %v6146_v50  ;;  %v7105_v16 = vld [vmem:[#allocation38_spill] sm:$0xff]  ;;  %v7108_v57 = vld [vmem:[#allocation40_spill] sm:$0xff] }
 0x451   : > { %v2537_v6 = vpop.permute.xlu0 %2536  ;;  %4300 = vtanh.f32 %v2243_v29  ;;  %v4289_v25 = vpop.eup %4288  ;;  %v6196_v52 = vadd.f32 %v2851_v14, %v2780_v7  ;;  %v2783_v19 = vmul.f32 %v6028_v45, %v5525_v35  ;;  %v2784_v7 = vmul.f32 %v6028_v45, %v5528_v39 }
 0x452   : > { %v2712_v32 = vmul.f32 %v4285_v10, %v2537_v6  ;;  %4302 = vtanh.f32 %v2241_v46  ;;  %v2857_v49 = vmul.f32 %v6034_v56, %v2715_v36  ;;  %v6198_v47 = vadd.f32 %v2856_v55, %v2785_v31  ;;  %v4291_v15 = vpop.eup %4290  ;;  %v7106_v31 = vld [vmem:[#allocation69_spill] sm:$0xff]  ;;  %v7107_v46 = vld [vmem:[#allocation39_spill] sm:$0xff] }
 0x453   : > { %4304 = vtanh.f32 %v5893_v63  ;;  %v2539_v62 = vpop.permute.xlu1 %2538  ;;  %v4293_v42 = vpop.eup %4292  ;;  %v7104_v63 = vld [vmem:[#allocation37_spill] sm:$0xff]  ;;  %v6216_v40 = vmul.f32 %v6028_v45, %v7105_v16  ;;  %v6222_v39 = vmul.f32 %v6028_v45, %v7107_v46  ;;  %v6226_v10 = vmul.f32 %v6028_v45, %v7108_v57  ;;  %v7115_v57 = vld [vmem:[#allocation74_spill] sm:$0xff] }
 0x454   : > { %v2854_v41 = vmul.f32 %v6034_v56, %v2712_v32  ;;  %v2713_v8 = vmul.f32 %v4287_v43, %v2539_v62  ;;  %2610 = vrot.lane.b32.xlu1 %v2429_v61, %s4684_s20  ;;  %v6205_v21 = vadd.f32 %v2857_v49, %v2786_v27  ;;  %4306 = vtanh.f32 %v7103_v59  ;;  %v7109_v61 = vld [vmem:[#allocation71_spill] sm:$0xff]  ;;  %v7110_v43 = vld [vmem:[#allocation72_spill] sm:$0xff]  ;;  %v7113_v46 = vld [vmem:[#allocation73_spill] sm:$0xff] }
 0x455   : > { %v2549_v50 = vpop.permute.xlu0 %2548  ;;  %v2789_v14 = vmul.f32 %v6028_v45, %v7104_v63  ;;  %4308 = vtanh.f32 %v7106_v31 }
 0x456   : > { %v2718_v0 = vmul.f32 %v4289_v25, %v2549_v50  ;;  %v6210_v35 = vadd.f32 %v2854_v41, %v2783_v19  ;;  %v2855_v27 = vmul.f32 %v6034_v56, %v2713_v8  ;;  %4310 = vtanh.f32 %v7109_v61 }
 0x457   : > { %v4295_v29 = vpop.eup %4294  ;;  %v2551_v36 = vpop.permute.xlu1 %2550  ;;  %4312 = vtanh.f32 %v7110_v43 }
 0x458   : > { %v2860_v55 = vmul.f32 %v6034_v56, %v2718_v0  ;;  %v2370_v32 = vadd.f32 1.0, %v4295_v29  ;;  %v2719_v25 = vmul.f32 %v4293_v42, %v2551_v36  ;;  %v3764_v49 = vpop.f32.mrb[60].mxu1  ;;  %v6231_v41 = vadd.f32 %v2855_v27, %v2784_v7  ;;  %v7112_v0 = vld [vmem:[#allocation41_spill] sm:$0xff] }
 0x459   : > { %v4297_v6 = vpop.eup %4296  ;;  %v2545_v19 = vpop.permute.xlu0 %2544  ;;  %v6234_v8 = vadd.f32 %v6153_v37, %v3764_v49  ;;  %v2793_v31 = vmul.f32 %v6028_v45, %v7112_v0  ;;  %4314 = vtanh.f32 %v7113_v46 }
 0x45a   : > { %v2368_v62 = vadd.f32 1.0, %v4297_v6  ;;  %v2716_v50 = vmul.f32 %v4291_v15, %v2545_v19  ;;  %v2105_v59 = vpop.f32.mrb[61].mxu1  ;;  %v6236_v63 = vadd.f32 %v2860_v55, %v2789_v14  ;;  %v4299_v16 = vpop.eup %4298  ;;  %v2434_v29 = vmul.f32 0.5, %v2370_v32 }
 0x45b   : > { %7111 = vst [vmem:[#allocation70_spill] sm:$0xff] %v6234_v8  ;;  %v6242_v42 = vadd.f32 %v6153_v37, %v2105_v59  ;;  %v3765_v7 = vpop.f32.mrb[62].mxu1  ;;  %v4301_v27 = vpop.eup %4300  ;;  %4316 = vtanh.f32 %v7115_v57  ;;  %v2861_v15 = vmul.f32 %v6034_v56, %v2719_v25  ;;  %v2246_v14 = vmul.f32 0.5, %v6234_v8 }
 0x45c   : > { %v2432_v61 = vmul.f32 0.5, %v2368_v62  ;;  %v2547_v55 = vpop.permute.xlu1 %2546  ;;  %v2108_v36 = vpop.f32.mrb[63].mxu1  ;;  %v2371_v43 = vadd.f32 1.0, %v4301_v27  ;;  %v2858_v49 = vmul.f32 %v6034_v56, %v2716_v50  ;;  %2620 = vrot.lane.b32.xlu0 %v2434_v29, %s4684_s20  ;;  %v6251_v62 = vadd.f32 %v6153_v37, %v3765_v7  ;;  %v7119_v29 = vld [vmem:[#allocation75_spill] sm:$0xff] }
 0x45d   : > { %7114 = vst [vmem:[#allocation37_spill] sm:$0xff] %v6242_v42  ;;  %v4303_v6 = vpop.eup %4302  ;;  %v2244_v32 = vmul.f32 0.5, %v6242_v42  ;;  %v2717_v19 = vmul.f32 %v4299_v16, %v2547_v55  ;;  %v2557_v59 = vpop.permute.xlu0 %2556  ;;  %4318 = vtanh.f32 %v2246_v14  ;;  %v6254_v25 = vadd.f32 %v6153_v37, %v2108_v36  ;;  %v7118_v42 = vld [vmem:[#allocation42_spill] sm:$0xff] }
 0x45e   : > { %v4305_v0 = vpop.eup %4304  ;;  %v2369_v46 = vadd.f32 1.0, %v4303_v6  ;;  %7116 = vst [vmem:[#allocation38_spill] sm:$0xff] %v6251_v62  ;;  %v2435_v57 = vmul.f32 0.5, %v2371_v43  ;;  %v2794_v16 = vmul.f32 %v6028_v45, %v7118_v42  ;;  %v2247_v55 = vmul.f32 0.5, %v6251_v62 }
 0x45f   : > { %7117 = vst [vmem:[#allocation69_spill] sm:$0xff] %v6254_v25  ;;  %4320 = vtanh.f32 %v2244_v32  ;;  %v2859_v27 = vmul.f32 %v6034_v56, %v2717_v19  ;;  %v2722_v50 = vmul.f32 %v4305_v0, %v2557_v59  ;;  %v4307_v8 = vpop.eup %4306  ;;  %v2245_v14 = vmul.f32 0.5, %v6254_v25 }
 0x460   : > { %4322 = vtanh.f32 %v7119_v29  ;;  %v2559_v7 = vpop.permute.xlu1 %2558  ;;  %v4309_v6 = vpop.eup %4308  ;;  %v2433_v37 = vmul.f32 0.5, %v2369_v46  ;;  %2622 = vrot.lane.b32.xlu1 %v2435_v57, %s4684_s20  ;;  %2616 = vrot.lane.b32.xlu0 %v2432_v61, %s4684_s20  ;;  %v6267_v59 = vadd.f32 %v2861_v15, %v6216_v40  ;;  %v6270_v0 = vadd.f32 %v2858_v49, %v6222_v39  ;;  %v7121_v61 = vld [vmem:[#allocation43_spill] sm:$0xff] }
 0x461   : > { %4324 = vtanh.f32 %v7120_v4  ;;  %v2864_v36 = vmul.f32 %v6034_v56, %v2722_v50  ;;  %v2723_v43 = vmul.f32 %v4307_v8, %v2559_v7  ;;  %v2553_v32 = vpop.permute.xlu0 %2552  ;;  %v4311_v42 = vpop.eup %4310  ;;  %v6274_v8 = vadd.f32 %v2859_v27, %v6226_v10  ;;  %v7122_v7 = vld [vmem:[#allocation78_spill] sm:$0xff] }
 0x462   : > { %4326 = vtanh.f32 %v2247_v55  ;;  %v2720_v19 = vmul.f32 %v4309_v6, %v2553_v32  ;;  %v4313_v29 = vpop.eup %4312  ;;  %v2791_v57 = vmul.f32 %v6028_v45, %v7121_v61 }
 0x463   : > { %4328 = vtanh.f32 %v2245_v14  ;;  %v2865_v4 = vmul.f32 %v6034_v56, %v2723_v43  ;;  %v6276_v46 = vadd.f32 %v2864_v36, %v2793_v31  ;;  %v4315_v40 = vpop.eup %4314  ;;  %v7124_v31 = vld [vmem:[#allocation44_spill] sm:$0xff]  ;;  %v7125_v36 = vld [vmem:[#allocation77_spill] sm:$0xff] }
 0x464   : > { %v2862_v50 = vmul.f32 %v6034_v56, %v2720_v19  ;;  %v2555_v55 = vpop.permute.xlu1 %2554  ;;  %2618 = vrot.lane.b32.xlu1 %v2433_v37, %s4684_s20  ;;  %4330 = vtanh.f32 %v7122_v7  ;;  %v2792_v6 = vmul.f32 %v6028_v45, %v7124_v31  ;;  %v7128_v31 = vld [vmem:[#allocation79_spill] sm:$0xff] }
 0x465   : > { %v2721_v15 = vmul.f32 %v4311_v42, %v2555_v55  ;;  %v2565_v39 = vpop.permute.xlu0 %2564  ;;  %v6282_v49 = vadd.f32 %v2865_v4, %v2794_v16  ;;  %v4317_v14 = vpop.eup %4316  ;;  %4332 = vtanh.f32 %v7125_v36  ;;  %v7126_v42 = vld [vmem:[#allocation45_spill] sm:$0xff] }
 0x466   : > { %v2726_v10 = vmul.f32 %v4313_v29, %v2565_v39  ;;  %v6285_v27 = vadd.f32 %v2862_v50, %v2791_v57  ;;  %v2797_v37 = vmul.f32 %v6028_v45, %v7126_v42  ;;  %v7127_v39 = vld [vmem:[#allocation46_spill] sm:$0xff]  ;;  %4334 = vtanh.f32 %v7128_v31  ;;  %v7130_v42 = vld [vmem:[#allocation80_spill] sm:$0xff] }
 0x467   : > { %v2863_v43 = vmul.f32 %v6034_v56, %v2721_v15  ;;  %v4319_v32 = vpop.eup %4318  ;;  %v2798_v7 = vmul.f32 %v6028_v45, %v7127_v39  ;;  %4336 = vtanh.f32 %v7130_v42 }
 0x468   : > { %7123 = vst [vmem:[#allocation39_spill] sm:$0xff] %v6285_v27  ;;  %v2868_v16 = vmul.f32 %v6034_v56, %v2726_v10  ;;  %v2567_v19 = vpop.permute.xlu1 %2566  ;;  %v2374_v61 = vadd.f32 1.0, %v4319_v32  ;;  %v7132_v27 = vld [vmem:[#allocation81_spill] sm:$0xff] }
 0x469   : > { %v4321_v4 = vpop.eup %4320  ;;  %v2727_v55 = vmul.f32 %v4317_v14, %v2567_v19  ;;  %v2561_v29 = vpop.permute.xlu0 %2560  ;;  %v6294_v57 = vadd.f32 %v2863_v43, %v2792_v6  ;;  %v7131_v19 = vld [vmem:[#allocation47_spill] sm:$0xff]  ;;  %4338 = vtanh.f32 %v7132_v27 }
 0x46a   : > { %v4323_v50 = vpop.eup %4322  ;;  %v2724_v15 = vmul.f32 %v4315_v40, %v2561_v29  ;;  %v6299_v36 = vadd.f32 %v2868_v16, %v2797_v37  ;;  %v2438_v10 = vmul.f32 0.5, %v2374_v61  ;;  %v2372_v62 = vadd.f32 1.0, %v4321_v4  ;;  %v7134_v4 = vld [vmem:[#allocation48_spill] sm:$0xff] }
 0x46b   : > { %v4325_v25 = vpop.eup %4324  ;;  %v2869_v32 = vmul.f32 %v6034_v56, %v2727_v55  ;;  %v2795_v6 = vmul.f32 %v6028_v45, %v7131_v19  ;;  %v2796_v61 = vmul.f32 %v6028_v45, %v7134_v4  ;;  %v7135_v55 = vld [vmem:[#allocation82_spill] sm:$0xff] }
 0x46c   : > { %7129 = vst [vmem:[#allocation40_spill] sm:$0xff] %v6299_v36  ;;  %v4327_v14 = vpop.eup %4326  ;;  %v2866_v43 = vmul.f32 %v6034_v56, %v2724_v15  ;;  %v2563_v28 = vpop.permute.xlu1 %2562  ;;  %2628 = vrot.lane.b32.xlu0 %v2438_v10, %s4684_s20  ;;  %4340 = vtanh.f32 %v7135_v55  ;;  %v2436_v15 = vmul.f32 0.5, %v2372_v62  ;;  %v7137_v62 = vld [vmem:[#allocation83_spill] sm:$0xff] }
 0x46d   : > { %v4329_v39 = vpop.eup %4328  ;;  %v2375_v40 = vadd.f32 1.0, %v4327_v14  ;;  %v2725_v37 = vmul.f32 %v4323_v50, %v2563_v28  ;;  %v2573_v16 = vpop.permute.xlu0 %2572  ;;  %v6308_v29 = vadd.f32 %v2869_v32, %v2798_v7  ;;  %v7136_v28 = vld [vmem:[#allocation49_spill] sm:$0xff]  ;;  %4342 = vtanh.f32 %v7137_v62 }
 0x46e   : > { %v2730_v31 = vmul.f32 %v4325_v25, %v2573_v16  ;;  %v6313_v42 = vadd.f32 %v2866_v43, %v2795_v6  ;;  %v2373_v36 = vadd.f32 1.0, %v4329_v39  ;;  %v4331_v14 = vpop.eup %4330  ;;  %v2801_v50 = vmul.f32 %v6028_v45, %v7136_v28  ;;  %v7139_v16 = vld [vmem:[#allocation84_spill] sm:$0xff] }
 0x46f   : > { %7133 = vst [vmem:[#allocation71_spill] sm:$0xff] %v6308_v29  ;;  %v2439_v19 = vmul.f32 0.5, %v2375_v40  ;;  %v2867_v27 = vmul.f32 %v6034_v56, %v2725_v37  ;;  %v4333_v32 = vpop.eup %4332  ;;  %v7138_v40 = vld [vmem:[#allocation50_spill] sm:$0xff]  ;;  %4344 = vtanh.f32 %v7139_v16 }
 0x470   : > { %v2872_v7 = vmul.f32 %v6034_v56, %v2730_v31  ;;  %v2575_v10 = vpop.permute.xlu1 %2574  ;;  %2624 = vrot.lane.b32.xlu0 %v2436_v15, %s4684_s20  ;;  %v2802_v37 = vmul.f32 %v6028_v45, %v7138_v40  ;;  %v2437_v4 = vmul.f32 0.5, %v2373_v36  ;;  %v4335_v31 = vpop.eup %4334  ;;  %v7144_v40 = vld [vmem:[#allocation85_spill] sm:$0xff] }
 0x471   : > { %v2731_v29 = vmul.f32 %v4331_v14, %v2575_v10  ;;  %2630 = vrot.lane.b32.xlu1 %v2439_v19, %s4684_s20  ;;  %v2569_v25 = vpop.permute.xlu0 %2568  ;;  %v6321_v6 = vadd.f32 %v2867_v27, %v2796_v61  ;;  %v7140_v19 = vld [vmem:[#allocation51_spill] sm:$0xff]  ;;  %v4337_v14 = vpop.eup %4336  ;;  %v7141_v10 = vld [vmem:[#allocation86_spill] sm:$0xff] }
 0x472   : > { %v2728_v43 = vmul.f32 %v4333_v32, %v2569_v25  ;;  %v6324_v39 = vadd.f32 %v2872_v7, %v2801_v50  ;;  %v2799_v15 = vmul.f32 %v6028_v45, %v7140_v19  ;;  %4346 = vtanh.f32 %v7141_v10  ;;  %v7143_v25 = vld [vmem:[#allocation25_spill] sm:$0xff]  ;;  %v7149_v10 = vld [vmem:[#allocation26_spill] sm:$0xff] }
 0x473   : > { %v2873_v55 = vmul.f32 %v6034_v56, %v2731_v29  ;;  %v4339_v29 = vpop.eup %4338  ;;  %v2800_v62 = vmul.f32 %v6028_v45, %v7143_v25  ;;  %4348 = vtanh.f32 %v7144_v40  ;;  %v2806_v25 = vmul.f32 %v6028_v45, %v7149_v10  ;;  %v7155_v10 = vld [vmem:[#allocation89_spill] sm:$0xff] }
 0x474   : > { %v2870_v61 = vmul.f32 %v6034_v56, %v2728_v43  ;;  %v2571_v27 = vpop.permute.xlu1 %2570 }
 0x475   : > { %v2729_v28 = vmul.f32 %v4335_v31, %v2571_v27  ;;  %2626 = vrot.lane.b32.xlu1 %v2437_v4, %s4684_s20  ;;  %v2581_v50 = vpop.permute.xlu0 %2580  ;;  %v6334_v7 = vadd.f32 %v2873_v55, %v2802_v37  ;;  %v7145_v31 = vld [vmem:[#allocation27_spill] sm:$0xff] }
 0x476   : > { %v2734_v32 = vmul.f32 %v4337_v14, %v2581_v50  ;;  %v6337_v36 = vadd.f32 %v2870_v61, %v2799_v15  ;;  %v4341_v16 = vpop.eup %4340  ;;  %v2805_v4 = vmul.f32 %v6028_v45, %v7145_v31  ;;  %v7147_v15 = vld [vmem:[#allocation87_spill] sm:$0xff] }
 0x477   : > { %v2871_v43 = vmul.f32 %v6034_v56, %v2729_v28  ;;  %4350 = vtanh.f32 %v7147_v15  ;;  %v7150_v28 = vld [vmem:[#allocation88_spill] sm:$0xff]  ;;  %v4343_v31 = vpop.eup %4342 }
 0x478   : > { %7142 = vst [vmem:[#allocation72_spill] sm:$0xff] %v6337_v36  ;;  %v2876_v37 = vmul.f32 %v6034_v56, %v2734_v32  ;;  %v2583_v55 = vpop.permute.xlu1 %2582  ;;  %4352 = vtanh.f32 %v7150_v28  ;;  %v7151_v36 = vld [vmem:[#allocation28_spill] sm:$0xff] }
 0x479   : > { %v2735_v19 = vmul.f32 %v4341_v16, %v2583_v55  ;;  %v2577_v27 = vpop.permute.xlu0 %2576  ;;  %v6346_v14 = vadd.f32 %v2871_v43, %v2800_v62  ;;  %v2803_v32 = vmul.f32 %v6028_v45, %v7151_v36  ;;  %v4345_v43 = vpop.eup %4344  ;;  %4354 = vtanh.f32 %v6002_v9 }
 0x47a   : > { %v2732_v61 = vmul.f32 %v4339_v29, %v2577_v27  ;;  %v6349_v50 = vadd.f32 %v2876_v37, %v2805_v4  ;;  %v7154_v27 = vld [vmem:[#allocation29_spill] sm:$0xff]  ;;  %4356 = vtanh.f32 %v7155_v10 }
 0x47b   : > { %7146 = vst [vmem:[#allocation41_spill] sm:$0xff] %v6346_v14  ;;  %v2877_v40 = vmul.f32 %v6034_v56, %v2735_v19  ;;  %v2804_v19 = vmul.f32 %v6028_v45, %v7154_v27  ;;  %v7160_v27 = vld [vmem:[#allocation30_spill] sm:$0xff] }
 0x47c   : > { %7148 = vst [vmem:[#allocation73_spill] sm:$0xff] %v6349_v50  ;;  %v2874_v16 = vmul.f32 %v6034_v56, %v2732_v61  ;;  %v2579_v62 = vpop.permute.xlu1 %2578  ;;  %v4347_v28 = vpop.eup %4346  ;;  %v7156_v61 = vld [vmem:[#allocation31_spill] sm:$0xff] }
 0x47d   : > { %v2733_v55 = vmul.f32 %v4343_v31, %v2579_v62  ;;  %v2589_v15 = vpop.permute.xlu0 %2588  ;;  %v6358_v29 = vadd.f32 %v2877_v40, %v2806_v25  ;;  %v2809_v50 = vmul.f32 %v6028_v45, %v7156_v61  ;;  %v4349_v40 = vpop.eup %4348  ;;  %v7161_v61 = vld [vmem:[#allocation32_spill] sm:$0xff] }
 0x47e   : > { %v2738_v4 = vmul.f32 %v4345_v43, %v2589_v15  ;;  %v6361_v37 = vadd.f32 %v2874_v16, %v2803_v32  ;;  %v7158_v32 = vld [vmem:[#allocation90_spill] sm:$0xff] }
 0x47f   : > { %7152 = vst [vmem:[#allocation74_spill] sm:$0xff] %v6358_v29  ;;  %v2875_v36 = vmul.f32 %v6034_v56, %v2733_v55  ;;  %4358 = vtanh.f32 %v7158_v32  ;;  %v2810_v55 = vmul.f32 %v6028_v45, %v7160_v27  ;;  %v7164_v27 = vld [vmem:[#allocation53_spill] sm:$0xff] }
 0x480   : > { %7153 = vst [vmem:[#allocation42_spill] sm:$0xff] %v6361_v37  ;;  %v2880_v31 = vmul.f32 %v6034_v56, %v2738_v4  ;;  %v2591_v25 = vpop.permute.xlu1 %2590  ;;  %v2807_v4 = vmul.f32 %v6028_v45, %v7161_v61  ;;  %v2813_v61 = vmul.f32 %v6028_v45, %v7164_v27  ;;  %4360 = vtanh.f32 %v6026_v22 }
 0x481   : > { %v2739_v62 = vmul.f32 %v4347_v28, %v2591_v25  ;;  %v2585_v9 = vpop.permute.xlu0 %2584  ;;  %v6370_v43 = vadd.f32 %v2875_v36, %v2804_v19  ;;  %v4351_v37 = vpop.eup %4350  ;;  %4362 = vtanh.f32 %v6039_v53  ;;  %v3009_v22 = vsel %vm2966_vm2, %v6158_v3, 0.0 }
 0x482   : > { %v2736_v16 = vmul.f32 %v4349_v40, %v2585_v9  ;;  %v6373_v15 = vadd.f32 %v2880_v31, %v2809_v50  ;;  %v4353_v25 = vpop.eup %4352  ;;  %v7163_v31 = vld [vmem:[#allocation52_spill] sm:$0xff]  ;;  %4364 = vtanh.f32 %v6032_v48  ;;  %v3006_v53 = vsel %vm2966_vm2, %v6196_v52, 0.0 }
 0x483   : > { %7157 = vst [vmem:[#allocation75_spill] sm:$0xff] %v6370_v43  ;;  %v2881_v10 = vmul.f32 %v6034_v56, %v2739_v62  ;;  %v2808_v9 = vmul.f32 %v6028_v45, %v7163_v31  ;;  %v4355_v32 = vpop.eup %4354  ;;  %v7166_v31 = vld [vmem:[#allocation55_spill] sm:$0xff]  ;;  %4366 = vtanh.f32 %v6044_v13  ;;  %v3021_v52 = vsel %vm2966_vm2, %v6198_v47, 0.0 }
 0x484   : > { %7159 = vst [vmem:[#allocation76_spill] sm:$0xff] %v6373_v15  ;;  %v2878_v29 = vmul.f32 %v6034_v56, %v2736_v16  ;;  %v2587_v28 = vpop.permute.xlu1 %2586  ;;  %v4357_v14 = vpop.eup %4356  ;;  %v2811_v27 = vmul.f32 %v6028_v45, %v7166_v31  ;;  %4368 = vtanh.f32 %v6084_v44 }
 0x485   : > { %v2737_v19 = vmul.f32 %v4351_v37, %v2587_v28  ;;  %v2597_v36 = vpop.permute.xlu0 %2596  ;;  %v6381_v43 = vadd.f32 %v2881_v10, %v2810_v55  ;;  %4370 = vtanh.f32 %v6088_v34  ;;  %v3033_v34 = vsel %vm2966_vm2, %v6236_v63, 0.0 }
 0x486   : > { %v2742_v40 = vmul.f32 %v4353_v25, %v2597_v36  ;;  %v6383_v50 = vadd.f32 %v2878_v29, %v2807_v4  ;;  %v7165_v4 = vld [vmem:[#allocation54_spill] sm:$0xff]  ;;  %4372 = vtanh.f32 %v6099_v20  ;;  %v3030_v20 = vsel %vm2966_vm2, %v6274_v8, 0.0 }
 0x487   : > { %v2879_v62 = vmul.f32 %v6034_v56, %v2737_v19  ;;  %v2814_v25 = vmul.f32 %v6028_v45, %v7165_v4  ;;  %v2988_v4 = vsel %vm2966_vm2, %v6115_v33, 0.0  ;;  %v2991_v33 = vsel %vm2966_vm2, %v6132_v51, 0.0 }
 0x488   : > { %7162 = vst [vmem:[#allocation43_spill] sm:$0xff] %v6383_v50  ;;  %v2884_v16 = vmul.f32 %v6034_v56, %v2742_v40  ;;  %v2599_v15 = vpop.permute.xlu1 %2598  ;;  %4374 = vtanh.f32 %v6103_v1  ;;  %v3045_v8 = vsel %vm2966_vm2, %v6276_v46, 0.0 }
 0x489   : > { %v2743_v37 = vmul.f32 %v4355_v32, %v2599_v15  ;;  %v2593_v28 = vpop.permute.xlu0 %2592  ;;  %v6391_v55 = vadd.f32 %v2879_v62, %v2808_v9  ;;  %v4359_v36 = vpop.eup %4358  ;;  %4376 = vtanh.f32 %v6156_v11  ;;  %v7175_v11 = vld [vmem:[#allocation39_spill] sm:$0xff] }
 0x48a   : > { %v2740_v10 = vmul.f32 %v4357_v14, %v2593_v28  ;;  %v6393_v29 = vadd.f32 %v2884_v16, %v2813_v61  ;;  %v7167_v14 = vld [vmem:[#allocation56_spill] sm:$0xff]  ;;  %v2973_v16 = vsel %vm2966_vm2, %v6051_v18, 0.0  ;;  %v2967_v28 = vsel %vm2966_vm2, %v6061_v30, 0.0 }
 0x48b   : > { %v2885_v19 = vmul.f32 %v6034_v56, %v2743_v37  ;;  %v2812_v62 = vmul.f32 %v6028_v45, %v7167_v14  ;;  %v2985_v18 = vsel %vm2966_vm2, %v6090_v54, 0.0  ;;  %v2982_v30 = vsel %vm2966_vm2, %v6120_v17, 0.0  ;;  %v4361_v17 = vpop.eup %4360 }
 0x48c   : > { %v2882_v40 = vmul.f32 %v6034_v56, %v2740_v10  ;;  %v2595_v50 = vpop.permute.xlu1 %2594  ;;  %v2970_v10 = vsel %vm2966_vm2, %v6077_v2, 0.0  ;;  %v2997_v2 = vsel %vm2966_vm2, %v6122_v38, 0.0  ;;  %v2994_v54 = vsel %vm2966_vm2, %v6151_v60, 0.0  ;;  %v4363_v51 = vpop.eup %4362  ;;  %v7168_v60 = vld [vmem:[#allocation35_spill] sm:$0xff] }
 0x48d   : > { %v2741_v15 = vmul.f32 %v4359_v36, %v2595_v50  ;;  %v6401_v32 = vadd.f32 %v2885_v19, %v2814_v25  ;;  %v2976_v50 = vsel %vm2966_vm2, %v6063_v26, 0.0  ;;  %v2979_v25 = vsel %vm2966_vm2, %v6117_v58, 0.0  ;;  %v4365_v19 = vpop.eup %4364 }
 0x48e   : > { %v6403_v9 = vadd.f32 %v2882_v40, %v2811_v27  ;;  %v3000_v26 = vsel %vm2966_vm2, %v6129_v12, 0.0  ;;  %v3012_v58 = vsel %vm2966_vm2, %v6190_v23, 0.0  ;;  %v3003_v12 = vsel %vm2966_vm2, %v6193_v5, 0.0 }
 0x48f   : > { %v2883_v61 = vmul.f32 %v6034_v56, %v2741_v15  ;;  %2974 = vadd.xlane.f32.xlu0 %v2973_v16  ;;  %v2817_v13 = vmul.f32 %v6028_v45, %v7168_v60  ;;  %v3024_v27 = vsel %vm2966_vm2, %v6205_v21, 0.0  ;;  %v7169_v15 = vld [vmem:[#allocation36_spill] sm:$0xff]  ;;  %v7173_v60 = vld [vmem:[#allocation58_spill] sm:$0xff]  ;;  %4378 = vtanh.f32 %v6164_v24 }
 0x490   : > { %v2818_v14 = vmul.f32 %v6028_v45, %v7169_v15  ;;  %v6459_v16 = vld [vmem:[#allocation12] ss:$0 sm:$0xff]  ;;  %v3018_v45 = vsel %vm2966_vm2, %v6231_v41, 0.0  ;;  %v3036_v41 = vsel %vm2966_vm2, %v6267_v59, 0.0 }
 0x491   : > { %v6410_v37 = vadd.f32 %v2883_v61, %v2812_v62  ;;  %v4367_v61 = vpop.eup %4366 }
 0x493   : > { %2968 = vadd.xlane.f32.xlu0 %v2967_v28  ;;  %v7170_v28 = vld [vmem:[#allocation34_spill] sm:$0xff] }
 0x494   : > { %v2815_v21 = vmul.f32 %v6459_v16, %v7170_v28  ;;  %v7178_v28 = vld [vmem:[#allocation71_spill] sm:$0xff] }
 0x497   : > { %2977 = vadd.xlane.f32.xlu0 %v2976_v50  ;;  %v6463_v50 = vld [vmem:[#allocation14] ss:$0 sm:$0xff] }
 0x499   : > { %2971 = vadd.xlane.f32.xlu1 %v2970_v10 }
 0x49b   : > { %2989 = vadd.xlane.f32.xlu0 %v2988_v4 }
 0x49d   : > { %2986 = vadd.xlane.f32.xlu1 %v2985_v18 }
 0x49f   : > { %2983 = vadd.xlane.f32.xlu0 %v2982_v30  ;;  %v7171_v30 = vld [vmem:[#allocation33_spill] sm:$0xff] }
 0x4a1   : > { %2980 = vadd.xlane.f32.xlu1 %v2979_v25  ;;  %v2816_v25 = vmul.f32 %v6459_v16, %v7171_v30  ;;  %v3054_v30 = vsel %vm2966_vm2, %v6321_v6, 0.0  ;;  %v3069_v6 = vsel %vm2966_vm2, %v6324_v39, 0.0 }
 0x4a3   : > { %3001 = vadd.xlane.f32.xlu0 %v3000_v26 }
 0x4a5   : > { %2998 = vadd.xlane.f32.xlu1 %v2997_v2 }
 0x4a7   : > { %2995 = vadd.xlane.f32.xlu0 %v2994_v54 }
 0x4a9   : > { %2992 = vadd.xlane.f32.xlu1 %v2991_v33  ;;  %v3027_v33 = vsel %vm2966_vm2, %v6270_v0, 0.0 }
 0x4ab   : > { %3013 = vadd.xlane.f32.xlu0 %v3012_v58 }
 0x4ad   : > { %3010 = vadd.xlane.f32.xlu1 %v3009_v22  ;;  %v7172_v22 = vld [vmem:[#allocation60_spill] sm:$0xff] }
 0x4ae   : > { %v2605_v38 = vpop.permute.xlu0 %2604 }
 0x4af   : > { %v2746_v48 = vmul.f32 %v4361_v17, %v2605_v38  ;;  %3007 = vadd.xlane.f32.xlu0 %v3006_v53  ;;  %v2821_v17 = vmul.f32 %v6459_v16, %v7172_v22 }
 0x4b1   : > { %3004 = vadd.xlane.f32.xlu1 %v3003_v12  ;;  %v2888_v23 = vmul.f32 %v6034_v56, %v2746_v48  ;;  %v2607_v3 = vpop.permute.xlu1 %2606  ;;  %v3048_v12 = vsel %vm2966_vm2, %v6282_v49, 0.0 }
 0x4b2   : > { %v2747_v36 = vmul.f32 %v4363_v51, %v2607_v3  ;;  %v2601_v31 = vpop.permute.xlu0 %2600 }
 0x4b3   : > { %v2744_v5 = vmul.f32 %v4365_v19, %v2601_v31  ;;  %3025 = vadd.xlane.f32.xlu0 %v3024_v27  ;;  %v6453_v40 = vadd.f32 %v2888_v23, %v2817_v13  ;;  %v2819_v13 = vmul.f32 %v6459_v16, %v7173_v60  ;;  %v7174_v23 = vld [vmem:[#allocation59_spill] sm:$0xff]  ;;  %v3042_v31 = vsel %vm2966_vm2, %v6294_v57, 0.0  ;;  %v7186_v60 = vld [vmem:[#allocation41_spill] sm:$0xff] }
 0x4b4   : > { %v2889_v62 = vmul.f32 %v6034_v56, %v2747_v36  ;;  %v3015_v56 = vsel %vm2966_vm2, %v6210_v35, 0.0  ;;  %v4369_v35 = vpop.eup %4368  ;;  %v2822_v3 = vmul.f32 %v6459_v16, %v7174_v23  ;;  %v3060_v57 = vsel %vm2966_vm2, %v7178_v28, 0.0  ;;  %v7192_v28 = vld [vmem:[#allocation69_spill] sm:$0xff] }
 0x4b5   : > { %3022 = vadd.xlane.f32.xlu1 %v3021_v52  ;;  %v2886_v47 = vmul.f32 %v6463_v50, %v2744_v5  ;;  %v2603_v10 = vpop.permute.xlu1 %2602  ;;  %v4371_v59 = vpop.eup %4370  ;;  %v3039_v52 = vsel %vm2966_vm2, %v7175_v11, 0.0 }
 0x4b6   : > { %v2745_v4 = vmul.f32 %v4367_v61, %v2603_v10  ;;  %v6468_v18 = vadd.f32 %v2889_v62, %v2818_v14  ;;  %v4373_v38 = vpop.eup %4372  ;;  %v7176_v14 = vld [vmem:[#allocation91_spill] sm:$0xff]  ;;  %v7177_v62 = vld [vmem:[#allocation57_spill] sm:$0xff] }
 0x4b7   : > { %3019 = vadd.xlane.f32.xlu0 %v3018_v45  ;;  %v6473_v44 = vadd.f32 %v2886_v47, %v2815_v21  ;;  %v4375_v36 = vpop.eup %4374  ;;  %4380 = vtanh.f32 %v7176_v14  ;;  %v2820_v61 = vmul.f32 %v6459_v16, %v7177_v62  ;;  %v7179_v21 = vld [vmem:[#allocation40_spill] sm:$0xff]  ;;  %v7191_v62 = vld [vmem:[#allocation73_spill] sm:$0xff] }
 0x4b8   : > { %v2887_v26 = vmul.f32 %v6463_v50, %v2745_v4  ;;  %v3057_v47 = vsel %vm2966_vm2, %v7179_v21, 0.0  ;;  %v7180_v4 = vld [vmem:[#allocation92_spill] sm:$0xff]  ;;  %v4377_v45 = vpop.eup %4376 }
 0x4b9   : > { %3016 = vadd.xlane.f32.xlu1 %v3015_v56  ;;  %4382 = vtanh.f32 %v7180_v4 }
 0x4ba   : > { %v6481_v2 = vadd.f32 %v2887_v26, %v2816_v25  ;;  %v3051_v25 = vsel %vm2966_vm2, %v6313_v42, 0.0 }
 0x4bb   : > { %3037 = vadd.xlane.f32.xlu0 %v3036_v41  ;;  %v4379_v41 = vpop.eup %4378 }
 0x4bd   : > { %3034 = vadd.xlane.f32.xlu1 %v3033_v34  ;;  %v7181_v34 = vld [vmem:[#allocation64_spill] sm:$0xff] }
 0x4be   : > { %v2613_v54 = vpop.permute.xlu0 %2612 }
 0x4bf   : > { %v2750_v58 = vmul.f32 %v4369_v35, %v2613_v54  ;;  %3031 = vadd.xlane.f32.xlu0 %v3030_v20  ;;  %v2825_v35 = vmul.f32 %v6459_v16, %v7181_v34 }
 0x4c1   : > { %3028 = vadd.xlane.f32.xlu1 %v3027_v33  ;;  %v2892_v63 = vmul.f32 %v6463_v50, %v2750_v58  ;;  %v4381_v20 = vpop.eup %4380 }
 0x4c2   : > { %v2615_v1 = vpop.permute.xlu1 %2614  ;;  %v2609_v53 = vpop.permute.xlu0 %2608 }
 0x4c3   : > { %v2751_v48 = vmul.f32 %v4373_v38, %v2615_v1  ;;  %v2748_v0 = vmul.f32 %v4371_v59, %v2609_v53  ;;  %3049 = vadd.xlane.f32.xlu0 %v3048_v12  ;;  %v6497_v51 = vadd.f32 %v2892_v63, %v2821_v17  ;;  %v3072_v59 = vsel %vm2966_vm2, %v6334_v7, 0.0  ;;  %v7182_v63 = vld [vmem:[#allocation70_spill] sm:$0xff]  ;;  %v7184_v53 = vld [vmem:[#allocation63_spill] sm:$0xff] }
 0x4c4   : > { %4384 = vtanh.f32 %v7182_v63  ;;  %v7183_v38 = vld [vmem:[#allocation62_spill] sm:$0xff]  ;;  %v2826_v12 = vmul.f32 %v6459_v16, %v7184_v53 }
 0x4c5   : > { %3046 = vadd.xlane.f32.xlu1 %v3045_v8  ;;  %v2893_v19 = vmul.f32 %v6463_v50, %v2751_v48  ;;  %v2890_v49 = vmul.f32 %v6463_v50, %v2748_v0  ;;  %v2823_v1 = vmul.f32 %v6459_v16, %v7183_v38  ;;  %v4383_v8 = vpop.eup %4382  ;;  %v7185_v0 = vld [vmem:[#allocation37_spill] sm:$0xff]  ;;  %v7197_v63 = vld [vmem:[#allocation66_spill] sm:$0xff] }
 0x4c6   : > { %v2611_v46 = vpop.permute.xlu1 %2610  ;;  %4386 = vtanh.f32 %v7185_v0  ;;  %v2827_v38 = vmul.f32 %v6459_v16, %v7197_v63 }
 0x4c7   : > { %v2749_v27 = vmul.f32 %v4375_v36, %v2611_v46  ;;  %3043 = vadd.xlane.f32.xlu0 %v3042_v31  ;;  %v6511_v5 = vadd.f32 %v2893_v19, %v2822_v3  ;;  %v6513_v15 = vadd.f32 %v2890_v49, %v2819_v13  ;;  %v3066_v13 = vsel %vm2966_vm2, %v7186_v60, 0.0  ;;  %v7187_v3 = vld [vmem:[#allocation72_spill] sm:$0xff]  ;;  %v7188_v46 = vld [vmem:[#allocation38_spill] sm:$0xff]  ;;  %v7189_v31 = vld [vmem:[#allocation61_spill] sm:$0xff] }
 0x4c8   : > { %v3063_v19 = vsel %vm2966_vm2, %v7187_v3, 0.0  ;;  %4388 = vtanh.f32 %v7188_v46  ;;  %v7200_v3 = vld [vmem:[#allocation65_spill] sm:$0xff] }
 0x4c9   : > { %3040 = vadd.xlane.f32.xlu1 %v3039_v52  ;;  %v2891_v24 = vmul.f32 %v6463_v50, %v2749_v27  ;;  %v2824_v27 = vmul.f32 %v6459_v16, %v7189_v31  ;;  %v7190_v52 = vld [vmem:[#allocation74_spill] sm:$0xff]  ;;  %4390 = vtanh.f32 %v7192_v28  ;;  %v3108_v31 = vsel %vm2966_vm2, %v6401_v32, 0.0 }
 0x4ca   : > { %v3084_v14 = vsel %vm2966_vm2, %v7190_v52, 0.0  ;;  %v3099_v52 = vsel %vm2966_vm2, %v6403_v9, 0.0  ;;  %v3117_v32 = vsel %vm2966_vm2, %v6453_v40, 0.0  ;;  %v3132_v9 = vsel %vm2966_vm2, %v6511_v5, 0.0 }
 0x4cb   : > { %3061 = vadd.xlane.f32.xlu0 %v3060_v57  ;;  %v6523_v10 = vadd.f32 %v2891_v24, %v2820_v61  ;;  %v3081_v61 = vsel %vm2966_vm2, %v7191_v62, 0.0 }
 0x4cd   : > { %3058 = vadd.xlane.f32.xlu1 %v3057_v47  ;;  %v7193_v47 = vld [vmem:[#allocation75_spill] sm:$0xff]  ;;  %v3126_v40 = vsel %vm2966_vm2, %v6523_v10, 0.0 }
 0x4ce   : > { %v2621_v56 = vpop.permute.xlu0 %2620  ;;  %v4385_v57 = vpop.eup %4384  ;;  %v3078_v4 = vsel %vm2966_vm2, %v7193_v47, 0.0 }
 0x4cf   : > { %v2754_v26 = vmul.f32 %v4377_v45, %v2621_v56  ;;  %3055 = vadd.xlane.f32.xlu0 %v3054_v30  ;;  %v7194_v45 = vld [vmem:[#allocation42_spill] sm:$0xff] }
 0x4d0   : > { %v3075_v56 = vsel %vm2966_vm2, %v7194_v45, 0.0 }
 0x4d1   : > { %3052 = vadd.xlane.f32.xlu1 %v3051_v25  ;;  %v2896_v54 = vmul.f32 %v6463_v50, %v2754_v26  ;;  %v4387_v25 = vpop.eup %4386  ;;  %v7195_v26 = vld [vmem:[#allocation68_spill] sm:$0xff] }
 0x4d2   : > { %v2623_v33 = vpop.permute.xlu1 %2622  ;;  %v2617_v58 = vpop.permute.xlu0 %2616 }
 0x4d3   : > { %v2755_v22 = vmul.f32 %v4381_v20, %v2623_v33  ;;  %v2752_v42 = vmul.f32 %v4379_v41, %v2617_v58  ;;  %3073 = vadd.xlane.f32.xlu0 %v3072_v59  ;;  %v6537_v17 = vadd.f32 %v2896_v54, %v2825_v35  ;;  %v2829_v41 = vmul.f32 %v6459_v16, %v7195_v26  ;;  %v4389_v35 = vpop.eup %4388  ;;  %v7196_v59 = vld [vmem:[#allocation76_spill] sm:$0xff] }
 0x4d4   : > { %v3096_v33 = vsel %vm2966_vm2, %v6381_v43, 0.0 }
 0x4d5   : > { %3070 = vadd.xlane.f32.xlu1 %v3069_v6  ;;  %v2897_v48 = vmul.f32 %v6463_v50, %v2755_v22  ;;  %v2894_v7 = vmul.f32 %v6463_v50, %v2752_v42  ;;  %v3093_v22 = vsel %vm2966_vm2, %v7196_v59, 0.0 }
 0x4d6   : > { %v2619_v39 = vpop.permute.xlu1 %2618 }
 0x4d7   : > { %v2753_v23 = vmul.f32 %v4383_v8, %v2619_v39  ;;  %3067 = vadd.xlane.f32.xlu0 %v3066_v13  ;;  %v6551_v49 = vadd.f32 %v2897_v48, %v2826_v12  ;;  %v6553_v36 = vadd.f32 %v2894_v7, %v2823_v1  ;;  %v7198_v1 = vld [vmem:[#allocation67_spill] sm:$0xff]  ;;  %v4391_v7 = vpop.eup %4390  ;;  %v3090_v8 = vsel %vm2966_vm2, %v6391_v55, 0.0 }
 0x4d8   : > { %v2830_v53 = vmul.f32 %v6459_v16, %v7198_v1  ;;  %v7199_v39 = vld [vmem:[#allocation43_spill] sm:$0xff] }
 0x4d9   : > { %3064 = vadd.xlane.f32.xlu1 %v3063_v19  ;;  %v2895_v11 = vmul.f32 %v6463_v50, %v2753_v23  ;;  %v3087_v60 = vsel %vm2966_vm2, %v7199_v39, 0.0  ;;  %v2828_v19 = vmul.f32 %v6459_v16, %v7200_v3  ;;  %v3120_v16 = vsel %vm2966_vm2, %v6468_v18, 0.0 }
 0x4da   : > { %v3123_v18 = vsel %vm2966_vm2, %v6513_v15, 0.0  ;;  %v3135_v5 = vsel %vm2966_vm2, %v6553_v36, 0.0 }
 0x4db   : > { %3085 = vadd.xlane.f32.xlu0 %v3084_v14  ;;  %v6563_v24 = vadd.f32 %v2895_v11, %v2824_v27  ;;  %v3105_v27 = vsel %vm2966_vm2, %v6393_v29, 0.0  ;;  %v3102_v11 = vsel %vm2966_vm2, %v6410_v37, 0.0  ;;  %v3114_v29 = vsel %vm2966_vm2, %v6481_v2, 0.0  ;;  %v6626_v14 = vld [vmem:[#allocation2] ss:$0 sm:$0xff] }
 0x4dc   : > { %v3129_v37 = vsel %vm2966_vm2, %v6497_v51, 0.0  ;;  %v3141_v2 = vsel %vm2966_vm2, %v6537_v17, 0.0 }
 0x4dd   : > { %3082 = vadd.xlane.f32.xlu1 %v3081_v61  ;;  %v3138_v51 = vsel %vm2966_vm2, %v6563_v24, 0.0 }
 0x4de   : > { %v2629_v21 = vpop.permute.xlu0 %2628 }
 0x4df   : > { %v2758_v30 = vmul.f32 %v4385_v57, %v2629_v21  ;;  %3079 = vadd.xlane.f32.xlu0 %v3078_v4 }
 0x4e1   : > { %3076 = vadd.xlane.f32.xlu1 %v3075_v56  ;;  %v2900_v34 = vmul.f32 %v6463_v50, %v2758_v30 }
 0x4e2   : > { %v2625_v20 = vpop.permute.xlu0 %2624 }
 0x4e3   : > { %v2631_v54 = vpop.permute.xlu1 %2630  ;;  %v2756_v6 = vmul.f32 %v4387_v25, %v2625_v20  ;;  %3097 = vadd.xlane.f32.xlu0 %v3096_v33  ;;  %v2964_v42 = vadd.f32 %v2900_v34, %v2829_v41 }
 0x4e4   : > { %v2759_v58 = vmul.f32 %v4389_v35, %v2631_v54 }
 0x4e5   : > { %3094 = vadd.xlane.f32.xlu1 %v3093_v22  ;;  %v2898_v48 = vmul.f32 %v6463_v50, %v2756_v6  ;;  %v3153_v17 = vsel %vm2966_vm2, %v2964_v42, 0.0 }
 0x4e6   : > { %v2901_v12 = vmul.f32 %v6463_v50, %v2759_v58 }
 0x4e7   : > { %v2627_v43 = vpop.permute.xlu1 %2626  ;;  %3091 = vadd.xlane.f32.xlu0 %v3090_v8  ;;  %v2962_v13 = vadd.f32 %v2898_v48, %v2827_v38 }
 0x4e8   : > { %v2757_v0 = vmul.f32 %v4391_v7, %v2627_v43  ;;  %v2965_v23 = vadd.f32 %v2901_v12, %v2830_v53 }
 0x4e9   : > { %3088 = vadd.xlane.f32.xlu1 %v3087_v60  ;;  %v3147_v10 = vsel %vm2966_vm2, %v2962_v13, 0.0 }
 0x4ea   : > { %v2899_v46 = vmul.f32 %v6463_v50, %v2757_v0  ;;  %v3111_v50 = vsel %vm2966_vm2, %v6473_v44, 0.0  ;;  %v3144_v44 = vsel %vm2966_vm2, %v6551_v49, 0.0  ;;  %v3156_v49 = vsel %vm2966_vm2, %v2965_v23, 0.0 }
 0x4eb   : > { %3109 = vadd.xlane.f32.xlu0 %v3108_v31 }
 0x4ec   : > { %v2963_v55 = vadd.f32 %v2899_v46, %v2828_v19 }
 0x4ed   : > { %3106 = vadd.xlane.f32.xlu1 %v3105_v27 }
 0x4ee   : > { %v3150_v15 = vsel %vm2966_vm2, %v2963_v55, 0.0 }
 0x4ef   : > { %3103 = vadd.xlane.f32.xlu0 %v3102_v11 }
 0x4f1   : > { %3100 = vadd.xlane.f32.xlu1 %v3099_v52 }
 0x4f3   : > { %3121 = vadd.xlane.f32.xlu0 %v3120_v16 }
 0x4f5   : > { %3118 = vadd.xlane.f32.xlu1 %v3117_v32 }
 0x4f7   : > { %3115 = vadd.xlane.f32.xlu0 %v3114_v29 }
 0x4f9   : > { %3112 = vadd.xlane.f32.xlu1 %v3111_v50 }
 0x4fb   : > { %3133 = vadd.xlane.f32.xlu0 %v3132_v9 }
 0x4fd   : > { %3130 = vadd.xlane.f32.xlu1 %v3129_v37 }
 0x4ff   : > { %3127 = vadd.xlane.f32.xlu0 %v3126_v40 }
 0x501   : > { %3124 = vadd.xlane.f32.xlu1 %v3123_v18 }
 0x503   : > { %3145 = vadd.xlane.f32.xlu0 %v3144_v44 }
 0x505   : > { %3142 = vadd.xlane.f32.xlu1 %v3141_v2 }
 0x507   : > { %3139 = vadd.xlane.f32.xlu0 %v3138_v51 }
 0x509   : > { %3136 = vadd.xlane.f32.xlu1 %v3135_v5 }
 0x50b   : > { %3151 = vadd.xlane.f32.xlu0 %v3150_v15 }
 0x50d   : > { %3148 = vadd.xlane.f32.xlu1 %v3147_v10 }
 0x50f   : > { %3157 = vadd.xlane.f32.xlu0 %v3156_v49 }
 0x511   : > { %3154 = vadd.xlane.f32.xlu1 %v3153_v17 }
 0x51c   : > { %v2975_v62 = vpop.xlane.xlu0 %2974 }
 0x51d   : > { %v3168_v36 = vadd.f32 %v6626_v14, %v2975_v62 }
 0x51f   : > { %3233 = vst.msk [vmem:[%s6631_s23 + $0x10] sm:$0xff] %vm3230_vm3, %v3168_v36 }
 0x520   : > { %v2969_v61 = vpop.xlane.xlu0 %2968 }
 0x521   : > { %v3166_v24 = vadd.f32 %v6626_v14, %v2969_v61 }
 0x523   : > { %3231 = vst.msk [vmem:[%s6631_s23] sm:$0xff] %vm3230_vm3, %v3166_v24 }
 0x524   : > { %v2978_v28 = vpop.xlane.xlu0 %2977 }
 0x525   : > { %v3169_v21 = vadd.f32 %v6626_v14, %v2978_v28 }
 0x526   : > { %v2972_v57 = vpop.xlane.xlu1 %2971 }
 0x527   : > { %v3167_v47 = vadd.f32 %v6626_v14, %v2972_v57  ;;  %3234 = vst.msk [vmem:[%s6631_s23 + $0x18] sm:$0xff] %vm3230_vm3, %v3169_v21 }
 0x528   : > { %v2990_v4 = vpop.xlane.xlu0 %2989 }
 0x529   : > { %3232 = vst.msk [vmem:[%s6631_s23 + $0x8] sm:$0xff] %vm3230_vm3, %v3167_v47  ;;  %v3173_v56 = vadd.f32 %v6626_v14, %v2990_v4 }
 0x52a   : > { %v2987_v45 = vpop.xlane.xlu1 %2986 }
 0x52b   : > { %v3172_v30 = vadd.f32 %v6626_v14, %v2987_v45  ;;  %3238 = vst.msk [vmem:[%s6631_s23 + $0x38] sm:$0xff] %vm3230_vm3, %v3173_v56 }
 0x52c   : > { %v2984_v25 = vpop.xlane.xlu0 %2983 }
 0x52d   : > { %3237 = vst.msk [vmem:[%s6631_s23 + $0x30] sm:$0xff] %vm3230_vm3, %v3172_v30  ;;  %v3171_v41 = vadd.f32 %v6626_v14, %v2984_v25 }
 0x52e   : > { %v2981_v26 = vpop.xlane.xlu1 %2980 }
 0x52f   : > { %v3170_v34 = vadd.f32 %v6626_v14, %v2981_v26  ;;  %3236 = vst.msk [vmem:[%s6631_s23 + $0x28] sm:$0xff] %vm3230_vm3, %v3171_v41 }
 0x530   : > { %v3002_v35 = vpop.xlane.xlu0 %3001 }
 0x531   : > { %3235 = vst.msk [vmem:[%s6631_s23 + $0x20] sm:$0xff] %vm3230_vm3, %v3170_v34  ;;  %v3177_v20 = vadd.f32 %v6626_v14, %v3002_v35 }
 0x532   : > { %v2999_v54 = vpop.xlane.xlu1 %2998 }
 0x533   : > { %v3176_v33 = vadd.f32 %v6626_v14, %v2999_v54  ;;  %3242 = vst.msk [vmem:[%s6631_s23 + $0x58] sm:$0xff] %vm3230_vm3, %v3177_v20 }
 0x534   : > { %v2996_v58 = vpop.xlane.xlu0 %2995 }
 0x535   : > { %3241 = vst.msk [vmem:[%s6631_s23 + $0x50] sm:$0xff] %vm3230_vm3, %v3176_v33  ;;  %v3175_v22 = vadd.f32 %v6626_v14, %v2996_v58 }
 0x536   : > { %v2993_v59 = vpop.xlane.xlu1 %2992 }
 0x537   : > { %v3174_v6 = vadd.f32 %v6626_v14, %v2993_v59  ;;  %3240 = vst.msk [vmem:[%s6631_s23 + $0x48] sm:$0xff] %vm3230_vm3, %v3175_v22 }
 0x538   : > { %v3014_v42 = vpop.xlane.xlu0 %3013 }
 0x539   : > { %3239 = vst.msk [vmem:[%s6631_s23 + $0x40] sm:$0xff] %vm3230_vm3, %v3174_v6  ;;  %v3181_v38 = vadd.f32 %v6626_v14, %v3014_v42 }
 0x53a   : > { %v3011_v63 = vpop.xlane.xlu1 %3010 }
 0x53b   : > { %v3180_v1 = vadd.f32 %v6626_v14, %v3011_v63  ;;  %3246 = vst.msk [vmem:[%s6631_s23 + $0x78] sm:$0xff] %vm3230_vm3, %v3181_v38 }
 0x53c   : > { %v3008_v53 = vpop.xlane.xlu0 %3007 }
 0x53d   : > { %3245 = vst.msk [vmem:[%s6631_s23 + $0x70] sm:$0xff] %vm3230_vm3, %v3180_v1  ;;  %v3179_v48 = vadd.f32 %v6626_v14, %v3008_v53 }
 0x53e   : > { %v3005_v12 = vpop.xlane.xlu1 %3004 }
 0x53f   : > { %v3178_v7 = vadd.f32 %v6626_v14, %v3005_v12  ;;  %3244 = vst.msk [vmem:[%s6631_s23 + $0x68] sm:$0xff] %vm3230_vm3, %v3179_v48 }
 0x540   : > { %v3026_v43 = vpop.xlane.xlu0 %3025 }
 0x541   : > { %3243 = vst.msk [vmem:[%s6631_s23 + $0x60] sm:$0xff] %vm3230_vm3, %v3178_v7  ;;  %v3185_v0 = vadd.f32 %v6626_v14, %v3026_v43 }
 0x542   : > { %v3023_v8 = vpop.xlane.xlu1 %3022 }
 0x543   : > { %v3184_v39 = vadd.f32 %v6626_v14, %v3023_v8  ;;  %3250 = vst.msk [vmem:[%s6631_s23 + $0x98] sm:$0xff] %vm3230_vm3, %v3185_v0 }
 0x544   : > { %v3020_v60 = vpop.xlane.xlu0 %3019 }
 0x545   : > { %3249 = vst.msk [vmem:[%s6631_s23 + $0x90] sm:$0xff] %vm3230_vm3, %v3184_v39  ;;  %v3183_v23 = vadd.f32 %v6626_v14, %v3020_v60 }
 0x546   : > { %v3017_v13 = vpop.xlane.xlu1 %3016 }
 0x547   : > { %v3182_v3 = vadd.f32 %v6626_v14, %v3017_v13  ;;  %3248 = vst.msk [vmem:[%s6631_s23 + $0x88] sm:$0xff] %vm3230_vm3, %v3183_v23 }
 0x548   : > { %v3038_v19 = vpop.xlane.xlu0 %3037 }
 0x549   : > { %3247 = vst.msk [vmem:[%s6631_s23 + $0x80] sm:$0xff] %vm3230_vm3, %v3182_v3  ;;  %v3189_v31 = vadd.f32 %v6626_v14, %v3038_v19 }
 0x54a   : > { %v3035_v46 = vpop.xlane.xlu1 %3034 }
 0x54b   : > { %v3188_v27 = vadd.f32 %v6626_v14, %v3035_v46  ;;  %3254 = vst.msk [vmem:[%s6631_s23 + $0xb8] sm:$0xff] %vm3230_vm3, %v3189_v31 }
 0x54c   : > { %v3032_v55 = vpop.xlane.xlu0 %3031 }
 0x54d   : > { %3253 = vst.msk [vmem:[%s6631_s23 + $0xb0] sm:$0xff] %vm3230_vm3, %v3188_v27  ;;  %v3187_v52 = vadd.f32 %v6626_v14, %v3032_v55 }
 0x54e   : > { %v3029_v11 = vpop.xlane.xlu1 %3028 }
 0x54f   : > { %v3186_v16 = vadd.f32 %v6626_v14, %v3029_v11  ;;  %3252 = vst.msk [vmem:[%s6631_s23 + $0xa8] sm:$0xff] %vm3230_vm3, %v3187_v52 }
 0x550   : > { %v3050_v32 = vpop.xlane.xlu0 %3049 }
 0x551   : > { %3251 = vst.msk [vmem:[%s6631_s23 + $0xa0] sm:$0xff] %vm3230_vm3, %v3186_v16  ;;  %v3193_v50 = vadd.f32 %v6626_v14, %v3050_v32 }
 0x552   : > { %v3047_v29 = vpop.xlane.xlu1 %3046 }
 0x553   : > { %v3192_v9 = vadd.f32 %v6626_v14, %v3047_v29  ;;  %3258 = vst.msk [vmem:[%s6631_s23 + $0xd8] sm:$0xff] %vm3230_vm3, %v3193_v50 }
 0x554   : > { %v3044_v37 = vpop.xlane.xlu0 %3043 }
 0x555   : > { %3257 = vst.msk [vmem:[%s6631_s23 + $0xd0] sm:$0xff] %vm3230_vm3, %v3192_v9  ;;  %v3191_v18 = vadd.f32 %v6626_v14, %v3044_v37 }
 0x556   : > { %v3041_v40 = vpop.xlane.xlu1 %3040 }
 0x557   : > { %v3190_v44 = vadd.f32 %v6626_v14, %v3041_v40  ;;  %3256 = vst.msk [vmem:[%s6631_s23 + $0xc8] sm:$0xff] %vm3230_vm3, %v3191_v18 }
 0x558   : > { %v3062_v2 = vpop.xlane.xlu0 %3061 }
 0x559   : > { %3255 = vst.msk [vmem:[%s6631_s23 + $0xc0] sm:$0xff] %vm3230_vm3, %v3190_v44  ;;  %v3197_v5 = vadd.f32 %v6626_v14, %v3062_v2 }
 0x55a   : > { %v3059_v51 = vpop.xlane.xlu1 %3058 }
 0x55b   : > { %v3196_v15 = vadd.f32 %v6626_v14, %v3059_v51  ;;  %3262 = vst.msk [vmem:[%s6631_s23 + $0xf8] sm:$0xff] %vm3230_vm3, %v3197_v5 }
 0x55c   : > { %v3056_v10 = vpop.xlane.xlu0 %3055 }
 0x55d   : > { %3261 = vst.msk [vmem:[%s6631_s23 + $0xf0] sm:$0xff] %vm3230_vm3, %v3196_v15  ;;  %v3195_v17 = vadd.f32 %v6626_v14, %v3056_v10 }
 0x55e   : > { %v3053_v49 = vpop.xlane.xlu1 %3052 }
 0x55f   : > { %v3194_v62 = vadd.f32 %v6626_v14, %v3053_v49  ;;  %3260 = vst.msk [vmem:[%s6631_s23 + $0xe8] sm:$0xff] %vm3230_vm3, %v3195_v17 }
 0x560   : > { %v3074_v36 = vpop.xlane.xlu0 %3073 }
 0x561   : > { %3259 = vst.msk [vmem:[%s6631_s23 + $0xe0] sm:$0xff] %vm3230_vm3, %v3194_v62  ;;  %v3201_v24 = vadd.f32 %v6626_v14, %v3074_v36 }
 0x562   : > { %v3071_v61 = vpop.xlane.xlu1 %3070 }
 0x563   : > { %v3200_v28 = vadd.f32 %v6626_v14, %v3071_v61  ;;  %3266 = vst.msk [vmem:[%s6631_s23 + $0x118] sm:$0xff] %vm3230_vm3, %v3201_v24 }
 0x564   : > { %v3068_v57 = vpop.xlane.xlu0 %3067 }
 0x565   : > { %3265 = vst.msk [vmem:[%s6631_s23 + $0x110] sm:$0xff] %vm3230_vm3, %v3200_v28  ;;  %v3199_v47 = vadd.f32 %v6626_v14, %v3068_v57 }
 0x566   : > { %v3065_v21 = vpop.xlane.xlu1 %3064 }
 0x567   : > { %v3198_v4 = vadd.f32 %v6626_v14, %v3065_v21  ;;  %3264 = vst.msk [vmem:[%s6631_s23 + $0x108] sm:$0xff] %vm3230_vm3, %v3199_v47 }
 0x568   : > { %v3086_v45 = vpop.xlane.xlu0 %3085 }
 0x569   : > { %3263 = vst.msk [vmem:[%s6631_s23 + $0x100] sm:$0xff] %vm3230_vm3, %v3198_v4  ;;  %v3205_v30 = vadd.f32 %v6626_v14, %v3086_v45 }
 0x56a   : > { %v3083_v56 = vpop.xlane.xlu1 %3082 }
 0x56b   : > { %v3204_v25 = vadd.f32 %v6626_v14, %v3083_v56  ;;  %3270 = vst.msk [vmem:[%s6631_s23 + $0x138] sm:$0xff] %vm3230_vm3, %v3205_v30 }
 0x56c   : > { %v3080_v26 = vpop.xlane.xlu0 %3079 }
 0x56d   : > { %3269 = vst.msk [vmem:[%s6631_s23 + $0x130] sm:$0xff] %vm3230_vm3, %v3204_v25  ;;  %v3203_v34 = vadd.f32 %v6626_v14, %v3080_v26 }
 0x56e   : > { %v3077_v41 = vpop.xlane.xlu1 %3076 }
 0x56f   : > { %v3202_v35 = vadd.f32 %v6626_v14, %v3077_v41  ;;  %3268 = vst.msk [vmem:[%s6631_s23 + $0x128] sm:$0xff] %vm3230_vm3, %v3203_v34 }
 0x570   : > { %v3098_v54 = vpop.xlane.xlu0 %3097 }
 0x571   : > { %3267 = vst.msk [vmem:[%s6631_s23 + $0x120] sm:$0xff] %vm3230_vm3, %v3202_v35  ;;  %v3209_v33 = vadd.f32 %v6626_v14, %v3098_v54 }
 0x572   : > { %v3095_v20 = vpop.xlane.xlu1 %3094 }
 0x573   : > { %v3208_v58 = vadd.f32 %v6626_v14, %v3095_v20  ;;  %3274 = vst.msk [vmem:[%s6631_s23 + $0x158] sm:$0xff] %vm3230_vm3, %v3209_v33 }
 0x574   : > { %v3092_v59 = vpop.xlane.xlu0 %3091 }
 0x575   : > { %3273 = vst.msk [vmem:[%s6631_s23 + $0x150] sm:$0xff] %vm3230_vm3, %v3208_v58  ;;  %v3207_v6 = vadd.f32 %v6626_v14, %v3092_v59 }
 0x576   : > { %v3089_v22 = vpop.xlane.xlu1 %3088 }
 0x577   : > { %v3206_v42 = vadd.f32 %v6626_v14, %v3089_v22  ;;  %3272 = vst.msk [vmem:[%s6631_s23 + $0x148] sm:$0xff] %vm3230_vm3, %v3207_v6 }
 0x578   : > { %v3110_v63 = vpop.xlane.xlu0 %3109 }
 0x579   : > { %3271 = vst.msk [vmem:[%s6631_s23 + $0x140] sm:$0xff] %vm3230_vm3, %v3206_v42  ;;  %v3213_v1 = vadd.f32 %v6626_v14, %v3110_v63 }
 0x57a   : > { %v3107_v38 = vpop.xlane.xlu1 %3106 }
 0x57b   : > { %v3212_v53 = vadd.f32 %v6626_v14, %v3107_v38  ;;  %3278 = vst.msk [vmem:[%s6631_s23 + $0x178] sm:$0xff] %vm3230_vm3, %v3213_v1 }
 0x57c   : > { %v3104_v12 = vpop.xlane.xlu0 %3103 }
 0x57d   : > { %3277 = vst.msk [vmem:[%s6631_s23 + $0x170] sm:$0xff] %vm3230_vm3, %v3212_v53  ;;  %v3211_v7 = vadd.f32 %v6626_v14, %v3104_v12 }
 0x57e   : > { %v3101_v48 = vpop.xlane.xlu1 %3100 }
 0x57f   : > { %v3210_v43 = vadd.f32 %v6626_v14, %v3101_v48  ;;  %3276 = vst.msk [vmem:[%s6631_s23 + $0x168] sm:$0xff] %vm3230_vm3, %v3211_v7 }
 0x580   : > { %v3122_v8 = vpop.xlane.xlu0 %3121 }
 0x581   : > { %3275 = vst.msk [vmem:[%s6631_s23 + $0x160] sm:$0xff] %vm3230_vm3, %v3210_v43  ;;  %v3217_v39 = vadd.f32 %v6626_v14, %v3122_v8 }
 0x582   : > { %v3119_v0 = vpop.xlane.xlu1 %3118 }
 0x583   : > { %v3216_v60 = vadd.f32 %v6626_v14, %v3119_v0  ;;  %3282 = vst.msk [vmem:[%s6631_s23 + $0x198] sm:$0xff] %vm3230_vm3, %v3217_v39 }
 0x584   : > { %v3116_v13 = vpop.xlane.xlu0 %3115 }
 0x585   : > { %3281 = vst.msk [vmem:[%s6631_s23 + $0x190] sm:$0xff] %vm3230_vm3, %v3216_v60  ;;  %v3215_v3 = vadd.f32 %v6626_v14, %v3116_v13 }
 0x586   : > { %v3113_v23 = vpop.xlane.xlu1 %3112 }
 0x587   : > { %v3214_v19 = vadd.f32 %v6626_v14, %v3113_v23  ;;  %3280 = vst.msk [vmem:[%s6631_s23 + $0x188] sm:$0xff] %vm3230_vm3, %v3215_v3 }
 0x588   : > { %v3134_v46 = vpop.xlane.xlu0 %3133 }
 0x589   : > { %3279 = vst.msk [vmem:[%s6631_s23 + $0x180] sm:$0xff] %vm3230_vm3, %v3214_v19  ;;  %v3221_v27 = vadd.f32 %v6626_v14, %v3134_v46 }
 0x58a   : > { %v3131_v31 = vpop.xlane.xlu1 %3130 }
 0x58b   : > { %v3220_v55 = vadd.f32 %v6626_v14, %v3131_v31  ;;  %3286 = vst.msk [vmem:[%s6631_s23 + $0x1b8] sm:$0xff] %vm3230_vm3, %v3221_v27 }
 0x58c   : > { %v3128_v11 = vpop.xlane.xlu0 %3127 }
 0x58d   : > { %3285 = vst.msk [vmem:[%s6631_s23 + $0x1b0] sm:$0xff] %vm3230_vm3, %v3220_v55  ;;  %v3219_v16 = vadd.f32 %v6626_v14, %v3128_v11 }
 0x58e   : > { %v3125_v52 = vpop.xlane.xlu1 %3124 }
 0x58f   : > { %v3218_v32 = vadd.f32 %v6626_v14, %v3125_v52  ;;  %3284 = vst.msk [vmem:[%s6631_s23 + $0x1a8] sm:$0xff] %vm3230_vm3, %v3219_v16 }
 0x590   : > { %v3146_v29 = vpop.xlane.xlu0 %3145 }
 0x591   : > { %3283 = vst.msk [vmem:[%s6631_s23 + $0x1a0] sm:$0xff] %vm3230_vm3, %v3218_v32  ;;  %v3225_v9 = vadd.f32 %v6626_v14, %v3146_v29 }
 0x592   : > { %v3143_v50 = vpop.xlane.xlu1 %3142 }
 0x593   : > { %v3224_v37 = vadd.f32 %v6626_v14, %v3143_v50  ;;  %3290 = vst.msk [vmem:[%s6631_s23 + $0x1d8] sm:$0xff] %vm3230_vm3, %v3225_v9 }
 0x594   : > { %v3140_v40 = vpop.xlane.xlu0 %3139 }
 0x595   : > { %3289 = vst.msk [vmem:[%s6631_s23 + $0x1d0] sm:$0xff] %vm3230_vm3, %v3224_v37  ;;  %v3223_v44 = vadd.f32 %v6626_v14, %v3140_v40 }
 0x596   : > { %v3137_v18 = vpop.xlane.xlu1 %3136 }
 0x597   : > { %v3222_v2 = vadd.f32 %v6626_v14, %v3137_v18  ;;  %3288 = vst.msk [vmem:[%s6631_s23 + $0x1c8] sm:$0xff] %vm3230_vm3, %v3223_v44 }
 0x598   : > { %v3152_v51 = vpop.xlane.xlu0 %3151 }
 0x599   : > { %3287 = vst.msk [vmem:[%s6631_s23 + $0x1c0] sm:$0xff] %vm3230_vm3, %v3222_v2  ;;  %v3227_v15 = vadd.f32 %v6626_v14, %v3152_v51 }
 0x59a   : > { %v3149_v5 = vpop.xlane.xlu1 %3148 }
 0x59b   : > { %v3226_v10 = vadd.f32 %v6626_v14, %v3149_v5  ;;  %3292 = vst.msk [vmem:[%s6631_s23 + $0x1e8] sm:$0xff] %vm3230_vm3, %v3227_v15  ;;  %3302 = sbr.rel (!%p7201_p6) target bundleno = 1471 (0x5bf), region = 84 }
 0x59c   : > { %v3158_v49 = vpop.xlane.xlu0 %3157 }
 0x59d   : > { %3291 = vst.msk [vmem:[%s6631_s23 + $0x1e0] sm:$0xff] %vm3230_vm3, %v3226_v10  ;;  %v3229_v62 = vadd.f32 %v6626_v14, %v3158_v49 }
 0x59e   : > { %v3155_v17 = vpop.xlane.xlu1 %3154 }
 0x59f   : > { %v3228_v36 = vadd.f32 %v6626_v14, %v3155_v17  ;;  %3294 = vst.msk [vmem:[%s6631_s23 + $0x1f8] sm:$0xff] %vm3230_vm3, %v3229_v62 }
 0x5a1   : > { %3293 = vst.msk [vmem:[%s6631_s23 + $0x1f0] sm:$0xff] %vm3230_vm3, %v3228_v36 }
 0x5a2   : > { %s7214_s21 = smov (!%p3305_p5, %s3304_s21), 64 }
 0x5a3   : > { %s6828_s1 = sshll.u32 %s7214_s21, 7 }
 0x5a4   : > { %s3309_s22 = ssub.s32 8192, %s6828_s1 }
 0x5a5   : > { %3310 = vsyncadd %s3296_s27, %s3309_s22  ;;  %p3548_p11 = scmp.ne.s32.totalorder %s6828_s1, 0  ;;  %s3555_s18 = sshll.u32 %s4757_s7, 13 }
 0x5a6   : > { %s7202_s19 = sld [smem:[#allocation94_spill]]  ;;  %s3315_s25 = sshll.u32 %s6631_s23, 4  ;;  %s6841_s25 = int_to_ptr.vmem [resolvable:$true] %s3315_s25 }
 0x5a7   : > { %s4592_s8 = scalar_lea.vmem %s6841_s25, %s6828_s1  ;;  %s4685_s11 = smov [#allocation15]  }
 0x5a8   : > { %p4593_p13 = scmp.ne.s32.totalorder %s6841_s25, %s4592_s8  ;;  %s4596_s16 = sshll.u32 %s4685_s11, 4  ;;  %s4597_s16 = int_to_ptr.vmem [resolvable:$false] %s4596_s16 }
 0x5a9   : > { %s4598_s7 = scalar_lea.vmem %s4597_s16, 16384  ;;  %p4599_p7 = scmp.lt.s32.totalorder %s6841_s25, %s4597_s16 }
 0x5aa   : > { %p4594_p0 = pnand %p4593_p13, %p3548_p11  ;;  %p4600_p2 = scmp.lt.s32.totalorder %s4598_s7, %s4592_s8 }
 0x5ac   : > { %s6838_s29 = scalar_lea.hbm %s7202_s19, %s3555_s18  ;;  %p4595_p12 = pneg %p4594_p0 }
 0x5ad   : > { %p4601_p8 = por %p4600_p2, %p4599_p7 }
 0x5af   : > { %p4602_p9 = pnand %p4601_p8, %p4595_p12 }
 0x5b1   : > { %4605 = shalt.err (!%p4602_p9)
}
 0x5b2   : > { %s4606_s15 = scalar_lea.hbm %s6838_s29, %s6828_s1  ;;  %s4610_s17 = scalar_lea.hbm %s7202_s19, 9600 }
 0x5b3   : > { %p4607_p10 = scmp.ne.s32.totalorder %s6838_s29, %s4606_s15  ;;  %p4611_p6 = scmp.lt.u32.totalorder %s6838_s29, %s7202_s19 }
 0x5b4   : > { %p4612_p5 = scmp.lt.u32.totalorder %s4610_s17, %s4606_s15  ;;  %p4614_p0 = scmp.lt.u32.totalorder %s4606_s15, %s6838_s29 }
 0x5b5   : > { %p4608_p1 = pnand %p4607_p10, %p3548_p11 }
 0x5b6   : > { %p4613_p13 = por %p4612_p5, %p4611_p6 }
 0x5b7   : > { %p4609_p3 = pneg %p4608_p1 }
 0x5b8   : > { %p4615_p12 = por %p4614_p0, %p4613_p13 }
 0x5ba   : > { %p4616_p7 = pnand %p4615_p12, %p4609_p3 }
 0x5bc   : > { %4619 = shalt.err (!%p4616_p7)
}
 0x5bd   : > { %s4686_s13 = smov 128   ;;  %s4687_s21 = smov 8  }
 0x5be   : > { %3321 = dma.vmem_to_hbm [thread:$0]  (%p3548_p11), %s6841_s25, %s6828_s1, %s6838_s29, %s3296_s27, %s4686_s13, %s4686_s13, %s4687_s21  }
 0x5bf PF: > { %s7203_s22 = sld [smem:[#allocation21_spill]]  ;;  %s7204_s18 = sld [smem:[#allocation24_spill]] }
 0x5c5   : > { %s3330_s28 = sand.u32 1, %s7203_s22   ;;  %p7205_p2 = scmp.ne.s32.totalorder %s7204_s18, 0 }
 0x5c6   : > { %s3331_s14 = scalar_lea.sflag [#allocation5], %s3330_s28 }
 0x5c7   : > { %p3812_p8 = pnand %p3453_p4, %p7205_p2 }
 0x5c9   : > { %4653 = dma.done.wait (!%p3812_p8), %s3331_s14, 8192  }
 0x5ca   : > { %4655 = vsyncadd (!%p3812_p8), %s3331_s14, 4294959104  ;;  %s7206_s10 = sld [smem:[#allocation22_spill]]  ;;  %s7207_s8 = sld [smem:[#allocation23_spill]] }
 0x5cb   : > { %s7208_s29 = smov %s4662_s30  ;;  %s7209_s30 = smov %s4666_s9 }
 0x5d0   : > { %p26_p9 = scmp.ge.s32.totalorder %s7206_s10, 4   ;;  %s7210_s9 = smov %s7207_s8 }
 0x5d2   :  { %28 = sbr.rel (!%p26_p9) target bundleno = 11 (0xb), region = 121 }
 0x5d9   :  { %3336 = vsyncpa [#allocation4], 1 }
 0x5da   :  { %3338 = vsyncpa [#allocation4 + $0x1], 1 }
 0x5db   :  { %3339 = vsyncpa [#allocation7], 1 }
 0x5dc   :  { %3340 = vsyncpa [#allocation10], 1 }
 0x5dd   :  { %3341 = vsyncpa [#allocation13], 1 }
 0x5de   :  { %3342 = vsyncpa [#allocation5], 1 }
 0x5df   :  { %3344 = vsyncpa [#allocation5 + $0x1], 1 }

</bundles_post_ra>
